<compile_context>
chip_gen: v6e
topology: v6e:2x2x1
jax: 0.10.0
libtpu: 0.0.40
codegen_flags: <defaults>
</compile_context>

<pallas_src>
import math
import functools

import jax
import jax.numpy as jnp
from jax.experimental import pallas as pl
from jax.experimental.pallas import tpu as pltpu


def _round_up(x, m):
    return ((x + m - 1) // m) * m


# ----------------------------------------------------------------------------
# Kernel 1: row-tiled matmul + bias (used for patch embedding and all projections)
# ----------------------------------------------------------------------------
def _matmul_bias_kernel(x_ref, w_ref, b_ref, o_ref):
    acc = jnp.dot(x_ref[...], w_ref[...], preferred_element_type=jnp.float32)
    o_ref[...] = (acc + b_ref[...].astype(jnp.float32)).astype(o_ref.dtype)


def matmul_bias(x2d, w, b, *, tm=256):
    """x2d: (M, K), w: (K, N), b: (N,) -> (M, N)."""
    M, K = x2d.shape
    N = w.shape[1]
    tm_eff = min(tm, _round_up(M, 8))
    M_pad = _round_up(M, tm_eff)
    if M_pad != M:
        x2d = jnp.pad(x2d, ((0, M_pad - M), (0, 0)))
    out = pl.pallas_call(
        _matmul_bias_kernel,
        out_shape=jax.ShapeDtypeStruct((M_pad, N), x2d.dtype),
        grid_spec=pltpu.PrefetchScalarGridSpec(
            num_scalar_prefetch=0,
            grid=(M_pad // tm_eff,),
            in_specs=[
                pl.BlockSpec((tm_eff, K), lambda i: (i, 0)),
                pl.BlockSpec((K, N), lambda i: (0, 0)),
                pl.BlockSpec((1, N), lambda i: (0, 0)),
            ],
            out_specs=pl.BlockSpec((tm_eff, N), lambda i: (i, 0)),
        ),
        compiler_params=pltpu.CompilerParams(dimension_semantics=("parallel",)),
    )(x2d, w, b.reshape(1, N))
    return out[:M] if M_pad != M else out


# ----------------------------------------------------------------------------
# Kernel 2: fused scaled-dot-product attention (per chunk of heads)
# ----------------------------------------------------------------------------
def _attention_kernel(q_ref, k_ref, v_ref, o_ref, *, scale):
    q = q_ref[...].astype(jnp.float32)
    k = k_ref[...].astype(jnp.float32)
    v = v_ref[...].astype(jnp.float32)
    s = jnp.einsum('bqd,bkd->bqk', q, k, preferred_element_type=jnp.float32) * scale
    s = s - jnp.max(s, axis=-1, keepdims=True)
    p = jnp.exp(s)
    p = p / jnp.sum(p, axis=-1, keepdims=True)
    o = jnp.einsum('bqk,bkd->bqd', p, v, preferred_element_type=jnp.float32)
    o_ref[...] = o.astype(o_ref.dtype)


def attention(q, k, v, scale):
    """q: (BH, Sq, dh), k/v: (BH, Sk, dh) -> (BH, Sq, dh)."""
    BH, Sq, dh = q.shape
    Sk = k.shape[1]
    hb = 1
    for c in (8, 4, 2, 1):
        if BH % c == 0:
            hb = c
            break
    kern = functools.partial(_attention_kernel, scale=scale)
    return pl.pallas_call(
        kern,
        out_shape=jax.ShapeDtypeStruct((BH, Sq, dh), q.dtype),
        grid_spec=pltpu.PrefetchScalarGridSpec(
            num_scalar_prefetch=0,
            grid=(BH // hb,),
            in_specs=[
                pl.BlockSpec((hb, Sq, dh), lambda i: (i, 0, 0)),
                pl.BlockSpec((hb, Sk, dh), lambda i: (i, 0, 0)),
                pl.BlockSpec((hb, Sk, dh), lambda i: (i, 0, 0)),
            ],
            out_specs=pl.BlockSpec((hb, Sq, dh), lambda i: (i, 0, 0)),
        ),
        compiler_params=pltpu.CompilerParams(dimension_semantics=("parallel",)),
    )(q, k, v)


# ----------------------------------------------------------------------------
# Kernel 3: fused residual add + LayerNorm (PyTorch post-norm, eps=1e-5)
# ----------------------------------------------------------------------------
def _add_ln_kernel(x_ref, r_ref, g_ref, b_ref, o_ref):
    s = x_ref[...].astype(jnp.float32) + r_ref[...].astype(jnp.float32)
    mu = jnp.mean(s, axis=-1, keepdims=True)
    c = s - mu
    var = jnp.mean(c * c, axis=-1, keepdims=True)
    y = c * jax.lax.rsqrt(var + 1e-5)
    o_ref[...] = (y * g_ref[...].astype(jnp.float32)
                  + b_ref[...].astype(jnp.float32)).astype(o_ref.dtype)


def add_layernorm(x2d, r2d, gamma, beta, *, tm=256):
    """LayerNorm(x2d + r2d) * gamma + beta, rows tiled."""
    M, D = x2d.shape
    tm_eff = min(tm, _round_up(M, 8))
    M_pad = _round_up(M, tm_eff)
    if M_pad != M:
        x2d = jnp.pad(x2d, ((0, M_pad - M), (0, 0)))
        r2d = jnp.pad(r2d, ((0, M_pad - M), (0, 0)))
    out = pl.pallas_call(
        _add_ln_kernel,
        out_shape=jax.ShapeDtypeStruct((M_pad, D), x2d.dtype),
        grid_spec=pltpu.PrefetchScalarGridSpec(
            num_scalar_prefetch=0,
            grid=(M_pad // tm_eff,),
            in_specs=[
                pl.BlockSpec((tm_eff, D), lambda i: (i, 0)),
                pl.BlockSpec((tm_eff, D), lambda i: (i, 0)),
                pl.BlockSpec((1, D), lambda i: (0, 0)),
                pl.BlockSpec((1, D), lambda i: (0, 0)),
            ],
            out_specs=pl.BlockSpec((tm_eff, D), lambda i: (i, 0)),
        ),
        compiler_params=pltpu.CompilerParams(dimension_semantics=("parallel",)),
    )(x2d, r2d, gamma.reshape(1, D), beta.reshape(1, D))
    return out[:M] if M_pad != M else out


# ----------------------------------------------------------------------------
# Kernel 4: fused FFN  Linear -> ReLU -> Linear  (hidden dim tiled, f32 accumulator)
# ----------------------------------------------------------------------------
def _ffn_kernel(x_ref, w1_ref, b1_ref, w2_ref, b2_ref, o_ref, acc_ref):
    j = pl.program_id(1)

    @pl.when(j == 0)
    def _():
        acc_ref[...] = jnp.zeros_like(acc_ref)

    h = jnp.dot(x_ref[...], w1_ref[...], preferred_element_type=jnp.float32)
    h = h + b1_ref[...].astype(jnp.float32)
    h = jnp.maximum(h, 0.0)  # ReLU: PyTorch TransformerEncoder/DecoderLayer default activation
    acc_ref[...] += jnp.dot(h.astype(w2_ref.dtype), w2_ref[...],
                            preferred_element_type=jnp.float32)

    @pl.when(j == pl.num_programs(1) - 1)
    def _():
        o_ref[...] = (acc_ref[...] + b2_ref[...].astype(jnp.float32)).astype(o_ref.dtype)


def _pick_hidden_tile(hidden):
    for c in (512, 256, 128):
        if hidden % c == 0:
            return c
    return hidden


def feed_forward(x, w1, b1, w2, b2, *, tm=256, th=None):
    """x: (..., dim); w1: (dim, hidden); w2: (hidden, dim)."""
    orig_shape = x.shape
    dim = orig_shape[-1]
    hidden = w1.shape[1]

    x2d = x.reshape(-1, dim)
    M = x2d.shape[0]
    tm_eff = min(tm, _round_up(M, 8))
    M_pad = _round_up(M, tm_eff)
    if M_pad != M:
        x2d = jnp.pad(x2d, ((0, M_pad - M), (0, 0)))

    th_eff = th if th is not None else _pick_hidden_tile(hidden)
    assert hidden % th_eff == 0

    itemsize = jnp.dtype(x.dtype).itemsize
    w_itemsize = jnp.dtype(w1.dtype).itemsize
    cost = pl.CostEstimate(
        flops=4 * M_pad * dim * hidden,
        transcendentals=0,
        bytes_accessed=(2 * M_pad * dim * itemsize + 2 * dim * hidden * w_itemsize
                        + (hidden + dim) * jnp.dtype(b1.dtype).itemsize))

    vmem_need = (4 * tm_eff * dim * itemsize + 4 * dim * th_eff * w_itemsize
                 + 2 * (th_eff + dim) * w_itemsize + tm_eff * dim * 4 + 4 * tm_eff * th_eff)
    vmem_limit = int(min(max(vmem_need * 2, 32 * 1024 * 1024), 96 * 1024 * 1024))

    out = pl.pallas_call(
        _ffn_kernel,
        out_shape=jax.ShapeDtypeStruct((M_pad, dim), x.dtype),
        grid_spec=pltpu.PrefetchScalarGridSpec(
            num_scalar_prefetch=0,
            grid=(M_pad // tm_eff, hidden // th_eff),
            in_specs=[
                pl.BlockSpec((tm_eff, dim), lambda i, j: (i, 0)),
                pl.BlockSpec((dim, th_eff), lambda i, j: (0, j)),
                pl.BlockSpec((1, th_eff), lambda i, j: (0, j)),
                pl.BlockSpec((th_eff, dim), lambda i, j: (j, 0)),
                pl.BlockSpec((1, dim), lambda i, j: (0, 0)),
            ],
            out_specs=pl.BlockSpec((tm_eff, dim), lambda i, j: (i, 0)),
            scratch_shapes=[pltpu.VMEM((tm_eff, dim), jnp.float32)],
        ),
        compiler_params=pltpu.CompilerParams(
            dimension_semantics=("parallel", "arbitrary"),
            vmem_limit_bytes=vmem_limit),
        cost_estimate=cost,
    )(x2d, w1, b1.reshape(1, hidden), w2, b2.reshape(1, dim))

    if M_pad != M:
        out = out[:M]
    return out.reshape(orig_shape)


# ----------------------------------------------------------------------------
# Pure-JAX reference ops (same composition, used only for the correctness check)
# ----------------------------------------------------------------------------
def _ref_linear(x, w, b):
    return x @ w + b


def _ref_attention(q, k, v, scale):
    s = jnp.einsum('bqd,bkd->bqk', q, k) * scale
    p = jax.nn.softmax(s, axis=-1)
    return jnp.einsum('bqk,bkd->bqd', p, v)


def _ref_add_ln(x, r, g, b):
    s = x + r
    mu = s.mean(-1, keepdims=True)
    var = ((s - mu) ** 2).mean(-1, keepdims=True)
    return (s - mu) * jax.lax.rsqrt(var + 1e-5) * g + b


def _ref_ffn(x, w1, b1, w2, b2):
    return jnp.maximum(x @ w1 + b1, 0.0) @ w2 + b2


PALLAS_OPS = dict(linear=matmul_bias, attn=attention, add_ln=add_layernorm, ffn=feed_forward)
REF_OPS = dict(linear=_ref_linear, attn=_ref_attention, add_ln=_ref_add_ln, ffn=_ref_ffn)


# ----------------------------------------------------------------------------
# Model composition (mirrors the PyTorch module; seq-first like nn.Transformer*)
# ----------------------------------------------------------------------------
def mha(q, k, v, p, num_heads, ops):
    """q: (Sq, B, D), k/v: (Sk, B, D) -> (Sq, B, D).  Matches nn.MultiheadAttention (eval)."""
    Sq, B, D = q.shape
    Sk = k.shape[0]
    dh = D // num_heads
    q2 = q.reshape(Sq * B, D)
    k2 = k.reshape(Sk * B, D)
    v2 = v.reshape(Sk * B, D)

    if (k is q) and (v is q):               # self-attention: one packed QKV projection
        qkv = ops['linear'](q2,
                            jnp.concatenate([p['wq'], p['wk'], p['wv']], axis=1),
                            jnp.concatenate([p['bq'], p['bk'], p['bv']], axis=0))
        qq, kk, vv = qkv[:, :D], qkv[:, D:2 * D], qkv[:, 2 * D:]
    elif k is v:                             # cross-attention: packed KV projection
        qq = ops['linear'](q2, p['wq'], p['bq'])
        kv = ops['linear'](k2,
                           jnp.concatenate([p['wk'], p['wv']], axis=1),
                           jnp.concatenate([p['bk'], p['bv']], axis=0))
        kk, vv = kv[:, :D], kv[:, D:]
    else:
        qq = ops['linear'](q2, p['wq'], p['bq'])
        kk = ops['linear'](k2, p['wk'], p['bk'])
        vv = ops['linear'](v2, p['wv'], p['bv'])

    def split_heads(t, S):
        return t.reshape(S, B, num_heads, dh).transpose(1, 2, 0, 3).reshape(B * num_heads, S, dh)

    o = ops['attn'](split_heads(qq, Sq), split_heads(kk, Sk), split_heads(vv, Sk),
                    1.0 / math.sqrt(dh))
    o = o.reshape(B, num_heads, Sq, dh).transpose(2, 0, 1, 3).reshape(Sq * B, D)
    o = ops['linear'](o, p['wo'], p['bo'])
    return o.reshape(Sq, B, D)


def encoder_layer(x, p, num_heads, ops):
    S, B, D = x.shape
    x2 = x.reshape(S * B, D)
    sa = mha(x, x, x, p['self_attn'], num_heads, ops).reshape(S * B, D)
    x2 = ops['add_ln'](sa, x2, p['ln1_w'], p['ln1_b'])
    ff = ops['ffn'](x2, p['w1'], p['b1'], p['w2'], p['b2'])
    x2 = ops['add_ln'](ff, x2, p['ln2_w'], p['ln2_b'])
    return x2.reshape(S, B, D)


def decoder_layer(tgt, mem, p, num_heads, ops):
    S, B, D = tgt.shape
    t2 = tgt.reshape(S * B, D)
    sa = mha(tgt, tgt, tgt, p['self_attn'], num_heads, ops).reshape(S * B, D)
    t2 = ops['add_ln'](sa, t2, p['ln1_w'], p['ln1_b'])
    tgt = t2.reshape(S, B, D)
    ca = mha(tgt, mem, mem, p['cross_attn'], num_heads, ops).reshape(S * B, D)
    t2 = ops['add_ln'](ca, t2, p['ln2_w'], p['ln2_b'])
    ff = ops['ffn'](t2, p['w1'], p['b1'], p['w2'], p['b2'])
    t2 = ops['add_ln'](ff, t2, p['ln3_w'], p['ln3_b'])
    return t2.reshape(S, B, D)


def ummt_forward(input_frames, params, *, patch_size, num_heads, ops):
    B, C, H, W = input_frames.shape
    ps = patch_size
    hp, wp = H // ps, W // ps
    n = hp * wp
    D = params['cls_token'].shape[-1]

    # Conv2d(1, D, kernel=ps, stride=ps, bias=False) == unfold into patches + matmul.
    patches = input_frames.reshape(B, C, hp, ps, wp, ps).transpose(0, 2, 4, 1, 3, 5)
    patches = patches.reshape(B * n, C * ps * ps)
    x = ops['linear'](patches, params['patch_w'], params['patch_b']).reshape(B, n, D)

    cls = jnp.broadcast_to(params['cls_token'], (B, 1, D))
    x = jnp.concatenate([cls, x], axis=1)                  # (B, n+1, D)
    x = x + params['pos_embedding'][:, :n + 1]

    h = jnp.transpose(x, (1, 0, 2))                        # (n+1, B, D) seq-first
    for lp in params['encoder_layers']:
        h = encoder_layer(h, lp, num_heads, ops)
    x = jnp.transpose(h, (1, 0, 2))                        # (B, n+1, D)

    # The reference module passes batch-first tensors straight into the seq-first decoder;
    # reproduce exactly: tgt "seq"=B, "batch"=n+1; memory seq=1, "batch"=num_patches+1.
    mem = params['pos_embedding']                          # (1, num_patches+1, D)
    t = x
    for lp in params['decoder_layers']:
        t = decoder_layer(t, mem, lp, num_heads, ops)

    t = t[:, 1:, :]
    return jnp.mean(t, axis=1)
    # TODO(synk): lvid/lvot MLP heads (data_type != None path) not implemented.


# ----------------------------------------------------------------------------
# Parameter initialization (deterministic, PyTorch-Linear-like uniform bounds)
# ----------------------------------------------------------------------------
def _init_linear(key, fan_in, fan_out, dtype):
    kw, kb = jax.random.split(key)
    lim = 1.0 / math.sqrt(fan_in)
    return (jax.random.uniform(kw, (fan_in, fan_out), dtype, -lim, lim),
            jax.random.uniform(kb, (fan_out,), dtype, -lim, lim))


def _init_attn(key, D, dtype):
    ks = jax.random.split(key, 4)
    wq, bq = _init_linear(ks[0], D, D, dtype)
    wk, bk = _init_linear(ks[1], D, D, dtype)
    wv, bv = _init_linear(ks[2], D, D, dtype)
    wo, bo = _init_linear(ks[3], D, D, dtype)
    return dict(wq=wq, bq=bq, wk=wk, bk=bk, wv=wv, bv=bv, wo=wo, bo=bo)


def _init_enc_layer(key, D, F, dtype):
    ks = jax.random.split(key, 3)
    p = dict(self_attn=_init_attn(ks[0], D, dtype))
    p['w1'], p['b1'] = _init_linear(ks[1], D, F, dtype)
    p['w2'], p['b2'] = _init_linear(ks[2], F, D, dtype)
    p['ln1_w'] = jnp.ones((D,), dtype); p['ln1_b'] = jnp.zeros((D,), dtype)
    p['ln2_w'] = jnp.ones((D,), dtype); p['ln2_b'] = jnp.zeros((D,), dtype)
    return p


def _init_dec_layer(key, D, F, dtype):
    ks = jax.random.split(key, 4)
    p = dict(self_attn=_init_attn(ks[0], D, dtype),
             cross_attn=_init_attn(ks[1], D, dtype))
    p['w1'], p['b1'] = _init_linear(ks[2], D, F, dtype)
    p['w2'], p['b2'] = _init_linear(ks[3], F, D, dtype)
    for i in (1, 2, 3):
        p['ln%d_w' % i] = jnp.ones((D,), dtype)
        p['ln%d_b' % i] = jnp.zeros((D,), dtype)
    return p


if __name__ == "__main__":
    # Scaled-down UMMT: 64x64 image, 16x16 patches -> 16 patches (+cls = 17 tokens),
    # hidden_dim=128, 4 heads, 2 encoder + 2 decoder layers, dim_feedforward=256, batch=2.
    image_size, patch_size = 64, 16
    hidden_dim, num_heads, num_layers, ffn_dim = 128, 4, 2, 256
    batch = 2
    dtype = jnp.float32
    num_patches = (image_size // patch_size) ** 2

    key = jax.random.PRNGKey(0)
    k_frames, k_patch, k_pos, k_cls, k_enc, k_dec = jax.random.split(key, 6)

    params = dict(
        patch_w=jax.random.normal(k_patch, (patch_size * patch_size, hidden_dim), dtype) * 0.02,
        patch_b=jnp.zeros((hidden_dim,), dtype),           # Conv2d(bias=False)
        pos_embedding=jax.random.normal(k_pos, (1, num_patches + 1, hidden_dim), dtype),
        cls_token=jax.random.normal(k_cls, (1, 1, hidden_dim), dtype),
        encoder_layers=[_init_enc_layer(k, hidden_dim, ffn_dim, dtype)
                        for k in jax.random.split(k_enc, num_layers)],
        decoder_layers=[_init_dec_layer(k, hidden_dim, ffn_dim, dtype)
                        for k in jax.random.split(k_dec, num_layers)],
    )

    input_frames = jax.random.normal(k_frames, (batch, 1, image_size, image_size), dtype)

    fwd = jax.jit(functools.partial(ummt_forward, patch_size=patch_size,
                                    num_heads=num_heads, ops=PALLAS_OPS))
    out = jax.block_until_ready(fwd(input_frames, params))

    ref = ummt_forward(input_frames, params, patch_size=patch_size,
                       num_heads=num_heads, ops=REF_OPS)
    ref = jax.block_until_ready(ref)

    assert out.shape == (batch, hidden_dim) and out.dtype == dtype
    assert bool(jnp.all(jnp.isfinite(out)))
    assert jnp.allclose(out, ref, atol=2e-2, rtol=2e-2), float(jnp.max(jnp.abs(out - ref)))

    print("KERNEL_OK")
</pallas_src>

<mosaic_0001>
module attributes {stable_mosaic.version = 11 : i64} {
  func.func @_matmul_bias_kernel(%arg0: i32, %arg1: memref<32x256xf32, #tpu.memory_space<vmem>>, %arg2: memref<256x128xf32, #tpu.memory_space<vmem>>, %arg3: memref<1x128xf32, #tpu.memory_space<vmem>>, %arg4: memref<32x128xf32, #tpu.memory_space<vmem>>) attributes {dimension_semantics = [#tpu.dimension_semantics<parallel>], iteration_bounds = array<i64: 1>, scalar_prefetch = 0 : i64, scratch_operands = 0 : i64, tpu.core_type = #tpu.core_type<tc>, window_params = [{transform_indices = @transform_0, window_bounds = array<i64: 32, 256>}, {pipeline_mode = #tpu.pipeline_mode<synchronous>, transform_indices = @transform_1, window_bounds = array<i64: 256, 128>}, {pipeline_mode = #tpu.pipeline_mode<synchronous>, transform_indices = @transform_2, window_bounds = array<i64: 1, 128>}, {transform_indices = @transform_3, window_bounds = array<i64: 32, 128>}]} {
    %c0 = arith.constant 0 : index
    %c0_0 = arith.constant 0 : index
    %0 = vector.load %arg1[%c0, %c0_0] : memref<32x256xf32, #tpu.memory_space<vmem>>, vector<32x256xf32>
    %c0_1 = arith.constant 0 : index
    %c0_2 = arith.constant 0 : index
    %1 = vector.load %arg2[%c0_1, %c0_2] : memref<256x128xf32, #tpu.memory_space<vmem>>, vector<256x128xf32>
    %cst = arith.constant dense<0.000000e+00> : vector<32x128xf32>
    %2 = tpu.matmul %0, %1, %cst {dimension_numbers = #tpu.dot_dimension_numbers<[1], [0], [0], [1], [0, 0, 1, 1], [], []>} : vector<32x256xf32>, vector<256x128xf32>, vector<32x128xf32> -> vector<32x128xf32>
    %c0_3 = arith.constant 0 : index
    %c0_4 = arith.constant 0 : index
    %3 = vector.load %arg3[%c0_3, %c0_4] : memref<1x128xf32, #tpu.memory_space<vmem>>, vector<1x128xf32>
    %4 = vector.broadcast %3 : vector<1x128xf32> to vector<32x128xf32>
    %5 = arith.addf %2, %4 : vector<32x128xf32>
    %c0_5 = arith.constant 0 : index
    %c0_6 = arith.constant 0 : index
    %6 = vector.load %arg4[%c0_5, %c0_6] : memref<32x128xf32, #tpu.memory_space<vmem>>, vector<32x128xf32>
    tpu.vector_store %arg4[%c0_5, %c0_6], %5 {strides = array<i32>} : memref<32x128xf32, #tpu.memory_space<vmem>>, vector<32x128xf32>,
    return
  }
  func.func @transform_0(%arg0: i32) -> (i32, i32) {
    %c0_i32 = arith.constant 0 : i32
    %c0_i32_0 = arith.constant 0 : i32
    return %arg0, %c0_i32 : i32, i32
  }
  func.func @transform_1(%arg0: i32) -> (i32, i32) {
    %c0_i32 = arith.constant 0 : i32
    %c0_i32_0 = arith.constant 0 : i32
    %c0_i32_1 = arith.constant 0 : i32
    return %c0_i32, %c0_i32_0 : i32, i32
  }
  func.func @transform_2(%arg0: i32) -> (i32, i32) {
    %c0_i32 = arith.constant 0 : i32
    %c0_i32_0 = arith.constant 0 : i32
    %c0_i32_1 = arith.constant 0 : i32
    return %c0_i32, %c0_i32_0 : i32, i32
  }
  func.func @transform_3(%arg0: i32) -> (i32, i32) {
    %c0_i32 = arith.constant 0 : i32
    %c0_i32_0 = arith.constant 0 : i32
    return %arg0, %c0_i32 : i32, i32
  }
}

module attributes {stable_mosaic.version = 11 : i64} {
  func.func @_matmul_bias_kernel(%arg0: i32, %arg1: memref<40x128xf32, #tpu.memory_space<vmem>>, %arg2: memref<128x384xf32, #tpu.memory_space<vmem>>, %arg3: memref<1x384xf32, #tpu.memory_space<vmem>>, %arg4: memref<40x384xf32, #tpu.memory_space<vmem>>) attributes {dimension_semantics = [#tpu.dimension_semantics<parallel>], iteration_bounds = array<i64: 1>, scalar_prefetch = 0 : i64, scratch_operands = 0 : i64, tpu.core_type = #tpu.core_type<tc>, window_params = [{transform_indices = @transform_0, window_bounds = array<i64: 40, 128>}, {pipeline_mode = #tpu.pipeline_mode<synchronous>, transform_indices = @transform_1, window_bounds = array<i64: 128, 384>}, {pipeline_mode = #tpu.pipeline_mode<synchronous>, transform_indices = @transform_2, window_bounds = array<i64: 1, 384>}, {transform_indices = @transform_3, window_bounds = array<i64: 40, 384>}]} {
    %c0 = arith.constant 0 : index
    %c0_0 = arith.constant 0 : index
    %0 = vector.load %arg1[%c0, %c0_0] : memref<40x128xf32, #tpu.memory_space<vmem>>, vector<40x128xf32>
    %c0_1 = arith.constant 0 : index
    %c0_2 = arith.constant 0 : index
    %1 = vector.load %arg2[%c0_1, %c0_2] : memref<128x384xf32, #tpu.memory_space<vmem>>, vector<128x384xf32>
    %cst = arith.constant dense<0.000000e+00> : vector<40x384xf32>
    %2 = tpu.matmul %0, %1, %cst {dimension_numbers = #tpu.dot_dimension_numbers<[1], [0], [0], [1], [0, 0, 1, 1], [], []>} : vector<40x128xf32>, vector<128x384xf32>, vector<40x384xf32> -> vector<40x384xf32>
    %c0_3 = arith.constant 0 : index
    %c0_4 = arith.constant 0 : index
    %3 = vector.load %arg3[%c0_3, %c0_4] : memref<1x384xf32, #tpu.memory_space<vmem>>, vector<1x384xf32>
    %4 = vector.broadcast %3 : vector<1x384xf32> to vector<40x384xf32>
    %5 = arith.addf %2, %4 : vector<40x384xf32>
    %c0_5 = arith.constant 0 : index
    %c0_6 = arith.constant 0 : index
    %6 = vector.load %arg4[%c0_5, %c0_6] : memref<40x384xf32, #tpu.memory_space<vmem>>, vector<40x384xf32>
    tpu.vector_store %arg4[%c0_5, %c0_6], %5 {strides = array<i32>} : memref<40x384xf32, #tpu.memory_space<vmem>>, vector<40x384xf32>,
    return
  }
  func.func @transform_0(%arg0: i32) -> (i32, i32) {
    %c0_i32 = arith.constant 0 : i32
    %c0_i32_0 = arith.constant 0 : i32
    return %arg0, %c0_i32 : i32, i32
  }
  func.func @transform_1(%arg0: i32) -> (i32, i32) {
    %c0_i32 = arith.constant 0 : i32
    %c0_i32_0 = arith.constant 0 : i32
    %c0_i32_1 = arith.constant 0 : i32
    return %c0_i32, %c0_i32_0 : i32, i32
  }
  func.func @transform_2(%arg0: i32) -> (i32, i32) {
    %c0_i32 = arith.constant 0 : i32
    %c0_i32_0 = arith.constant 0 : i32
    %c0_i32_1 = arith.constant 0 : i32
    return %c0_i32, %c0_i32_0 : i32, i32
  }
  func.func @transform_3(%arg0: i32) -> (i32, i32) {
    %c0_i32 = arith.constant 0 : i32
    %c0_i32_0 = arith.constant 0 : i32
    return %arg0, %c0_i32 : i32, i32
  }
}

module attributes {stable_mosaic.version = 11 : i64} {
  func.func @_attention_kernel(%arg0: i32, %arg1: memref<8x17x32xf32, #tpu.memory_space<vmem>>, %arg2: memref<8x17x32xf32, #tpu.memory_space<vmem>>, %arg3: memref<8x17x32xf32, #tpu.memory_space<vmem>>, %arg4: memref<8x17x32xf32, #tpu.memory_space<vmem>>) attributes {dimension_semantics = [#tpu.dimension_semantics<parallel>], iteration_bounds = array<i64: 1>, scalar_prefetch = 0 : i64, scratch_operands = 0 : i64, tpu.core_type = #tpu.core_type<tc>, window_params = [{transform_indices = @transform_0, window_bounds = array<i64: 8, 17, 32>}, {transform_indices = @transform_1, window_bounds = array<i64: 8, 17, 32>}, {transform_indices = @transform_2, window_bounds = array<i64: 8, 17, 32>}, {transform_indices = @transform_3, window_bounds = array<i64: 8, 17, 32>}]} {
    %c0 = arith.constant 0 : index
    %c0_0 = arith.constant 0 : index
    %c0_1 = arith.constant 0 : index
    %0 = vector.load %arg1[%c0, %c0_0, %c0_1] : memref<8x17x32xf32, #tpu.memory_space<vmem>>, vector<8x17x32xf32>
    %c0_2 = arith.constant 0 : index
    %c0_3 = arith.constant 0 : index
    %c0_4 = arith.constant 0 : index
    %1 = vector.load %arg2[%c0_2, %c0_3, %c0_4] : memref<8x17x32xf32, #tpu.memory_space<vmem>>, vector<8x17x32xf32>
    %c0_5 = arith.constant 0 : index
    %c0_6 = arith.constant 0 : index
    %c0_7 = arith.constant 0 : index
    %2 = vector.load %arg3[%c0_5, %c0_6, %c0_7] : memref<8x17x32xf32, #tpu.memory_space<vmem>>, vector<8x17x32xf32>
    "tpu.trace_start"() <{level = 10 : i32, message = "bqd,bkd->bqk"}> : () -> ()
    %cst = arith.constant dense<0.000000e+00> : vector<8x17x17xf32>
    %3 = tpu.matmul %0, %1, %cst {dimension_numbers = #tpu.dot_dimension_numbers<[2], [2], [1], [1], [0, 0, 0, 1, 1, 1], [0], [0]>} : vector<8x17x32xf32>, vector<8x17x32xf32>, vector<8x17x17xf32> -> vector<8x17x17xf32>
    "tpu.trace_stop"() : () -> ()
    %cst_8 = arith.constant 0.176776692 : f32
    %4 = vector.broadcast %cst_8 : f32 to vector<8x17x17xf32>
    %5 = arith.mulf %3, %4 : vector<8x17x17xf32>
    %cst_9 = arith.constant dense<0xFF800000> : vector<8x17xf32>
    %6 = vector.multi_reduction <maximumf>, %5, %cst_9 [2] : vector<8x17x17xf32> to vector<8x17xf32>
    %7 = vector.shape_cast %6 : vector<8x17xf32> to vector<8x17x1xf32>
    %8 = vector.broadcast %7 : vector<8x17x1xf32> to vector<8x17x17xf32>
    %9 = arith.subf %5, %8 : vector<8x17x17xf32>
    %10 = math.exp %9 : vector<8x17x17xf32>
    %cst_10 = arith.constant dense<0.000000e+00> : vector<8x17xf32>
    %11 = vector.multi_reduction <add>, %10, %cst_10 [2] : vector<8x17x17xf32> to vector<8x17xf32>
    %12 = vector.shape_cast %11 : vector<8x17xf32> to vector<8x17x1xf32>
    %13 = vector.broadcast %12 : vector<8x17x1xf32> to vector<8x17x17xf32>
    %14 = arith.divf %10, %13 : vector<8x17x17xf32>
    "tpu.trace_start"() <{level = 10 : i32, message = "bqk,bkd->bqd"}> : () -> ()
    %cst_11 = arith.constant dense<0.000000e+00> : vector<8x17x32xf32>
    %15 = tpu.matmul %14, %2, %cst_11 {dimension_numbers = #tpu.dot_dimension_numbers<[2], [1], [1], [2], [0, 0, 0, 1, 1, 2], [0], [0]>} : vector<8x17x17xf32>, vector<8x17x32xf32>, vector<8x17x32xf32> -> vector<8x17x32xf32>
    "tpu.trace_stop"() : () -> ()
    %c0_12 = arith.constant 0 : index
    %c0_13 = arith.constant 0 : index
    %c0_14 = arith.constant 0 : index
    %16 = vector.load %arg4[%c0_12, %c0_13, %c0_14] : memref<8x17x32xf32, #tpu.memory_space<vmem>>, vector<8x17x32xf32>
    tpu.vector_store %arg4[%c0_12, %c0_13, %c0_14], %15 {strides = array<i32>} : memref<8x17x32xf32, #tpu.memory_space<vmem>>, vector<8x17x32xf32>,
    return
  }
  func.func @transform_0(%arg0: i32) -> (i32, i32, i32) {
    %c0_i32 = arith.constant 0 : i32
    %c0_i32_0 = arith.constant 0 : i32
    %c0_i32_1 = arith.constant 0 : i32
    return %arg0, %c0_i32, %c0_i32_0 : i32, i32, i32
  }
  func.func @transform_1(%arg0: i32) -> (i32, i32, i32) {
    %c0_i32 = arith.constant 0 : i32
    %c0_i32_0 = arith.constant 0 : i32
    %c0_i32_1 = arith.constant 0 : i32
    return %arg0, %c0_i32, %c0_i32_0 : i32, i32, i32
  }
  func.func @transform_2(%arg0: i32) -> (i32, i32, i32) {
    %c0_i32 = arith.constant 0 : i32
    %c0_i32_0 = arith.constant 0 : i32
    %c0_i32_1 = arith.constant 0 : i32
    return %arg0, %c0_i32, %c0_i32_0 : i32, i32, i32
  }
  func.func @transform_3(%arg0: i32) -> (i32, i32, i32) {
    %c0_i32 = arith.constant 0 : i32
    %c0_i32_0 = arith.constant 0 : i32
    %c0_i32_1 = arith.constant 0 : i32
    return %arg0, %c0_i32, %c0_i32_0 : i32, i32, i32
  }
}

module attributes {stable_mosaic.version = 11 : i64} {
  func.func @_matmul_bias_kernel(%arg0: i32, %arg1: memref<40x128xf32, #tpu.memory_space<vmem>>, %arg2: memref<128x128xf32, #tpu.memory_space<vmem>>, %arg3: memref<1x128xf32, #tpu.memory_space<vmem>>, %arg4: memref<40x128xf32, #tpu.memory_space<vmem>>) attributes {dimension_semantics = [#tpu.dimension_semantics<parallel>], iteration_bounds = array<i64: 1>, scalar_prefetch = 0 : i64, scratch_operands = 0 : i64, tpu.core_type = #tpu.core_type<tc>, window_params = [{transform_indices = @transform_0, window_bounds = array<i64: 40, 128>}, {pipeline_mode = #tpu.pipeline_mode<synchronous>, transform_indices = @transform_1, window_bounds = array<i64: 128, 128>}, {pipeline_mode = #tpu.pipeline_mode<synchronous>, transform_indices = @transform_2, window_bounds = array<i64: 1, 128>}, {transform_indices = @transform_3, window_bounds = array<i64: 40, 128>}]} {
    %c0 = arith.constant 0 : index
    %c0_0 = arith.constant 0 : index
    %0 = vector.load %arg1[%c0, %c0_0] : memref<40x128xf32, #tpu.memory_space<vmem>>, vector<40x128xf32>
    %c0_1 = arith.constant 0 : index
    %c0_2 = arith.constant 0 : index
    %1 = vector.load %arg2[%c0_1, %c0_2] : memref<128x128xf32, #tpu.memory_space<vmem>>, vector<128x128xf32>
    %cst = arith.constant dense<0.000000e+00> : vector<40x128xf32>
    %2 = tpu.matmul %0, %1, %cst {dimension_numbers = #tpu.dot_dimension_numbers<[1], [0], [0], [1], [0, 0, 1, 1], [], []>} : vector<40x128xf32>, vector<128x128xf32>, vector<40x128xf32> -> vector<40x128xf32>
    %c0_3 = arith.constant 0 : index
    %c0_4 = arith.constant 0 : index
    %3 = vector.load %arg3[%c0_3, %c0_4] : memref<1x128xf32, #tpu.memory_space<vmem>>, vector<1x128xf32>
    %4 = vector.broadcast %3 : vector<1x128xf32> to vector<40x128xf32>
    %5 = arith.addf %2, %4 : vector<40x128xf32>
    %c0_5 = arith.constant 0 : index
    %c0_6 = arith.constant 0 : index
    %6 = vector.load %arg4[%c0_5, %c0_6] : memref<40x128xf32, #tpu.memory_space<vmem>>, vector<40x128xf32>
    tpu.vector_store %arg4[%c0_5, %c0_6], %5 {strides = array<i32>} : memref<40x128xf32, #tpu.memory_space<vmem>>, vector<40x128xf32>,
    return
  }
  func.func @transform_0(%arg0: i32) -> (i32, i32) {
    %c0_i32 = arith.constant 0 : i32
    %c0_i32_0 = arith.constant 0 : i32
    return %arg0, %c0_i32 : i32, i32
  }
  func.func @transform_1(%arg0: i32) -> (i32, i32) {
    %c0_i32 = arith.constant 0 : i32
    %c0_i32_0 = arith.constant 0 : i32
    %c0_i32_1 = arith.constant 0 : i32
    return %c0_i32, %c0_i32_0 : i32, i32
  }
  func.func @transform_2(%arg0: i32) -> (i32, i32) {
    %c0_i32 = arith.constant 0 : i32
    %c0_i32_0 = arith.constant 0 : i32
    %c0_i32_1 = arith.constant 0 : i32
    return %c0_i32, %c0_i32_0 : i32, i32
  }
  func.func @transform_3(%arg0: i32) -> (i32, i32) {
    %c0_i32 = arith.constant 0 : i32
    %c0_i32_0 = arith.constant 0 : i32
    return %arg0, %c0_i32 : i32, i32
  }
}

module attributes {stable_mosaic.version = 11 : i64} {
  func.func @_add_ln_kernel(%arg0: i32, %arg1: memref<40x128xf32, #tpu.memory_space<vmem>>, %arg2: memref<40x128xf32, #tpu.memory_space<vmem>>, %arg3: memref<1x128xf32, #tpu.memory_space<vmem>>, %arg4: memref<1x128xf32, #tpu.memory_space<vmem>>, %arg5: memref<40x128xf32, #tpu.memory_space<vmem>>) attributes {dimension_semantics = [#tpu.dimension_semantics<parallel>], iteration_bounds = array<i64: 1>, scalar_prefetch = 0 : i64, scratch_operands = 0 : i64, tpu.core_type = #tpu.core_type<tc>, window_params = [{transform_indices = @transform_0, window_bounds = array<i64: 40, 128>}, {transform_indices = @transform_1, window_bounds = array<i64: 40, 128>}, {pipeline_mode = #tpu.pipeline_mode<synchronous>, transform_indices = @transform_2, window_bounds = array<i64: 1, 128>}, {pipeline_mode = #tpu.pipeline_mode<synchronous>, transform_indices = @transform_3, window_bounds = array<i64: 1, 128>}, {transform_indices = @transform_4, window_bounds = array<i64: 40, 128>}]} {
    %c0 = arith.constant 0 : index
    %c0_0 = arith.constant 0 : index
    %0 = vector.load %arg1[%c0, %c0_0] : memref<40x128xf32, #tpu.memory_space<vmem>>, vector<40x128xf32>
    %c0_1 = arith.constant 0 : index
    %c0_2 = arith.constant 0 : index
    %1 = vector.load %arg2[%c0_1, %c0_2] : memref<40x128xf32, #tpu.memory_space<vmem>>, vector<40x128xf32>
    %2 = arith.addf %0, %1 : vector<40x128xf32>
    %cst = arith.constant dense<0.000000e+00> : vector<40xf32>
    %3 = vector.multi_reduction <add>, %2, %cst [1] : vector<40x128xf32> to vector<40xf32>
    %4 = vector.shape_cast %3 : vector<40xf32> to vector<40x1xf32>
    %cst_3 = arith.constant 1.280000e+02 : f32
    %5 = vector.broadcast %cst_3 : f32 to vector<40x1xf32>
    %6 = arith.divf %4, %5 : vector<40x1xf32>
    %7 = vector.broadcast %6 : vector<40x1xf32> to vector<40x128xf32>
    %8 = arith.subf %2, %7 : vector<40x128xf32>
    %9 = arith.mulf %8, %8 : vector<40x128xf32>
    %cst_4 = arith.constant dense<0.000000e+00> : vector<40xf32>
    %10 = vector.multi_reduction <add>, %9, %cst_4 [1] : vector<40x128xf32> to vector<40xf32>
    %11 = vector.shape_cast %10 : vector<40xf32> to vector<40x1xf32>
    %cst_5 = arith.constant 1.280000e+02 : f32
    %12 = vector.broadcast %cst_5 : f32 to vector<40x1xf32>
    %13 = arith.divf %11, %12 : vector<40x1xf32>
    %cst_6 = arith.constant 9.99999974E-6 : f32
    %14 = vector.broadcast %cst_6 : f32 to vector<40x1xf32>
    %15 = arith.addf %13, %14 : vector<40x1xf32>
    %16 = math.rsqrt %15 : vector<40x1xf32>
    %17 = vector.broadcast %16 : vector<40x1xf32> to vector<40x128xf32>
    %18 = arith.mulf %8, %17 : vector<40x128xf32>
    %c0_7 = arith.constant 0 : index
    %c0_8 = arith.constant 0 : index
    %19 = vector.load %arg3[%c0_7, %c0_8] : memref<1x128xf32, #tpu.memory_space<vmem>>, vector<1x128xf32>
    %20 = vector.broadcast %19 : vector<1x128xf32> to vector<40x128xf32>
    %21 = arith.mulf %18, %20 : vector<40x128xf32>
    %c0_9 = arith.constant 0 : index
    %c0_10 = arith.constant 0 : index
    %22 = vector.load %arg4[%c0_9, %c0_10] : memref<1x128xf32, #tpu.memory_space<vmem>>, vector<1x128xf32>
    %23 = vector.broadcast %22 : vector<1x128xf32> to vector<40x128xf32>
    %24 = arith.addf %21, %23 : vector<40x128xf32>
    %c0_11 = arith.constant 0 : index
    %c0_12 = arith.constant 0 : index
    %25 = vector.load %arg5[%c0_11, %c0_12] : memref<40x128xf32, #tpu.memory_space<vmem>>, vector<40x128xf32>
    tpu.vector_store %arg5[%c0_11, %c0_12], %24 {strides = array<i32>} : memref<40x128xf32, #tpu.memory_space<vmem>>, vector<40x128xf32>,
    return
  }
  func.func @transform_0(%arg0: i32) -> (i32, i32) {
    %c0_i32 = arith.constant 0 : i32
    %c0_i32_0 = arith.constant 0 : i32
    return %arg0, %c0_i32 : i32, i32
  }
  func.func @transform_1(%arg0: i32) -> (i32, i32) {
    %c0_i32 = arith.constant 0 : i32
    %c0_i32_0 = arith.constant 0 : i32
    return %arg0, %c0_i32 : i32, i32
  }
  func.func @transform_2(%arg0: i32) -> (i32, i32) {
    %c0_i32 = arith.constant 0 : i32
    %c0_i32_0 = arith.constant 0 : i32
    %c0_i32_1 = arith.constant 0 : i32
    return %c0_i32, %c0_i32_0 : i32, i32
  }
  func.func @transform_3(%arg0: i32) -> (i32, i32) {
    %c0_i32 = arith.constant 0 : i32
    %c0_i32_0 = arith.constant 0 : i32
    %c0_i32_1 = arith.constant 0 : i32
    return %c0_i32, %c0_i32_0 : i32, i32
  }
  func.func @transform_4(%arg0: i32) -> (i32, i32) {
    %c0_i32 = arith.constant 0 : i32
    %c0_i32_0 = arith.constant 0 : i32
    return %arg0, %c0_i32 : i32, i32
  }
}

module attributes {stable_mosaic.version = 11 : i64} {
  func.func @_ffn_kernel(%arg0: i32, %arg1: i32, %arg2: memref<40x128xf32, #tpu.memory_space<vmem>>, %arg3: memref<128x256xf32, #tpu.memory_space<vmem>>, %arg4: memref<1x256xf32, #tpu.memory_space<vmem>>, %arg5: memref<256x128xf32, #tpu.memory_space<vmem>>, %arg6: memref<1x128xf32, #tpu.memory_space<vmem>>, %arg7: memref<40x128xf32, #tpu.memory_space<vmem>>, %arg8: memref<40x128xf32, #tpu.memory_space<vmem>>) attributes {dimension_semantics = [#tpu.dimension_semantics<parallel>, #tpu.dimension_semantics<arbitrary>], iteration_bounds = array<i64: 1, 1>, scalar_prefetch = 0 : i64, scratch_operands = 1 : i64, tpu.core_type = #tpu.core_type<tc>, window_params = [{transform_indices = @transform_0, window_bounds = array<i64: 40, 128>}, {transform_indices = @transform_1, window_bounds = array<i64: 128, 256>}, {transform_indices = @transform_2, window_bounds = array<i64: 1, 256>}, {transform_indices = @transform_3, window_bounds = array<i64: 256, 128>}, {pipeline_mode = #tpu.pipeline_mode<synchronous>, transform_indices = @transform_4, window_bounds = array<i64: 1, 128>}, {transform_indices = @transform_5, window_bounds = array<i64: 40, 128>}]} {
    %c0_i32 = arith.constant 0 : i32
    %0 = arith.cmpi eq, %arg1, %c0_i32 : i32
    %1 = arith.extui %0 : i1 to i32
    %c0_i32_0 = arith.constant 0 : i32
    %2 = arith.cmpi ne, %1, %c0_i32_0 : i32
    scf.if %2 {
      %cst_16 = arith.constant 0.000000e+00 : f32
      %19 = vector.broadcast %cst_16 : f32 to vector<40x128xf32>
      %c0_17 = arith.constant 0 : index
      %c0_18 = arith.constant 0 : index
      %20 = vector.load %arg8[%c0_17, %c0_18] : memref<40x128xf32, #tpu.memory_space<vmem>>, vector<40x128xf32>
      tpu.vector_store %arg8[%c0_17, %c0_18], %19 {strides = array<i32>} : memref<40x128xf32, #tpu.memory_space<vmem>>, vector<40x128xf32>,
    } else {
    }
    %c0 = arith.constant 0 : index
    %c0_1 = arith.constant 0 : index
    %3 = vector.load %arg2[%c0, %c0_1] : memref<40x128xf32, #tpu.memory_space<vmem>>, vector<40x128xf32>
    %c0_2 = arith.constant 0 : index
    %c0_3 = arith.constant 0 : index
    %4 = vector.load %arg3[%c0_2, %c0_3] : memref<128x256xf32, #tpu.memory_space<vmem>>, vector<128x256xf32>
    %cst = arith.constant dense<0.000000e+00> : vector<40x256xf32>
    %5 = tpu.matmul %3, %4, %cst {dimension_numbers = #tpu.dot_dimension_numbers<[1], [0], [0], [1], [0, 0, 1, 1], [], []>} : vector<40x128xf32>, vector<128x256xf32>, vector<40x256xf32> -> vector<40x256xf32>
    %c0_4 = arith.constant 0 : index
    %c0_5 = arith.constant 0 : index
    %6 = vector.load %arg4[%c0_4, %c0_5] : memref<1x256xf32, #tpu.memory_space<vmem>>, vector<1x256xf32>
    %7 = vector.broadcast %6 : vector<1x256xf32> to vector<40x256xf32>
    %8 = arith.addf %5, %7 : vector<40x256xf32>
    %cst_6 = arith.constant 0.000000e+00 : f32
    %9 = vector.broadcast %cst_6 : f32 to vector<40x256xf32>
    %10 = arith.maximumf %8, %9 : vector<40x256xf32>
    %c0_7 = arith.constant 0 : index
    %c0_8 = arith.constant 0 : index
    %11 = vector.load %arg8[%c0_7, %c0_8] : memref<40x128xf32, #tpu.memory_space<vmem>>, vector<40x128xf32>
    %c0_9 = arith.constant 0 : index
    %c0_10 = arith.constant 0 : index
    %12 = vector.load %arg5[%c0_9, %c0_10] : memref<256x128xf32, #tpu.memory_space<vmem>>, vector<256x128xf32>
    %cst_11 = arith.constant dense<0.000000e+00> : vector<40x128xf32>
    %13 = tpu.matmul %10, %12, %cst_11 {dimension_numbers = #tpu.dot_dimension_numbers<[1], [0], [0], [1], [0, 0, 1, 1], [], []>} : vector<40x256xf32>, vector<256x128xf32>, vector<40x128xf32> -> vector<40x128xf32>
    %14 = arith.addf %11, %13 : vector<40x128xf32>
    %c0_12 = arith.constant 0 : index
    %c0_13 = arith.constant 0 : index
    %15 = vector.load %arg8[%c0_12, %c0_13] : memref<40x128xf32, #tpu.memory_space<vmem>>, vector<40x128xf32>
    tpu.vector_store %arg8[%c0_12, %c0_13], %14 {strides = array<i32>} : memref<40x128xf32, #tpu.memory_space<vmem>>, vector<40x128xf32>,
    %c0_i32_14 = arith.constant 0 : i32
    %16 = arith.cmpi eq, %arg1, %c0_i32_14 : i32
    %17 = arith.extui %16 : i1 to i32
    %c0_i32_15 = arith.constant 0 : i32
    %18 = arith.cmpi ne, %17, %c0_i32_15 : i32
    scf.if %18 {
      %c0_16 = arith.constant 0 : index
      %c0_17 = arith.constant 0 : index
      %19 = vector.load %arg8[%c0_16, %c0_17] : memref<40x128xf32, #tpu.memory_space<vmem>>, vector<40x128xf32>
      %c0_18 = arith.constant 0 : index
      %c0_19 = arith.constant 0 : index
      %20 = vector.load %arg6[%c0_18, %c0_19] : memref<1x128xf32, #tpu.memory_space<vmem>>, vector<1x128xf32>
      %21 = vector.broadcast %20 : vector<1x128xf32> to vector<40x128xf32>
      %22 = arith.addf %19, %21 : vector<40x128xf32>
      %c0_20 = arith.constant 0 : index
      %c0_21 = arith.constant 0 : index
      %23 = vector.load %arg7[%c0_20, %c0_21] : memref<40x128xf32, #tpu.memory_space<vmem>>, vector<40x128xf32>
      tpu.vector_store %arg7[%c0_20, %c0_21], %22 {strides = array<i32>} : memref<40x128xf32, #tpu.memory_space<vmem>>, vector<40x128xf32>,
    } else {
    }
    return
  }
  func.func @transform_0(%arg0: i32, %arg1: i32) -> (i32, i32) {
    %c0_i32 = arith.constant 0 : i32
    %c0_i32_0 = arith.constant 0 : i32
    return %arg0, %c0_i32 : i32, i32
  }
  func.func @transform_1(%arg0: i32, %arg1: i32) -> (i32, i32) {
    %c0_i32 = arith.constant 0 : i32
    %c0_i32_0 = arith.constant 0 : i32
    return %c0_i32, %arg1 : i32, i32
  }
  func.func @transform_2(%arg0: i32, %arg1: i32) -> (i32, i32) {
    %c0_i32 = arith.constant 0 : i32
    %c0_i32_0 = arith.constant 0 : i32
    return %c0_i32, %arg1 : i32, i32
  }
  func.func @transform_3(%arg0: i32, %arg1: i32) -> (i32, i32) {
    %c0_i32 = arith.constant 0 : i32
    %c0_i32_0 = arith.constant 0 : i32
    return %arg1, %c0_i32 : i32, i32
  }
  func.func @transform_4(%arg0: i32, %arg1: i32) -> (i32, i32) {
    %c0_i32 = arith.constant 0 : i32
    %c0_i32_0 = arith.constant 0 : i32
    %c0_i32_1 = arith.constant 0 : i32
    return %c0_i32, %c0_i32_0 : i32, i32
  }
  func.func @transform_5(%arg0: i32, %arg1: i32) -> (i32, i32) {
    %c0_i32 = arith.constant 0 : i32
    %c0_i32_0 = arith.constant 0 : i32
    return %arg0, %c0_i32 : i32, i32
  }
}

module attributes {stable_mosaic.version = 11 : i64} {
  func.func @_attention_kernel(%arg0: i32, %arg1: memref<4x2x32xf32, #tpu.memory_space<vmem>>, %arg2: memref<4x2x32xf32, #tpu.memory_space<vmem>>, %arg3: memref<4x2x32xf32, #tpu.memory_space<vmem>>, %arg4: memref<4x2x32xf32, #tpu.memory_space<vmem>>) attributes {dimension_semantics = [#tpu.dimension_semantics<parallel>], iteration_bounds = array<i64: 17>, scalar_prefetch = 0 : i64, scratch_operands = 0 : i64, tpu.core_type = #tpu.core_type<tc>, window_params = [{transform_indices = @transform_0, window_bounds = array<i64: 4, 2, 32>}, {transform_indices = @transform_1, window_bounds = array<i64: 4, 2, 32>}, {transform_indices = @transform_2, window_bounds = array<i64: 4, 2, 32>}, {transform_indices = @transform_3, window_bounds = array<i64: 4, 2, 32>}]} {
    %c0 = arith.constant 0 : index
    %c0_0 = arith.constant 0 : index
    %c0_1 = arith.constant 0 : index
    %0 = vector.load %arg1[%c0, %c0_0, %c0_1] : memref<4x2x32xf32, #tpu.memory_space<vmem>>, vector<4x2x32xf32>
    %c0_2 = arith.constant 0 : index
    %c0_3 = arith.constant 0 : index
    %c0_4 = arith.constant 0 : index
    %1 = vector.load %arg2[%c0_2, %c0_3, %c0_4] : memref<4x2x32xf32, #tpu.memory_space<vmem>>, vector<4x2x32xf32>
    %c0_5 = arith.constant 0 : index
    %c0_6 = arith.constant 0 : index
    %c0_7 = arith.constant 0 : index
    %2 = vector.load %arg3[%c0_5, %c0_6, %c0_7] : memref<4x2x32xf32, #tpu.memory_space<vmem>>, vector<4x2x32xf32>
    "tpu.trace_start"() <{level = 10 : i32, message = "bqd,bkd->bqk"}> : () -> ()
    %cst = arith.constant dense<0.000000e+00> : vector<4x2x2xf32>
    %3 = tpu.matmul %0, %1, %cst {dimension_numbers = #tpu.dot_dimension_numbers<[2], [2], [1], [1], [0, 0, 0, 1, 1, 1], [0], [0]>} : vector<4x2x32xf32>, vector<4x2x32xf32>, vector<4x2x2xf32> -> vector<4x2x2xf32>
    "tpu.trace_stop"() : () -> ()
    %cst_8 = arith.constant 0.176776692 : f32
    %4 = vector.broadcast %cst_8 : f32 to vector<4x2x2xf32>
    %5 = arith.mulf %3, %4 : vector<4x2x2xf32>
    %cst_9 = arith.constant dense<0xFF800000> : vector<4x2xf32>
    %6 = vector.multi_reduction <maximumf>, %5, %cst_9 [2] : vector<4x2x2xf32> to vector<4x2xf32>
    %7 = vector.shape_cast %6 : vector<4x2xf32> to vector<4x2x1xf32>
    %8 = vector.broadcast %7 : vector<4x2x1xf32> to vector<4x2x2xf32>
    %9 = arith.subf %5, %8 : vector<4x2x2xf32>
    %10 = math.exp %9 : vector<4x2x2xf32>
    %cst_10 = arith.constant dense<0.000000e+00> : vector<4x2xf32>
    %11 = vector.multi_reduction <add>, %10, %cst_10 [2] : vector<4x2x2xf32> to vector<4x2xf32>
    %12 = vector.shape_cast %11 : vector<4x2xf32> to vector<4x2x1xf32>
    %13 = vector.broadcast %12 : vector<4x2x1xf32> to vector<4x2x2xf32>
    %14 = arith.divf %10, %13 : vector<4x2x2xf32>
    "tpu.trace_start"() <{level = 10 : i32, message = "bqk,bkd->bqd"}> : () -> ()
    %cst_11 = arith.constant dense<0.000000e+00> : vector<4x2x32xf32>
    %15 = tpu.matmul %14, %2, %cst_11 {dimension_numbers = #tpu.dot_dimension_numbers<[2], [1], [1], [2], [0, 0, 0, 1, 1, 2], [0], [0]>} : vector<4x2x2xf32>, vector<4x2x32xf32>, vector<4x2x32xf32> -> vector<4x2x32xf32>
    "tpu.trace_stop"() : () -> ()
    %c0_12 = arith.constant 0 : index
    %c0_13 = arith.constant 0 : index
    %c0_14 = arith.constant 0 : index
    %16 = vector.load %arg4[%c0_12, %c0_13, %c0_14] : memref<4x2x32xf32, #tpu.memory_space<vmem>>, vector<4x2x32xf32>
    tpu.vector_store %arg4[%c0_12, %c0_13, %c0_14], %15 {strides = array<i32>} : memref<4x2x32xf32, #tpu.memory_space<vmem>>, vector<4x2x32xf32>,
    return
  }
  func.func @transform_0(%arg0: i32) -> (i32, i32, i32) {
    %c0_i32 = arith.constant 0 : i32
    %c0_i32_0 = arith.constant 0 : i32
    %c0_i32_1 = arith.constant 0 : i32
    return %arg0, %c0_i32, %c0_i32_0 : i32, i32, i32
  }
  func.func @transform_1(%arg0: i32) -> (i32, i32, i32) {
    %c0_i32 = arith.constant 0 : i32
    %c0_i32_0 = arith.constant 0 : i32
    %c0_i32_1 = arith.constant 0 : i32
    return %arg0, %c0_i32, %c0_i32_0 : i32, i32, i32
  }
  func.func @transform_2(%arg0: i32) -> (i32, i32, i32) {
    %c0_i32 = arith.constant 0 : i32
    %c0_i32_0 = arith.constant 0 : i32
    %c0_i32_1 = arith.constant 0 : i32
    return %arg0, %c0_i32, %c0_i32_0 : i32, i32, i32
  }
  func.func @transform_3(%arg0: i32) -> (i32, i32, i32) {
    %c0_i32 = arith.constant 0 : i32
    %c0_i32_0 = arith.constant 0 : i32
    %c0_i32_1 = arith.constant 0 : i32
    return %arg0, %c0_i32, %c0_i32_0 : i32, i32, i32
  }
}

module attributes {stable_mosaic.version = 11 : i64} {
  func.func @_matmul_bias_kernel(%arg0: i32, %arg1: memref<24x128xf32, #tpu.memory_space<vmem>>, %arg2: memref<128x256xf32, #tpu.memory_space<vmem>>, %arg3: memref<1x256xf32, #tpu.memory_space<vmem>>, %arg4: memref<24x256xf32, #tpu.memory_space<vmem>>) attributes {dimension_semantics = [#tpu.dimension_semantics<parallel>], iteration_bounds = array<i64: 1>, scalar_prefetch = 0 : i64, scratch_operands = 0 : i64, tpu.core_type = #tpu.core_type<tc>, window_params = [{transform_indices = @transform_0, window_bounds = array<i64: 24, 128>}, {pipeline_mode = #tpu.pipeline_mode<synchronous>, transform_indices = @transform_1, window_bounds = array<i64: 128, 256>}, {pipeline_mode = #tpu.pipeline_mode<synchronous>, transform_indices = @transform_2, window_bounds = array<i64: 1, 256>}, {transform_indices = @transform_3, window_bounds = array<i64: 24, 256>}]} {
    %c0 = arith.constant 0 : index
    %c0_0 = arith.constant 0 : index
    %0 = vector.load %arg1[%c0, %c0_0] : memref<24x128xf32, #tpu.memory_space<vmem>>, vector<24x128xf32>
    %c0_1 = arith.constant 0 : index
    %c0_2 = arith.constant 0 : index
    %1 = vector.load %arg2[%c0_1, %c0_2] : memref<128x256xf32, #tpu.memory_space<vmem>>, vector<128x256xf32>
    %cst = arith.constant dense<0.000000e+00> : vector<24x256xf32>
    %2 = tpu.matmul %0, %1, %cst {dimension_numbers = #tpu.dot_dimension_numbers<[1], [0], [0], [1], [0, 0, 1, 1], [], []>} : vector<24x128xf32>, vector<128x256xf32>, vector<24x256xf32> -> vector<24x256xf32>
    %c0_3 = arith.constant 0 : index
    %c0_4 = arith.constant 0 : index
    %3 = vector.load %arg3[%c0_3, %c0_4] : memref<1x256xf32, #tpu.memory_space<vmem>>, vector<1x256xf32>
    %4 = vector.broadcast %3 : vector<1x256xf32> to vector<24x256xf32>
    %5 = arith.addf %2, %4 : vector<24x256xf32>
    %c0_5 = arith.constant 0 : index
    %c0_6 = arith.constant 0 : index
    %6 = vector.load %arg4[%c0_5, %c0_6] : memref<24x256xf32, #tpu.memory_space<vmem>>, vector<24x256xf32>
    tpu.vector_store %arg4[%c0_5, %c0_6], %5 {strides = array<i32>} : memref<24x256xf32, #tpu.memory_space<vmem>>, vector<24x256xf32>,
    return
  }
  func.func @transform_0(%arg0: i32) -> (i32, i32) {
    %c0_i32 = arith.constant 0 : i32
    %c0_i32_0 = arith.constant 0 : i32
    return %arg0, %c0_i32 : i32, i32
  }
  func.func @transform_1(%arg0: i32) -> (i32, i32) {
    %c0_i32 = arith.constant 0 : i32
    %c0_i32_0 = arith.constant 0 : i32
    %c0_i32_1 = arith.constant 0 : i32
    return %c0_i32, %c0_i32_0 : i32, i32
  }
  func.func @transform_2(%arg0: i32) -> (i32, i32) {
    %c0_i32 = arith.constant 0 : i32
    %c0_i32_0 = arith.constant 0 : i32
    %c0_i32_1 = arith.constant 0 : i32
    return %c0_i32, %c0_i32_0 : i32, i32
  }
  func.func @transform_3(%arg0: i32) -> (i32, i32) {
    %c0_i32 = arith.constant 0 : i32
    %c0_i32_0 = arith.constant 0 : i32
    return %arg0, %c0_i32 : i32, i32
  }
}

module attributes {stable_mosaic.version = 11 : i64} {
  func.func @_attention_kernel(%arg0: i32, %arg1: memref<4x2x32xf32, #tpu.memory_space<vmem>>, %arg2: memref<4x1x32xf32, #tpu.memory_space<vmem>>, %arg3: memref<4x1x32xf32, #tpu.memory_space<vmem>>, %arg4: memref<4x2x32xf32, #tpu.memory_space<vmem>>) attributes {dimension_semantics = [#tpu.dimension_semantics<parallel>], iteration_bounds = array<i64: 17>, scalar_prefetch = 0 : i64, scratch_operands = 0 : i64, tpu.core_type = #tpu.core_type<tc>, window_params = [{transform_indices = @transform_0, window_bounds = array<i64: 4, 2, 32>}, {transform_indices = @transform_1, window_bounds = array<i64: 4, 1, 32>}, {transform_indices = @transform_2, window_bounds = array<i64: 4, 1, 32>}, {transform_indices = @transform_3, window_bounds = array<i64: 4, 2, 32>}]} {
    %c0 = arith.constant 0 : index
    %c0_0 = arith.constant 0 : index
    %c0_1 = arith.constant 0 : index
    %0 = vector.load %arg1[%c0, %c0_0, %c0_1] : memref<4x2x32xf32, #tpu.memory_space<vmem>>, vector<4x2x32xf32>
    %c0_2 = arith.constant 0 : index
    %c0_3 = arith.constant 0 : index
    %c0_4 = arith.constant 0 : index
    %1 = vector.load %arg2[%c0_2, %c0_3, %c0_4] : memref<4x1x32xf32, #tpu.memory_space<vmem>>, vector<4x1x32xf32>
    %c0_5 = arith.constant 0 : index
    %c0_6 = arith.constant 0 : index
    %c0_7 = arith.constant 0 : index
    %2 = vector.load %arg3[%c0_5, %c0_6, %c0_7] : memref<4x1x32xf32, #tpu.memory_space<vmem>>, vector<4x1x32xf32>
    "tpu.trace_start"() <{level = 10 : i32, message = "bqd,bkd->bqk"}> : () -> ()
    %cst = arith.constant dense<0.000000e+00> : vector<4x2x1xf32>
    %3 = tpu.matmul %0, %1, %cst {dimension_numbers = #tpu.dot_dimension_numbers<[2], [2], [1], [1], [0, 0, 0, 1, 1, 1], [0], [0]>} : vector<4x2x32xf32>, vector<4x1x32xf32>, vector<4x2x1xf32> -> vector<4x2x1xf32>
    "tpu.trace_stop"() : () -> ()
    %cst_8 = arith.constant 0.176776692 : f32
    %4 = vector.broadcast %cst_8 : f32 to vector<4x2x1xf32>
    %5 = arith.mulf %3, %4 : vector<4x2x1xf32>
    %cst_9 = arith.constant dense<0xFF800000> : vector<4x2xf32>
    %6 = vector.multi_reduction <maximumf>, %5, %cst_9 [2] : vector<4x2x1xf32> to vector<4x2xf32>
    %7 = vector.shape_cast %6 : vector<4x2xf32> to vector<4x2x1xf32>
    %8 = arith.subf %5, %7 : vector<4x2x1xf32>
    %9 = math.exp %8 : vector<4x2x1xf32>
    %cst_10 = arith.constant dense<0.000000e+00> : vector<4x2xf32>
    %10 = vector.multi_reduction <add>, %9, %cst_10 [2] : vector<4x2x1xf32> to vector<4x2xf32>
    %11 = vector.shape_cast %10 : vector<4x2xf32> to vector<4x2x1xf32>
    %12 = arith.divf %9, %11 : vector<4x2x1xf32>
    "tpu.trace_start"() <{level = 10 : i32, message = "bqk,bkd->bqd"}> : () -> ()
    %cst_11 = arith.constant dense<0.000000e+00> : vector<4x2x32xf32>
    %13 = tpu.matmul %12, %2, %cst_11 {dimension_numbers = #tpu.dot_dimension_numbers<[2], [1], [1], [2], [0, 0, 0, 1, 1, 2], [0], [0]>} : vector<4x2x1xf32>, vector<4x1x32xf32>, vector<4x2x32xf32> -> vector<4x2x32xf32>
    "tpu.trace_stop"() : () -> ()
    %c0_12 = arith.constant 0 : index
    %c0_13 = arith.constant 0 : index
    %c0_14 = arith.constant 0 : index
    %14 = vector.load %arg4[%c0_12, %c0_13, %c0_14] : memref<4x2x32xf32, #tpu.memory_space<vmem>>, vector<4x2x32xf32>
    tpu.vector_store %arg4[%c0_12, %c0_13, %c0_14], %13 {strides = array<i32>} : memref<4x2x32xf32, #tpu.memory_space<vmem>>, vector<4x2x32xf32>,
    return
  }
  func.func @transform_0(%arg0: i32) -> (i32, i32, i32) {
    %c0_i32 = arith.constant 0 : i32
    %c0_i32_0 = arith.constant 0 : i32
    %c0_i32_1 = arith.constant 0 : i32
    return %arg0, %c0_i32, %c0_i32_0 : i32, i32, i32
  }
  func.func @transform_1(%arg0: i32) -> (i32, i32, i32) {
    %c0_i32 = arith.constant 0 : i32
    %c0_i32_0 = arith.constant 0 : i32
    %c0_i32_1 = arith.constant 0 : i32
    return %arg0, %c0_i32, %c0_i32_0 : i32, i32, i32
  }
  func.func @transform_2(%arg0: i32) -> (i32, i32, i32) {
    %c0_i32 = arith.constant 0 : i32
    %c0_i32_0 = arith.constant 0 : i32
    %c0_i32_1 = arith.constant 0 : i32
    return %arg0, %c0_i32, %c0_i32_0 : i32, i32, i32
  }
  func.func @transform_3(%arg0: i32) -> (i32, i32, i32) {
    %c0_i32 = arith.constant 0 : i32
    %c0_i32_0 = arith.constant 0 : i32
    %c0_i32_1 = arith.constant 0 : i32
    return %arg0, %c0_i32, %c0_i32_0 : i32, i32, i32
  }
}

</mosaic_0001>

<bundles_post_ra>
// kernel: ummt_forward.35
= control target key start
LH: loop header
LB: loop body
LE: loop exit
PB: predicated region body
PF: predicated region fallthrough
CT: control target
= control target key end

     0   :  { %s386_s1 = inlined_call_operand.vmem [shape: f32[256,128], index: 1, kind: input, shape index: {}]   ;;  %s387_s0 = inlined_call_operand.vmem [shape: f32[32,256], index: 0, kind: input, shape index: {}]   ;;  %s388_s2 = inlined_call_operand.vmem [shape: f32[1,128], index: 2, kind: input, shape index: {}]   ;;  %s389_s3 = inlined_call_operand.vmem [shape: f32[32,128], index: 3, kind: output, shape index: {}]  }
   0x1   :  { %v53_v0 = vld [vmem:[%s386_s1 + $0xf8] sm:$0xff]  ;;  %v52_v2 = vld [vmem:[%s386_s1 + $0xf0] sm:$0xff]  ;;  %v51_v4 = vld [vmem:[%s386_s1 + $0xe8] sm:$0xff] }
   0x2   :  { %v37_v1 = vld [vmem:[%s386_s1 + $0x78] sm:$0xff]  ;;  %155 = vmatprep.subr.mxu0 %v53_v0  ;;  %199 = vmatprep.subr.mxu1 %v53_v0  ;;  %v36_v3 = vld [vmem:[%s386_s1 + $0x70] sm:$0xff]  ;;  %v35_v5 = vld [vmem:[%s386_s1 + $0x68] sm:$0xff] }
   0x3   :  { %156 = vmatpush3.msra.mxu0 %v37_v1  ;;  %215 = vmatpush3.msra.mxu1 %v37_v1  ;;  %v50_v6 = vld [vmem:[%s386_s1 + $0xe0] sm:$0xff]  ;;  %v49_v8 = vld [vmem:[%s386_s1 + $0xd8] sm:$0xff]  ;;  %v48_v10 = vld [vmem:[%s386_s1 + $0xd0] sm:$0xff] }
   0x4   :  { %157 = vmatprep.subr.mxu0 %v52_v2  ;;  %200 = vmatprep.subr.mxu1 %v52_v2  ;;  %v34_v7 = vld [vmem:[%s386_s1 + $0x60] sm:$0xff]  ;;  %v33_v9 = vld [vmem:[%s386_s1 + $0x58] sm:$0xff]  ;;  %v32_v11 = vld [vmem:[%s386_s1 + $0x50] sm:$0xff] }
   0x5   :  { %158 = vmatpush3.msra.mxu0 %v36_v3  ;;  %216 = vmatpush3.msra.mxu1 %v36_v3  ;;  %v47_v12 = vld [vmem:[%s386_s1 + $0xc8] sm:$0xff]  ;;  %v46_v14 = vld [vmem:[%s386_s1 + $0xc0] sm:$0xff]  ;;  %v45_v16 = vld [vmem:[%s386_s1 + $0xb8] sm:$0xff] }
   0x6   :  { %159 = vmatprep.subr.mxu0 %v51_v4  ;;  %201 = vmatprep.subr.mxu1 %v51_v4  ;;  %v31_v13 = vld [vmem:[%s386_s1 + $0x48] sm:$0xff]  ;;  %v30_v15 = vld [vmem:[%s386_s1 + $0x40] sm:$0xff]  ;;  %v29_v17 = vld [vmem:[%s386_s1 + $0x38] sm:$0xff] }
   0x7   :  { %160 = vmatpush3.msra.mxu0 %v35_v5  ;;  %217 = vmatpush3.msra.mxu1 %v35_v5  ;;  %v44_v18 = vld [vmem:[%s386_s1 + $0xb0] sm:$0xff]  ;;  %v43_v20 = vld [vmem:[%s386_s1 + $0xa8] sm:$0xff]  ;;  %v42_v22 = vld [vmem:[%s386_s1 + $0xa0] sm:$0xff] }
   0x8   :  { %161 = vmatprep.subr.mxu0 %v50_v6  ;;  %202 = vmatprep.subr.mxu1 %v50_v6  ;;  %v28_v19 = vld [vmem:[%s386_s1 + $0x30] sm:$0xff]  ;;  %v27_v21 = vld [vmem:[%s386_s1 + $0x28] sm:$0xff]  ;;  %v26_v23 = vld [vmem:[%s386_s1 + $0x20] sm:$0xff] }
   0x9   :  { %162 = vmatpush3.msra.mxu0 %v34_v7  ;;  %218 = vmatpush3.msra.mxu1 %v34_v7  ;;  %v41_v24 = vld [vmem:[%s386_s1 + $0x98] sm:$0xff]  ;;  %v40_v26 = vld [vmem:[%s386_s1 + $0x90] sm:$0xff]  ;;  %v39_v28 = vld [vmem:[%s386_s1 + $0x88] sm:$0xff] }
   0xa   :  { %163 = vmatprep.subr.mxu0 %v49_v8  ;;  %203 = vmatprep.subr.mxu1 %v49_v8  ;;  %v25_v25 = vld [vmem:[%s386_s1 + $0x18] sm:$0xff]  ;;  %v24_v27 = vld [vmem:[%s386_s1 + $0x10] sm:$0xff]  ;;  %v23_v29 = vld [vmem:[%s386_s1 + $0x8] sm:$0xff] }
   0xb   :  { %164 = vmatpush3.msra.mxu0 %v33_v9  ;;  %219 = vmatpush3.msra.mxu1 %v33_v9  ;;  %v38_v30 = vld [vmem:[%s386_s1 + $0x80] sm:$0xff]  ;;  %v15_v32 = vld [vmem:[%s387_s0 + $0x8] sm:$0xff]  ;;  %v17_v36 = vld [vmem:[%s387_s0 + $0x18] sm:$0xff] }
   0xc   :  { %165 = vmatprep.subr.mxu0 %v48_v10  ;;  %204 = vmatprep.subr.mxu1 %v48_v10  ;;  %v22_v31 = vld [vmem:[%s386_s1] sm:$0xff]  ;;  %v19_v33 = vld [vmem:[%s387_s0 + $0x28] sm:$0xff]  ;;  %v21_v37 = vld [vmem:[%s387_s0 + $0x38] sm:$0xff] }
   0xd   :  { %166 = vmatpush3.msra.mxu0 %v32_v11  ;;  %220 = vmatpush3.msra.mxu1 %v32_v11  ;;  %v14_v34 = vld [vmem:[%s387_s0] sm:$0xff]  ;;  %v16_v38 = vld [vmem:[%s387_s0 + $0x10] sm:$0xff] }
   0xe   :  { %167 = vmatprep.subr.mxu0 %v47_v12  ;;  %205 = vmatprep.subr.mxu1 %v47_v12  ;;  %v18_v35 = vld [vmem:[%s387_s0 + $0x20] sm:$0xff]  ;;  %v20_v39 = vld [vmem:[%s387_s0 + $0x30] sm:$0xff] }
   0xf   :  { %168 = vmatpush3.msra.mxu0 %v31_v13  ;;  %221 = vmatpush3.msra.mxu1 %v31_v13  ;;  %v154_v42 = vld [vmem:[%s388_s2] ss:$0 sm:$0xff] }
  0x10   :  { %169 = vmatprep.subr.mxu0 %v46_v14  ;;  %206 = vmatprep.subr.mxu1 %v46_v14 }
  0x11   :  { %170 = vmatpush3.msra.mxu0 %v30_v15  ;;  %222 = vmatpush3.msra.mxu1 %v30_v15 }
  0x12   :  { %171 = vmatprep.subr.mxu0 %v45_v16  ;;  %207 = vmatprep.subr.mxu1 %v45_v16 }
  0x13   :  { %172 = vmatpush3.msra.mxu0 %v29_v17  ;;  %223 = vmatpush3.msra.mxu1 %v29_v17 }
  0x14   :  { %173 = vmatprep.subr.mxu0 %v44_v18  ;;  %208 = vmatprep.subr.mxu1 %v44_v18 }
  0x15   :  { %174 = vmatpush3.msra.mxu0 %v28_v19  ;;  %224 = vmatpush3.msra.mxu1 %v28_v19 }
  0x16   :  { %175 = vmatprep.subr.mxu0 %v43_v20  ;;  %209 = vmatprep.subr.mxu1 %v43_v20 }
  0x17   :  { %176 = vmatpush3.msra.mxu0 %v27_v21  ;;  %225 = vmatpush3.msra.mxu1 %v27_v21 }
  0x18   :  { %177 = vmatprep.subr.mxu0 %v42_v22  ;;  %210 = vmatprep.subr.mxu1 %v42_v22 }
  0x19   :  { %178 = vmatpush3.msra.mxu0 %v26_v23  ;;  %226 = vmatpush3.msra.mxu1 %v26_v23 }
  0x1a   :  { %179 = vmatprep.subr.mxu0 %v41_v24  ;;  %211 = vmatprep.subr.mxu1 %v41_v24 }
  0x1b   :  { %180 = vmatpush3.msra.mxu0 %v25_v25  ;;  %227 = vmatpush3.msra.mxu1 %v25_v25 }
  0x1c   :  { %181 = vmatprep.subr.mxu0 %v40_v26  ;;  %212 = vmatprep.subr.mxu1 %v40_v26 }
  0x1d   :  { %182 = vmatpush3.msra.mxu0 %v24_v27  ;;  %228 = vmatpush3.msra.mxu1 %v24_v27 }
  0x1e   :  { %183 = vmatprep.subr.mxu0 %v39_v28  ;;  %213 = vmatprep.subr.mxu1 %v39_v28 }
  0x1f   :  { %184 = vmatpush3.msra.mxu0 %v23_v29  ;;  %229 = vmatpush3.msra.mxu1 %v23_v29 }
  0x20   :  { %185 = vmatprep.subr.mxu0 %v38_v30  ;;  %214 = vmatprep.subr.mxu1 %v38_v30 }
  0x21   :  { %186 = vmatpush3.msra.mxu0 %v22_v31  ;;  %230 = vmatpush3.msra.mxu1 %v22_v31 }
  0x22   :  { %125 = vmatprep.mubr.f32.mxu0 %v15_v32  ;;  %135 = vmatprep.mubr.f32.mxu1 %v19_v33 }
  0x23   :  { %126 = vmatmul.mubr.f32.vlgmr.msra.gmra.mxu0 %v14_v34  ;;  %136 = vmatmul.mubr.f32.vlgmr.msra.gmra.mxu1 %v18_v35 }
  0x24   :  { %130 = vmatprep.mubr.f32.mxu0 %v17_v36  ;;  %140 = vmatprep.mubr.f32.mxu1 %v21_v37 }
  0x27   :  { %131 = vmatmul.mubr.f32.gmra.mxu0 %v16_v38  ;;  %141 = vmatmul.mubr.f32.gmra.mxu1 %v20_v39 }
  0xe3   :  { %v187_v40 = vpop.f32.mrf.mxu0  ;;  %v193_v41 = vpop.f32.mrf.mxu1 }
  0xe5   :  { %v188_v43 = vpop.f32.mrf.mxu0  ;;  %v194_v44 = vpop.f32.mrf.mxu1 }
  0xe6   :  { %v189_v45 = vadd.f32 %v188_v43, %v187_v40  ;;  %v195_v46 = vadd.f32 %v194_v44, %v193_v41 }
  0xe7   :  { %v190_v47 = vpop.f32.mrf.mxu0  ;;  %v196_v48 = vpop.f32.mrf.mxu1 }
  0xe8   :  { %v128_v49 = vadd.f32 %v189_v45, %v154_v42  ;;  %v138_v50 = vadd.f32 %v195_v46, %v154_v42 }
  0xe9   :  { %v191_v51 = vpop.f32.mrf.mxu0  ;;  %v197_v52 = vpop.f32.mrf.mxu1 }
  0xea   :  { %146 = vst [vmem:[%s389_s3] sm:$0xff] %v128_v49  ;;  %148 = vst [vmem:[%s389_s3 + $0x10] sm:$0xff] %v138_v50  ;;  %v192_v53 = vadd.f32 %v191_v51, %v190_v47  ;;  %v198_v54 = vadd.f32 %v197_v52, %v196_v48 }
  0xec   :  { %v133_v55 = vadd.f32 %v192_v53, %v154_v42  ;;  %v143_v56 = vadd.f32 %v198_v54, %v154_v42 }
  0xee   :  { %147 = vst [vmem:[%s389_s3 + $0x8] sm:$0xff] %v133_v55  ;;  %149 = vst [vmem:[%s389_s3 + $0x18] sm:$0xff] %v143_v56 }

// kernel: ummt_forward.36
= control target key start
LH: loop header
LB: loop body
LE: loop exit
PB: predicated region body
PF: predicated region fallthrough
CT: control target
= control target key end

     0   :  { %v358_v1 = vmov 0.0   ;;  %vm359_vm0 = vmmov 0   ;;  %v69_v54 = vlaneseq  ;;  %s618_s1 = inlined_call_operand.vmem [shape: f32[128,384], index: 1, kind: input, shape index: {}]   ;;  %s619_s0 = inlined_call_operand.vmem [shape: f32[40,128], index: 0, kind: input, shape index: {}]   ;;  %s620_s2 = inlined_call_operand.vmem [shape: f32[1,384], index: 2, kind: input, shape index: {}]   ;;  %s621_s3 = inlined_call_operand.vmem [shape: f32[40,384], index: 3, kind: output, shape index: {}]  }
   0x1   :  { %v65_v0 = vld [vmem:[%s618_s1 + $0x170] sm:$0xff]  ;;  %309 = vmatprep.subr.mxu1 %v358_v1  ;;  %v64_v2 = vld [vmem:[%s618_s1 + $0x168] sm:$0xff]  ;;  %v66_v3 = vld [vmem:[%s618_s1 + $0x178] sm:$0xff]  ;;  %148 = vmatprep.mubr.f32.mxu0 %v358_v1 }
   0x2   :  { %84 = vmatprep.subr.mxu0 %v65_v0  ;;  %310 = vmatpush3.msra.mxu1 %v66_v3  ;;  %v62_v4 = vld [vmem:[%s618_s1 + $0x158] sm:$0xff]  ;;  %v61_v5 = vld [vmem:[%s618_s1 + $0x150] sm:$0xff]  ;;  %v63_v6 = vld [vmem:[%s618_s1 + $0x160] sm:$0xff]  ;;  %v70_v55 = vshrl.u32 %v69_v54, 7 }
   0x3   :  { %85 = vmatpush1.msra.mxu0 %v64_v2  ;;  %311 = vmatprep.subr.mxu1 %v358_v1  ;;  %v59_v7 = vld [vmem:[%s618_s1 + $0x140] sm:$0xff]  ;;  %v60_v8 = vld [vmem:[%s618_s1 + $0x148] sm:$0xff]  ;;  %v58_v9 = vld [vmem:[%s618_s1 + $0x138] sm:$0xff] }
   0x4   :  { %86 = vmatprep.subr.mxu0 %v62_v4  ;;  %312 = vmatpush3.msra.mxu1 %v63_v6  ;;  %v56_v10 = vld [vmem:[%s618_s1 + $0x128] sm:$0xff]  ;;  %v57_v11 = vld [vmem:[%s618_s1 + $0x130] sm:$0xff]  ;;  %v55_v12 = vld [vmem:[%s618_s1 + $0x120] sm:$0xff]  ;;  %v71_v56 = vsub.s32 0, %v70_v55  ;;  %v79_v57 = vsub.s32 2, %v70_v55  ;;  %v75_v59 = vsub.s32 1, %v70_v55 }
   0x5   :  { %87 = vmatpush1.msra.mxu0 %v61_v5  ;;  %313 = vmatprep.subr.mxu1 %v358_v1  ;;  %v53_v13 = vld [vmem:[%s618_s1 + $0x110] sm:$0xff]  ;;  %v54_v14 = vld [vmem:[%s618_s1 + $0x118] sm:$0xff]  ;;  %v52_v15 = vld [vmem:[%s618_s1 + $0x108] sm:$0xff] }
   0x6   :  { %88 = vmatprep.subr.mxu0 %v59_v7  ;;  %314 = vmatpush3.msra.mxu1 %v60_v8  ;;  %v50_v16 = vld [vmem:[%s618_s1 + $0xf8] sm:$0xff]  ;;  %v51_v17 = vld [vmem:[%s618_s1 + $0x100] sm:$0xff]  ;;  %v49_v18 = vld [vmem:[%s618_s1 + $0xf0] sm:$0xff] }
   0x7   :  { %89 = vmatpush1.msra.mxu0 %v58_v9  ;;  %315 = vmatprep.subr.mxu1 %v358_v1  ;;  %v47_v19 = vld [vmem:[%s618_s1 + $0xe0] sm:$0xff]  ;;  %v48_v20 = vld [vmem:[%s618_s1 + $0xe8] sm:$0xff]  ;;  %v46_v21 = vld [vmem:[%s618_s1 + $0xd8] sm:$0xff] }
   0x8   :  { %90 = vmatprep.subr.mxu0 %v56_v10  ;;  %316 = vmatpush3.msra.mxu1 %v57_v11  ;;  %v44_v22 = vld [vmem:[%s618_s1 + $0xc8] sm:$0xff]  ;;  %v45_v23 = vld [vmem:[%s618_s1 + $0xd0] sm:$0xff]  ;;  %v43_v24 = vld [vmem:[%s618_s1 + $0xc0] sm:$0xff] }
   0x9   :  { %91 = vmatpush1.msra.mxu0 %v55_v12  ;;  %317 = vmatprep.subr.mxu1 %v358_v1  ;;  %v41_v25 = vld [vmem:[%s618_s1 + $0xb0] sm:$0xff]  ;;  %v42_v26 = vld [vmem:[%s618_s1 + $0xb8] sm:$0xff]  ;;  %v40_v27 = vld [vmem:[%s618_s1 + $0xa8] sm:$0xff] }
   0xa   :  { %92 = vmatprep.subr.mxu0 %v53_v13  ;;  %318 = vmatpush3.msra.mxu1 %v54_v14  ;;  %v38_v28 = vld [vmem:[%s618_s1 + $0x98] sm:$0xff]  ;;  %v39_v29 = vld [vmem:[%s618_s1 + $0xa0] sm:$0xff]  ;;  %v37_v30 = vld [vmem:[%s618_s1 + $0x90] sm:$0xff] }
   0xb   :  { %93 = vmatpush1.msra.mxu0 %v52_v15  ;;  %319 = vmatprep.subr.mxu1 %v358_v1  ;;  %v35_v31 = vld [vmem:[%s618_s1 + $0x80] sm:$0xff]  ;;  %v36_v32 = vld [vmem:[%s618_s1 + $0x88] sm:$0xff]  ;;  %v34_v33 = vld [vmem:[%s618_s1 + $0x78] sm:$0xff] }
   0xc   :  { %94 = vmatprep.subr.mxu0 %v50_v16  ;;  %320 = vmatpush3.msra.mxu1 %v51_v17  ;;  %v32_v34 = vld [vmem:[%s618_s1 + $0x68] sm:$0xff]  ;;  %v33_v35 = vld [vmem:[%s618_s1 + $0x70] sm:$0xff]  ;;  %v31_v36 = vld [vmem:[%s618_s1 + $0x60] sm:$0xff] }
   0xd   :  { %95 = vmatpush1.msra.mxu0 %v49_v18  ;;  %321 = vmatprep.subr.mxu1 %v358_v1  ;;  %v29_v37 = vld [vmem:[%s618_s1 + $0x50] sm:$0xff]  ;;  %v30_v38 = vld [vmem:[%s618_s1 + $0x58] sm:$0xff]  ;;  %v28_v39 = vld [vmem:[%s618_s1 + $0x48] sm:$0xff] }
   0xe   :  { %96 = vmatprep.subr.mxu0 %v47_v19  ;;  %322 = vmatpush3.msra.mxu1 %v48_v20  ;;  %v26_v40 = vld [vmem:[%s618_s1 + $0x38] sm:$0xff]  ;;  %v27_v41 = vld [vmem:[%s618_s1 + $0x40] sm:$0xff]  ;;  %v25_v42 = vld [vmem:[%s618_s1 + $0x30] sm:$0xff] }
   0xf   :  { %97 = vmatpush1.msra.mxu0 %v46_v21  ;;  %323 = vmatprep.subr.mxu1 %v358_v1  ;;  %v23_v43 = vld [vmem:[%s618_s1 + $0x20] sm:$0xff]  ;;  %v24_v44 = vld [vmem:[%s618_s1 + $0x28] sm:$0xff]  ;;  %v22_v45 = vld [vmem:[%s618_s1 + $0x18] sm:$0xff] }
  0x10   :  { %98 = vmatprep.subr.mxu0 %v44_v22  ;;  %324 = vmatpush3.msra.mxu1 %v45_v23  ;;  %v20_v46 = vld [vmem:[%s618_s1 + $0x8] sm:$0xff]  ;;  %v21_v47 = vld [vmem:[%s618_s1 + $0x10] sm:$0xff]  ;;  %v19_v48 = vld [vmem:[%s618_s1] sm:$0xff] }
  0x11   :  { %99 = vmatpush1.msra.mxu0 %v43_v24  ;;  %325 = vmatprep.subr.mxu1 %v358_v1  ;;  %v14_v49 = vld [vmem:[%s619_s0] sm:$0xff]  ;;  %v15_v50 = vld [vmem:[%s619_s0 + $0x8] sm:$0xff]  ;;  %v16_v51 = vld [vmem:[%s619_s0 + $0x10] sm:$0xff] }
  0x12   :  { %100 = vmatprep.subr.mxu0 %v41_v25  ;;  %326 = vmatpush3.msra.mxu1 %v42_v26  ;;  %v17_v52 = vld [vmem:[%s619_s0 + $0x18] sm:$0xff]  ;;  %v18_v53 = vld [vmem:[%s619_s0 + $0x20] sm:$0xff] }
  0x13   :  { %101 = vmatpush1.msra.mxu0 %v40_v27  ;;  %327 = vmatprep.subr.mxu1 %v358_v1  ;;  %v67_v58 = vld [vmem:[%s620_s2] sm:$0x7] }
  0x14   :  { %102 = vmatprep.subr.mxu0 %v38_v28  ;;  %328 = vmatpush3.msra.mxu1 %v39_v29  ;;  %v72_v60 = vrot.slane %v67_v58, %v71_v56  ;;  %v80_v61 = vrot.slane %v67_v58, %v79_v57  ;;  %v76_v62 = vrot.slane %v67_v58, %v75_v59 }
  0x15   :  { %103 = vmatpush1.msra.mxu0 %v37_v30  ;;  %329 = vmatprep.subr.mxu1 %v358_v1 }
  0x16   :  { %104 = vmatprep.subr.mxu0 %v35_v31  ;;  %330 = vmatpush3.msra.mxu1 %v36_v32 }
  0x17   :  { %105 = vmatpush1.msra.mxu0 %v34_v33  ;;  %331 = vmatprep.subr.mxu1 %v358_v1 }
  0x18   :  { %106 = vmatprep.subr.mxu0 %v32_v34  ;;  %332 = vmatpush3.msra.mxu1 %v33_v35 }
  0x19   :  { %107 = vmatpush1.msra.mxu0 %v31_v36  ;;  %333 = vmatprep.subr.mxu1 %v358_v1 }
  0x1a   :  { %108 = vmatprep.subr.mxu0 %v29_v37  ;;  %334 = vmatpush3.msra.mxu1 %v30_v38 }
  0x1b   :  { %109 = vmatpush1.msra.mxu0 %v28_v39  ;;  %335 = vmatprep.subr.mxu1 %v358_v1 }
  0x1c   :  { %110 = vmatprep.subr.mxu0 %v26_v40  ;;  %336 = vmatpush3.msra.mxu1 %v27_v41 }
  0x1d   :  { %111 = vmatpush1.msra.mxu0 %v25_v42  ;;  %337 = vmatprep.subr.mxu1 %v358_v1 }
  0x1e   :  { %112 = vmatprep.subr.mxu0 %v23_v43  ;;  %338 = vmatpush3.msra.mxu1 %v24_v44 }
  0x1f   :  { %113 = vmatpush1.msra.mxu0 %v22_v45  ;;  %339 = vmatprep.subr.mxu1 %v358_v1 }
  0x20   :  { %114 = vmatprep.subr.mxu0 %v20_v46  ;;  %340 = vmatpush3.msra.mxu1 %v21_v47 }
  0x21   :  { %115 = vmatpush1.msra.mxu0 %v19_v48  ;;  %341 = vmatprep.mubr.msk.f32.mxu1 %vm359_vm0, %v358_v1 }
  0x22   :  { %149 = vmatmul.mubr.f32.vlgmr.msra.gmra.mxu0 %v14_v49  ;;  %342 = vmatmul.mubr.f32.vlgmr.msra.gmra.mxu1 %v14_v49 }
  0x23   :  { %154 = vmatprep.mubr.f32.mxu0 %v358_v1  ;;  %344 = vmatprep.mubr.msk.f32.mxu1 %vm359_vm0, %v358_v1 }
  0x26   :  { %155 = vmatmul.mubr.f32.gmra.mxu0 %v15_v50  ;;  %345 = vmatmul.mubr.f32.gmra.mxu1 %v15_v50 }
  0x27   :  { %160 = vmatprep.mubr.f32.mxu0 %v358_v1  ;;  %347 = vmatprep.mubr.msk.f32.mxu1 %vm359_vm0, %v358_v1 }
  0x2a   :  { %161 = vmatmul.mubr.f32.gmra.mxu0 %v16_v51  ;;  %348 = vmatmul.mubr.f32.gmra.mxu1 %v16_v51 }
  0x2b   :  { %166 = vmatprep.mubr.f32.mxu0 %v358_v1  ;;  %350 = vmatprep.mubr.msk.f32.mxu1 %vm359_vm0, %v358_v1 }
  0x2e   :  { %167 = vmatmul.mubr.f32.gmra.mxu0 %v17_v52  ;;  %351 = vmatmul.mubr.f32.gmra.mxu1 %v17_v52 }
  0x2f   :  { %172 = vmatprep.mubr.f32.mxu0 %v358_v1  ;;  %353 = vmatprep.mubr.msk.f32.mxu1 %vm359_vm0, %v358_v1 }
  0x32   :  { %173 = vmatmul.mubr.f32.gmra.mxu0 %v18_v53  ;;  %354 = vmatmul.mubr.f32.gmra.mxu1 %v18_v53 }
  0xe2   :  { %v150_v63 = vpop.f32.mrf.mxu0  ;;  %v245_v0 = vpop.f32.mrf.mxu1 }
  0xe3   :  { %v151_v1 = vadd.f32 %v150_v63, %v72_v60  ;;  %v246_v2 = vadd.f32 %v245_v0, %v80_v61 }
  0xe4   :  { %v152_v3 = vpop.f32.mrf.mxu0  ;;  %v343_v4 = vpop.f32.mrf.mxu1 }
  0xe5   :  { %269 = vst [vmem:[%s621_s3] sm:$0xff] %v151_v1  ;;  %271 = vst [vmem:[%s621_s3 + $0x10] sm:$0xff] %v246_v2  ;;  %v153_v5 = vadd.f32 %v152_v3, %v76_v62 }
  0xe6   :  { %v156_v6 = vpop.f32.mrf.mxu0  ;;  %v250_v7 = vpop.f32.mrf.mxu1 }
  0xe7   :  { %270 = vst [vmem:[%s621_s3 + $0x8] sm:$0xff] %v153_v5  ;;  %v157_v8 = vadd.f32 %v156_v6, %v72_v60  ;;  %v251_v9 = vadd.f32 %v250_v7, %v80_v61 }
  0xe8   :  { %v158_v10 = vpop.f32.mrf.mxu0  ;;  %v346_v11 = vpop.f32.mrf.mxu1 }
  0xe9   :  { %272 = vst [vmem:[%s621_s3 + $0x18] sm:$0xff] %v157_v8  ;;  %274 = vst [vmem:[%s621_s3 + $0x28] sm:$0xff] %v251_v9  ;;  %v159_v12 = vadd.f32 %v158_v10, %v76_v62 }
  0xea   :  { %v162_v13 = vpop.f32.mrf.mxu0  ;;  %v255_v14 = vpop.f32.mrf.mxu1 }
  0xeb   :  { %273 = vst [vmem:[%s621_s3 + $0x20] sm:$0xff] %v159_v12  ;;  %v163_v15 = vadd.f32 %v162_v13, %v72_v60  ;;  %v256_v16 = vadd.f32 %v255_v14, %v80_v61 }
  0xec   :  { %v164_v17 = vpop.f32.mrf.mxu0  ;;  %v349_v18 = vpop.f32.mrf.mxu1 }
  0xed   :  { %275 = vst [vmem:[%s621_s3 + $0x30] sm:$0xff] %v163_v15  ;;  %277 = vst [vmem:[%s621_s3 + $0x40] sm:$0xff] %v256_v16  ;;  %v165_v19 = vadd.f32 %v164_v17, %v76_v62 }
  0xee   :  { %v168_v20 = vpop.f32.mrf.mxu0  ;;  %v260_v21 = vpop.f32.mrf.mxu1 }
  0xef   :  { %276 = vst [vmem:[%s621_s3 + $0x38] sm:$0xff] %v165_v19  ;;  %v169_v22 = vadd.f32 %v168_v20, %v72_v60  ;;  %v261_v23 = vadd.f32 %v260_v21, %v80_v61 }
  0xf0   :  { %v170_v24 = vpop.f32.mrf.mxu0  ;;  %v352_v25 = vpop.f32.mrf.mxu1 }
  0xf1   :  { %278 = vst [vmem:[%s621_s3 + $0x48] sm:$0xff] %v169_v22  ;;  %280 = vst [vmem:[%s621_s3 + $0x58] sm:$0xff] %v261_v23  ;;  %v171_v26 = vadd.f32 %v170_v24, %v76_v62 }
  0xf2   :  { %v174_v27 = vpop.f32.mrf.mxu0  ;;  %v265_v28 = vpop.f32.mrf.mxu1 }
  0xf3   :  { %279 = vst [vmem:[%s621_s3 + $0x50] sm:$0xff] %v171_v26  ;;  %v175_v29 = vadd.f32 %v174_v27, %v72_v60  ;;  %v266_v30 = vadd.f32 %v265_v28, %v80_v61 }
  0xf4   :  { %v176_v31 = vpop.f32.mrf.mxu0  ;;  %v355_v32 = vpop.f32.mrf.mxu1 }
  0xf5   :  { %281 = vst [vmem:[%s621_s3 + $0x60] sm:$0xff] %v175_v29  ;;  %283 = vst [vmem:[%s621_s3 + $0x70] sm:$0xff] %v266_v30  ;;  %v177_v33 = vadd.f32 %v176_v31, %v76_v62 }
  0xf7   :  { %282 = vst [vmem:[%s621_s3 + $0x68] sm:$0xff] %v177_v33 }

// kernel: ummt_forward.38
= control target key start
LH: loop header
LB: loop body
LE: loop exit
PB: predicated region body
PF: predicated region fallthrough
CT: control target
= control target key end

     0   :  { %v244_v0 = vmov 0.0   ;;  %vm245_vm0 = vmmov 0   ;;  %s384_s1 = inlined_call_operand.vmem [shape: f32[128,128], index: 1, kind: input, shape index: {}]   ;;  %s385_s0 = inlined_call_operand.vmem [shape: f32[40,128], index: 0, kind: input, shape index: {}]   ;;  %s386_s2 = inlined_call_operand.vmem [shape: f32[1,128], index: 2, kind: input, shape index: {}]   ;;  %s387_s3 = inlined_call_operand.vmem [shape: f32[40,128], index: 3, kind: output, shape index: {}]  }
   0x1   :  { %163 = vmatprep.subr.mxu0 %v244_v0  ;;  %v34_v1 = vld [vmem:[%s384_s1 + $0x78] sm:$0xff]  ;;  %210 = vmatprep.subr.mxu1 %v244_v0  ;;  %v33_v2 = vld [vmem:[%s384_s1 + $0x70] sm:$0xff]  ;;  %v32_v3 = vld [vmem:[%s384_s1 + $0x68] sm:$0xff] }
   0x2   :  { %164 = vmatpush3.msra.mxu0 %v34_v1  ;;  %226 = vmatpush3.msra.mxu1 %v34_v1  ;;  %v31_v4 = vld [vmem:[%s384_s1 + $0x60] sm:$0xff]  ;;  %v30_v5 = vld [vmem:[%s384_s1 + $0x58] sm:$0xff]  ;;  %v29_v6 = vld [vmem:[%s384_s1 + $0x50] sm:$0xff] }
   0x3   :  { %165 = vmatprep.subr.mxu0 %v244_v0  ;;  %211 = vmatprep.subr.mxu1 %v244_v0  ;;  %v28_v7 = vld [vmem:[%s384_s1 + $0x48] sm:$0xff]  ;;  %v27_v8 = vld [vmem:[%s384_s1 + $0x40] sm:$0xff]  ;;  %v26_v9 = vld [vmem:[%s384_s1 + $0x38] sm:$0xff] }
   0x4   :  { %166 = vmatpush3.msra.mxu0 %v33_v2  ;;  %227 = vmatpush3.msra.mxu1 %v33_v2  ;;  %v25_v10 = vld [vmem:[%s384_s1 + $0x30] sm:$0xff]  ;;  %v24_v11 = vld [vmem:[%s384_s1 + $0x28] sm:$0xff]  ;;  %v23_v12 = vld [vmem:[%s384_s1 + $0x20] sm:$0xff] }
   0x5   :  { %167 = vmatprep.subr.mxu0 %v244_v0  ;;  %212 = vmatprep.subr.mxu1 %v244_v0  ;;  %v22_v13 = vld [vmem:[%s384_s1 + $0x18] sm:$0xff]  ;;  %v21_v14 = vld [vmem:[%s384_s1 + $0x10] sm:$0xff]  ;;  %v20_v15 = vld [vmem:[%s384_s1 + $0x8] sm:$0xff] }
   0x6   :  { %168 = vmatpush3.msra.mxu0 %v32_v3  ;;  %228 = vmatpush3.msra.mxu1 %v32_v3  ;;  %v19_v16 = vld [vmem:[%s384_s1] sm:$0xff]  ;;  %v17_v18 = vld [vmem:[%s385_s0 + $0x18] sm:$0xff]  ;;  %v15_v19 = vld [vmem:[%s385_s0 + $0x8] sm:$0xff] }
   0x7   :  { %169 = vmatprep.subr.mxu0 %v244_v0  ;;  %213 = vmatprep.subr.mxu1 %v244_v0  ;;  %v14_v17 = vld [vmem:[%s385_s0] sm:$0xff]  ;;  %v16_v21 = vld [vmem:[%s385_s0 + $0x10] sm:$0xff] }
   0x8   :  { %170 = vmatpush3.msra.mxu0 %v31_v4  ;;  %229 = vmatpush3.msra.mxu1 %v31_v4  ;;  %v18_v20 = vld [vmem:[%s385_s0 + $0x20] sm:$0xff] }
   0x9   :  { %171 = vmatprep.subr.mxu0 %v244_v0  ;;  %214 = vmatprep.subr.mxu1 %v244_v0  ;;  %v141_v22 = vld [vmem:[%s386_s2] ss:$0 sm:$0xff] }
   0xa   :  { %172 = vmatpush3.msra.mxu0 %v30_v5  ;;  %230 = vmatpush3.msra.mxu1 %v30_v5 }
   0xb   :  { %173 = vmatprep.subr.mxu0 %v244_v0  ;;  %215 = vmatprep.subr.mxu1 %v244_v0 }
   0xc   :  { %174 = vmatpush3.msra.mxu0 %v29_v6  ;;  %231 = vmatpush3.msra.mxu1 %v29_v6 }
   0xd   :  { %175 = vmatprep.subr.mxu0 %v244_v0  ;;  %216 = vmatprep.subr.mxu1 %v244_v0 }
   0xe   :  { %176 = vmatpush3.msra.mxu0 %v28_v7  ;;  %232 = vmatpush3.msra.mxu1 %v28_v7 }
   0xf   :  { %177 = vmatprep.subr.mxu0 %v244_v0  ;;  %217 = vmatprep.subr.mxu1 %v244_v0 }
  0x10   :  { %178 = vmatpush3.msra.mxu0 %v27_v8  ;;  %233 = vmatpush3.msra.mxu1 %v27_v8 }
  0x11   :  { %179 = vmatprep.subr.mxu0 %v244_v0  ;;  %218 = vmatprep.subr.mxu1 %v244_v0 }
  0x12   :  { %180 = vmatpush3.msra.mxu0 %v26_v9  ;;  %234 = vmatpush3.msra.mxu1 %v26_v9 }
  0x13   :  { %181 = vmatprep.subr.mxu0 %v244_v0  ;;  %219 = vmatprep.subr.mxu1 %v244_v0 }
  0x14   :  { %182 = vmatpush3.msra.mxu0 %v25_v10  ;;  %235 = vmatpush3.msra.mxu1 %v25_v10 }
  0x15   :  { %183 = vmatprep.subr.mxu0 %v244_v0  ;;  %220 = vmatprep.subr.mxu1 %v244_v0 }
  0x16   :  { %184 = vmatpush3.msra.mxu0 %v24_v11  ;;  %236 = vmatpush3.msra.mxu1 %v24_v11 }
  0x17   :  { %185 = vmatprep.subr.mxu0 %v244_v0  ;;  %221 = vmatprep.subr.mxu1 %v244_v0 }
  0x18   :  { %186 = vmatpush3.msra.mxu0 %v23_v12  ;;  %237 = vmatpush3.msra.mxu1 %v23_v12 }
  0x19   :  { %187 = vmatprep.subr.mxu0 %v244_v0  ;;  %222 = vmatprep.subr.mxu1 %v244_v0 }
  0x1a   :  { %188 = vmatpush3.msra.mxu0 %v22_v13  ;;  %238 = vmatpush3.msra.mxu1 %v22_v13 }
  0x1b   :  { %189 = vmatprep.subr.mxu0 %v244_v0  ;;  %223 = vmatprep.subr.mxu1 %v244_v0 }
  0x1c   :  { %190 = vmatpush3.msra.mxu0 %v21_v14  ;;  %239 = vmatpush3.msra.mxu1 %v21_v14 }
  0x1d   :  { %191 = vmatprep.subr.mxu0 %v244_v0  ;;  %224 = vmatprep.subr.mxu1 %v244_v0 }
  0x1e   :  { %192 = vmatpush3.msra.mxu0 %v20_v15  ;;  %240 = vmatpush3.msra.mxu1 %v20_v15 }
  0x1f   :  { %193 = vmatprep.subr.mxu0 %v244_v0  ;;  %195 = vmatprep.mubr.msk.f32.mxu0 %vm245_vm0, %v244_v0 }
  0x20   :  { %194 = vmatpush3.msra.mxu0 %v19_v16  ;;  %225 = vmatprep.subr.mxu1 %v244_v0 }
  0x21   :  { %196 = vmatmul.mubr.f32.vlgmr.msra.gmra.mxu0 %v14_v17  ;;  %241 = vmatpush3.msra.mxu1 %v19_v16 }
  0x22   :  { %204 = vmatprep.mubr.msk.f32.mxu1 %vm245_vm0, %v244_v0  ;;  %198 = vmatprep.mubr.msk.f32.mxu0 %vm245_vm0, %v244_v0 }
  0x23   :  { %205 = vmatmul.mubr.f32.vlgmr.msra.gmra.mxu1 %v17_v18 }
  0x24   :  { %207 = vmatprep.mubr.msk.f32.mxu1 %vm245_vm0, %v244_v0 }
  0x25   :  { %199 = vmatmul.mubr.f32.gmra.mxu0 %v15_v19 }
  0x26   :  { %201 = vmatprep.mubr.msk.f32.mxu0 %vm245_vm0, %v244_v0 }
  0x27   :  { %208 = vmatmul.mubr.f32.gmra.mxu1 %v18_v20 }
  0x29   :  { %202 = vmatmul.mubr.f32.gmra.mxu0 %v16_v21 }
  0xe1   :  { %v108_v23 = vpop.f32.mrf.mxu0 }
  0xe2   :  { %v109_v24 = vadd.f32 %v141_v22, %v108_v23 }
  0xe3   :  { %v197_v25 = vpop.f32.mrf.mxu0  ;;  %v123_v26 = vpop.f32.mrf.mxu1 }
  0xe4   :  { %132 = vst [vmem:[%s387_s3] sm:$0xff] %v109_v24  ;;  %v124_v27 = vadd.f32 %v141_v22, %v123_v26 }
  0xe5   :  { %v113_v28 = vpop.f32.mrf.mxu0  ;;  %v206_v29 = vpop.f32.mrf.mxu1 }
  0xe6   :  { %135 = vst [vmem:[%s387_s3 + $0x18] sm:$0xff] %v124_v27  ;;  %v114_v30 = vadd.f32 %v141_v22, %v113_v28 }
  0xe7   :  { %v200_v31 = vpop.f32.mrf.mxu0  ;;  %v128_v32 = vpop.f32.mrf.mxu1 }
  0xe8   :  { %133 = vst [vmem:[%s387_s3 + $0x8] sm:$0xff] %v114_v30  ;;  %v129_v33 = vadd.f32 %v141_v22, %v128_v32 }
  0xe9   :  { %v118_v34 = vpop.f32.mrf.mxu0  ;;  %v209_v35 = vpop.f32.mrf.mxu1 }
  0xea   :  { %136 = vst [vmem:[%s387_s3 + $0x20] sm:$0xff] %v129_v33  ;;  %v119_v36 = vadd.f32 %v141_v22, %v118_v34 }
  0xeb   :  { %v203_v37 = vpop.f32.mrf.mxu0 }
  0xec   :  { %134 = vst [vmem:[%s387_s3 + $0x10] sm:$0xff] %v119_v36 }

// kernel: ummt_forward.39
= control target key start
LH: loop header
LB: loop body
LE: loop exit
PB: predicated region body
PF: predicated region fallthrough
CT: control target
= control target key end

     0   :  { %s209_s0 = inlined_call_operand.vmem [shape: f32[40,128], index: 0, kind: input, shape index: {}]   ;;  %s210_s1 = inlined_call_operand.vmem [shape: f32[40,128], index: 1, kind: input, shape index: {}]   ;;  %s211_s2 = inlined_call_operand.vmem [shape: f32[1,128], index: 2, kind: input, shape index: {}]   ;;  %s212_s3 = inlined_call_operand.vmem [shape: f32[1,128], index: 3, kind: input, shape index: {}]   ;;  %s213_s4 = inlined_call_operand.vmem [shape: f32[40,128], index: 4, kind: output, shape index: {}]  }
   0x1   :  { %v17_v0 = vld [vmem:[%s209_s0] sm:$0xff]  ;;  %v19_v2 = vld [vmem:[%s209_s0 + $0x10] sm:$0xff]  ;;  %v18_v5 = vld [vmem:[%s209_s0 + $0x8] sm:$0xff] }
   0x2   :  { %v22_v1 = vld [vmem:[%s210_s1] sm:$0xff]  ;;  %v24_v4 = vld [vmem:[%s210_s1 + $0x10] sm:$0xff]  ;;  %v23_v6 = vld [vmem:[%s210_s1 + $0x8] sm:$0xff] }
   0x3   :  { %v27_v3 = vadd.f32 %v22_v1, %v17_v0  ;;  %v29_v7 = vadd.f32 %v24_v4, %v19_v2  ;;  %v20_v8 = vld [vmem:[%s209_s0 + $0x18] sm:$0xff]  ;;  %v28_v10 = vadd.f32 %v23_v6, %v18_v5  ;;  %v21_v12 = vld [vmem:[%s209_s0 + $0x20] sm:$0xff] }
   0x4   :  { %v25_v9 = vld [vmem:[%s210_s1 + $0x18] sm:$0xff]  ;;  %v26_v13 = vld [vmem:[%s210_s1 + $0x20] sm:$0xff] }
   0x5   :  { %32 = vadd.xlane.f32.xlu0 %v27_v3  ;;  %36 = vadd.xlane.f32.xlu1 %v29_v7  ;;  %v30_v11 = vadd.f32 %v25_v9, %v20_v8  ;;  %v31_v14 = vadd.f32 %v26_v13, %v21_v12  ;;  %v121_v51 = vld [vmem:[%s211_s2] ss:$0 sm:$0xff] }
   0x6   :  { %v122_v53 = vld [vmem:[%s212_s3] ss:$0 sm:$0xff] }
   0x9   :  { %34 = vadd.xlane.f32.xlu0 %v28_v10  ;;  %38 = vadd.xlane.f32.xlu1 %v30_v11 }
   0xd   :  { %40 = vadd.xlane.f32.xlu0 %v31_v14 }
  0x8e   :  { %v33_v15 = vpop.xlane.xlu0 %32  ;;  %v37_v17 = vpop.xlane.xlu1 %36 }
  0x8f   :  { %v43_v16 = vmul.f32 0.0078125, %v33_v15  ;;  %v45_v18 = vmul.f32 0.0078125, %v37_v17 }
  0x91   :  { %v48_v19 = vsub.f32 %v27_v3, %v43_v16  ;;  %v50_v20 = vsub.f32 %v29_v7, %v45_v18 }
  0x92   :  { %v35_v21 = vpop.xlane.xlu0 %34  ;;  %v39_v24 = vpop.xlane.xlu1 %38 }
  0x93   :  { %v44_v22 = vmul.f32 0.0078125, %v35_v21  ;;  %v53_v23 = vmul.f32 %v48_v19, %v48_v19  ;;  %v46_v25 = vmul.f32 0.0078125, %v39_v24  ;;  %v55_v27 = vmul.f32 %v50_v20, %v50_v20 }
  0x95   :  { %v49_v26 = vsub.f32 %v28_v10, %v44_v22  ;;  %58 = vadd.xlane.f32.xlu1 %v53_v23  ;;  %v51_v28 = vsub.f32 %v30_v11, %v46_v25 }
  0x96   :  { %v41_v29 = vpop.xlane.xlu0 %40 }
  0x97   :  { %v47_v30 = vmul.f32 0.0078125, %v41_v29  ;;  %v54_v31 = vmul.f32 %v49_v26, %v49_v26  ;;  %v56_v33 = vmul.f32 %v51_v28, %v51_v28 }
  0x99   :  { %v52_v32 = vsub.f32 %v31_v14, %v47_v30  ;;  %62 = vadd.xlane.f32.xlu1 %v55_v27  ;;  %60 = vadd.xlane.f32.xlu0 %v54_v31 }
  0x9b   :  { %v57_v34 = vmul.f32 %v52_v32, %v52_v32 }
  0x9d   :  { %64 = vadd.xlane.f32.xlu0 %v56_v33  ;;  %66 = vadd.xlane.f32.xlu1 %v57_v34 }
 0x11e   :  { %v59_v35 = vpop.xlane.xlu1 %58 }
 0x11f   :  { %v68_v36 = vmul.f32 0.0078125, %v59_v35 }
 0x121   :  { %v73_v37 = vadd.f32 1e-05, %v68_v36 }
 0x122   :  { %v63_v38 = vpop.xlane.xlu1 %62  ;;  %v61_v39 = vpop.xlane.xlu0 %60 }
 0x123   :  { %123 = vrsqrt.f32 %v73_v37  ;;  %v70_v40 = vmul.f32 0.0078125, %v63_v38  ;;  %v69_v41 = vmul.f32 0.0078125, %v61_v39 }
 0x125   :  { %v75_v42 = vadd.f32 1e-05, %v70_v40  ;;  %v74_v43 = vadd.f32 1e-05, %v69_v41 }
 0x126   :  { %v67_v44 = vpop.xlane.xlu1 %66  ;;  %v65_v45 = vpop.xlane.xlu0 %64 }
 0x127   :  { %125 = vrsqrt.f32 %v75_v42  ;;  %v72_v46 = vmul.f32 0.0078125, %v67_v44  ;;  %v71_v47 = vmul.f32 0.0078125, %v65_v45 }
 0x128   :  { %127 = vrsqrt.f32 %v74_v43 }
 0x129   :  { %v77_v48 = vadd.f32 1e-05, %v72_v46  ;;  %v76_v49 = vadd.f32 1e-05, %v71_v47 }
 0x12b   :  { %129 = vrsqrt.f32 %v77_v48 }
 0x12c   :  { %131 = vrsqrt.f32 %v76_v49 }
 0x130   :  { %v124_v50 = vpop.eup %123 }
 0x131   :  { %v83_v52 = vmul.f32 %v124_v50, %v48_v19 }
 0x133   :  { %v95_v54 = vmul.f32 %v121_v51, %v83_v52 }
 0x134   :  { %v126_v55 = vpop.eup %125 }
 0x135   :  { %v128_v56 = vpop.eup %127  ;;  %v107_v57 = vadd.f32 %v122_v53, %v95_v54  ;;  %v85_v58 = vmul.f32 %v126_v55, %v50_v20 }
 0x136   :  { %v84_v59 = vmul.f32 %v128_v56, %v49_v26 }
 0x137   :  { %112 = vst [vmem:[%s213_s4] sm:$0xff] %v107_v57  ;;  %v97_v60 = vmul.f32 %v121_v51, %v85_v58 }
 0x138   :  { %v130_v61 = vpop.eup %129  ;;  %v96_v62 = vmul.f32 %v121_v51, %v84_v59 }
 0x139   :  { %v132_v63 = vpop.eup %131  ;;  %v109_v0 = vadd.f32 %v122_v53, %v97_v60  ;;  %v87_v1 = vmul.f32 %v130_v61, %v52_v32 }
 0x13a   :  { %v108_v2 = vadd.f32 %v122_v53, %v96_v62  ;;  %v86_v3 = vmul.f32 %v132_v63, %v51_v28 }
 0x13b   :  { %114 = vst [vmem:[%s213_s4 + $0x10] sm:$0xff] %v109_v0  ;;  %v99_v4 = vmul.f32 %v121_v51, %v87_v1 }
 0x13c   :  { %113 = vst [vmem:[%s213_s4 + $0x8] sm:$0xff] %v108_v2  ;;  %v98_v5 = vmul.f32 %v121_v51, %v86_v3 }
 0x13d   :  { %v111_v6 = vadd.f32 %v122_v53, %v99_v4 }
 0x13e   :  { %v110_v7 = vadd.f32 %v122_v53, %v98_v5 }
 0x13f   :  { %116 = vst [vmem:[%s213_s4 + $0x20] sm:$0xff] %v111_v6 }
 0x140   :  { %115 = vst [vmem:[%s213_s4 + $0x18] sm:$0xff] %v110_v7 }

// kernel: ummt_forward.37
= control target key start
LH: loop header
LB: loop body
LE: loop exit
PB: predicated region body
PF: predicated region fallthrough
CT: control target
= control target key end

     0   :  { %vm86_vm0 = vcmask 261120   ;;  %v2441_v0 = vmov 0.0   ;;  %vm2442_vm1 = vmmov 0   ;;  %vm895_vm2 = vcmask 138240   ;;  %s3239_s1 = inlined_call_operand.vmem [shape: f32[8,17,32], index: 1, kind: input, shape index: {}]   ;;  %s3240_s0 = inlined_call_operand.vmem [shape: f32[8,17,32], index: 0, kind: input, shape index: {}]   ;;  %s3241_s2 = inlined_call_operand.vmem [shape: f32[8,17,32], index: 2, kind: input, shape index: {}]   ;;  %s3242_s3 = inlined_call_operand.vmem [shape: f32[8,17,32], index: 3, kind: output, shape index: {}]  }
   0x1   :  { %2103 = vmatprep.subr.mxu0 %v2441_v0  ;;  %v40_v1 = vld [vmem:[%s3239_s1 + $0x10] sm:$0x1]  ;;  %2118 = vmatprep.subr.mxu1 %v2441_v0  ;;  %v43_v2 = vld [vmem:[%s3239_s1 + $0x28] sm:$0x1]  ;;  %v42_v4 = vld [vmem:[%s3239_s1 + $0x20] sm:$0xff]  ;;  %vm902_vm3 = vcmask 131072  }
   0x2   :  { %2104 = vmatpush3.xpose.msk.msra.mxu0 %vm86_vm0, %v40_v1  ;;  %2119 = vmatpush3.xpose.msk.msra.mxu1 %vm86_vm0, %v43_v2  ;;  %v39_v3 = vld [vmem:[%s3239_s1 + $0x8] sm:$0xff]  ;;  %v38_v5 = vld [vmem:[%s3239_s1] sm:$0xff]  ;;  %v41_v6 = vld [vmem:[%s3239_s1 + $0x18] sm:$0xff]  ;;  %vm1170_vm4 = vcmask 1040384   ;;  %vm1900_vm5 = vcmask 253952  }
   0x3   :  { %2105 = vmatprep.subr.mxu0 %v2441_v0  ;;  %2120 = vmatprep.subr.mxu1 %v2441_v0  ;;  %v14_v7 = vld [vmem:[%s3240_s0] sm:$0xff]  ;;  %v17_v8 = vld [vmem:[%s3240_s0 + $0x18] sm:$0xff]  ;;  %v15_v11 = vld [vmem:[%s3240_s0 + $0x8] sm:$0xff] }
   0x4   :  { %2109 = vmatprep.mubr.msk.f32.mxu0 %vm2442_vm1, %v2441_v0  ;;  %2124 = vmatprep.mubr.msk.f32.mxu1 %vm2442_vm1, %v2441_v0  ;;  %v46_v9 = vld [vmem:[%s3239_s1 + $0x40] sm:$0x1]  ;;  %v49_v10 = vld [vmem:[%s3239_s1 + $0x58] sm:$0x1]  ;;  %v48_v14 = vld [vmem:[%s3239_s1 + $0x50] sm:$0xff] }
   0x5   :  { %v18_v12 = vld [vmem:[%s3240_s0 + $0x20] sm:$0xff]  ;;  %v45_v13 = vld [vmem:[%s3239_s1 + $0x38] sm:$0xff]  ;;  %v16_v15 = vld [vmem:[%s3240_s0 + $0x10] sm:$0x1] }
   0x6   :  { %2106 = vmatpush3.xpose.msk.msra.mxu0 %vm86_vm0, %v39_v3  ;;  %2121 = vmatpush3.xpose.msk.msra.mxu1 %vm86_vm0, %v42_v4  ;;  %v19_v16 = vld [vmem:[%s3240_s0 + $0x28] sm:$0x1]  ;;  %v44_v17 = vld [vmem:[%s3239_s1 + $0x30] sm:$0xff]  ;;  %v21_v23 = vld [vmem:[%s3240_s0 + $0x38] sm:$0xff] }
   0x7   :  { %2107 = vmatprep.subr.mxu0 %v2441_v0  ;;  %2122 = vmatprep.subr.mxu1 %v2441_v0  ;;  %v47_v18 = vld [vmem:[%s3239_s1 + $0x48] sm:$0xff]  ;;  %v20_v19 = vld [vmem:[%s3240_s0 + $0x30] sm:$0xff]  ;;  %v54_v26 = vld [vmem:[%s3239_s1 + $0x80] sm:$0xff] }
   0x8   :  { %v52_v20 = vld [vmem:[%s3239_s1 + $0x70] sm:$0x1]  ;;  %v23_v21 = vld [vmem:[%s3240_s0 + $0x48] sm:$0xff]  ;;  %v22_v27 = vld [vmem:[%s3240_s0 + $0x40] sm:$0x1] }
   0x9   :  { %v55_v22 = vld [vmem:[%s3239_s1 + $0x88] sm:$0x1]  ;;  %v24_v25 = vld [vmem:[%s3240_s0 + $0x50] sm:$0xff]  ;;  %v50_v28 = vld [vmem:[%s3239_s1 + $0x60] sm:$0xff] }
   0xa   :  { %2108 = vmatpush3.xpose.msk.msra.mxu0 %vm86_vm0, %v38_v5  ;;  %2123 = vmatpush3.xpose.msk.msra.mxu1 %vm86_vm0, %v41_v6  ;;  %v51_v24 = vld [vmem:[%s3239_s1 + $0x68] sm:$0xff]  ;;  %v25_v29 = vld [vmem:[%s3240_s0 + $0x58] sm:$0x1]  ;;  %v26_v31 = vld [vmem:[%s3240_s0 + $0x60] sm:$0xff] }
   0xb   :  { %2133 = vmatprep.subr.mxu0 %v2441_v0  ;;  %2148 = vmatprep.subr.mxu1 %v2441_v0  ;;  %v53_v30 = vld [vmem:[%s3239_s1 + $0x78] sm:$0xff]  ;;  %v58_v32 = vld [vmem:[%s3239_s1 + $0xa0] sm:$0x1]  ;;  %v27_v35 = vld [vmem:[%s3240_s0 + $0x68] sm:$0xff] }
   0xc   :  { %v29_v33 = vld [vmem:[%s3240_s0 + $0x78] sm:$0xff]  ;;  %v30_v37 = vld [vmem:[%s3240_s0 + $0x80] sm:$0xff]  ;;  %v60_v38 = vld [vmem:[%s3239_s1 + $0xb0] sm:$0xff] }
   0xd   :  { %2110 = vmatmul.mubr.msk.f32.vlgmr.msra.gmra.mxu0 %vm86_vm0, %v14_v7  ;;  %2125 = vmatmul.mubr.msk.f32.vlgmr.msra.gmra.mxu1 %vm86_vm0, %v17_v8  ;;  %v61_v34 = vld [vmem:[%s3239_s1 + $0xb8] sm:$0x1]  ;;  %v28_v39 = vld [vmem:[%s3240_s0 + $0x70] sm:$0x1]  ;;  %v31_v41 = vld [vmem:[%s3240_s0 + $0x88] sm:$0x1] }
   0xe   :  { %2134 = vmatpush3.xpose.msk.msra.mxu0 %vm86_vm0, %v46_v9  ;;  %2112 = vmatprep.mubr.msk.f32.mxu0 %vm2442_vm1, %v2441_v0  ;;  %v57_v36 = vld [vmem:[%s3239_s1 + $0x98] sm:$0xff]  ;;  %v56_v40 = vld [vmem:[%s3239_s1 + $0x90] sm:$0xff]  ;;  %v59_v42 = vld [vmem:[%s3239_s1 + $0xa8] sm:$0xff] }
   0xf   :  { %2149 = vmatpush3.xpose.msk.msra.mxu1 %vm86_vm0, %v49_v10  ;;  %2135 = vmatprep.subr.mxu0 %v2441_v0  ;;  %v32_v43 = vld [vmem:[%s3240_s0 + $0x90] sm:$0xff]  ;;  %v35_v44 = vld [vmem:[%s3240_s0 + $0xa8] sm:$0xff]  ;;  %v33_v45 = vld [vmem:[%s3240_s0 + $0x98] sm:$0xff] }
  0x10   :  { %2127 = vmatprep.mubr.msk.f32.mxu1 %vm2442_vm1, %v2441_v0  ;;  %2150 = vmatprep.subr.mxu1 %v2441_v0  ;;  %v36_v46 = vld [vmem:[%s3240_s0 + $0xb0] sm:$0xff]  ;;  %v34_v47 = vld [vmem:[%s3240_s0 + $0xa0] sm:$0x1]  ;;  %v37_v48 = vld [vmem:[%s3240_s0 + $0xb8] sm:$0x1] }
  0x11   :  { %2113 = vmatmul.mubr.msk.f32.gmra.mxu0 %vm86_vm0, %v15_v11  ;;  %2128 = vmatmul.mubr.msk.f32.gmra.mxu1 %vm86_vm0, %v18_v12 }
  0x12   :  { %2136 = vmatpush3.xpose.msk.msra.mxu0 %vm86_vm0, %v45_v13  ;;  %2115 = vmatprep.mubr.msk.f32.mxu0 %vm2442_vm1, %v2441_v0 }
  0x13   :  { %2151 = vmatpush3.xpose.msk.msra.mxu1 %vm86_vm0, %v48_v14  ;;  %2137 = vmatprep.subr.mxu0 %v2441_v0 }
  0x14   :  { %2130 = vmatprep.mubr.msk.f32.mxu1 %vm2442_vm1, %v2441_v0  ;;  %2152 = vmatprep.subr.mxu1 %v2441_v0 }
  0x15   :  { %2116 = vmatmul.mubr.msk.f32.gmra.mxu0 %vm86_vm0, %v16_v15  ;;  %2131 = vmatmul.mubr.msk.f32.gmra.mxu1 %vm86_vm0, %v19_v16 }
  0x16   :  { %2138 = vmatpush3.xpose.msk.msra.mxu0 %vm86_vm0, %v44_v17  ;;  %2139 = vmatprep.mubr.msk.f32.mxu0 %vm2442_vm1, %v2441_v0 }
  0x17   :  { %2153 = vmatpush3.xpose.msk.msra.mxu1 %vm86_vm0, %v47_v18  ;;  %2163 = vmatprep.subr.mxu0 %v2441_v0 }
  0x18   :  { %2154 = vmatprep.mubr.msk.f32.mxu1 %vm2442_vm1, %v2441_v0  ;;  %2178 = vmatprep.subr.mxu1 %v2441_v0 }
  0x19   :  { %2140 = vmatmul.mubr.msk.f32.vlgmr.msra.gmra.mxu0 %vm86_vm0, %v20_v19 }
  0x1a   :  { %2164 = vmatpush3.xpose.msk.msra.mxu0 %vm86_vm0, %v52_v20  ;;  %2155 = vmatmul.mubr.msk.f32.vlgmr.msra.gmra.mxu1 %vm86_vm0, %v23_v21 }
  0x1b   :  { %2142 = vmatprep.mubr.msk.f32.mxu0 %vm2442_vm1, %v2441_v0  ;;  %2179 = vmatpush3.xpose.msk.msra.mxu1 %vm86_vm0, %v55_v22 }
  0x1c   :  { %2165 = vmatprep.subr.mxu0 %v2441_v0  ;;  %2157 = vmatprep.mubr.msk.f32.mxu1 %vm2442_vm1, %v2441_v0 }
  0x1d   :  { %2143 = vmatmul.mubr.msk.f32.gmra.mxu0 %vm86_vm0, %v21_v23  ;;  %2180 = vmatprep.subr.mxu1 %v2441_v0 }
  0x1e   :  { %2166 = vmatpush3.xpose.msk.msra.mxu0 %vm86_vm0, %v51_v24  ;;  %2158 = vmatmul.mubr.msk.f32.gmra.mxu1 %vm86_vm0, %v24_v25 }
  0x1f   :  { %2145 = vmatprep.mubr.msk.f32.mxu0 %vm2442_vm1, %v2441_v0  ;;  %2181 = vmatpush3.xpose.msk.msra.mxu1 %vm86_vm0, %v54_v26 }
  0x20   :  { %2167 = vmatprep.subr.mxu0 %v2441_v0  ;;  %2160 = vmatprep.mubr.msk.f32.mxu1 %vm2442_vm1, %v2441_v0 }
  0x21   :  { %2146 = vmatmul.mubr.msk.f32.gmra.mxu0 %vm86_vm0, %v22_v27  ;;  %2182 = vmatprep.subr.mxu1 %v2441_v0 }
  0x22   :  { %2168 = vmatpush3.xpose.msk.msra.mxu0 %vm86_vm0, %v50_v28  ;;  %2161 = vmatmul.mubr.msk.f32.gmra.mxu1 %vm86_vm0, %v25_v29 }
  0x23   :  { %2169 = vmatprep.mubr.msk.f32.mxu0 %vm2442_vm1, %v2441_v0  ;;  %2183 = vmatpush3.xpose.msk.msra.mxu1 %vm86_vm0, %v53_v30 }
  0x24   :  { %2193 = vmatprep.subr.mxu0 %v2441_v0  ;;  %2184 = vmatprep.mubr.msk.f32.mxu1 %vm2442_vm1, %v2441_v0 }
  0x25   :  { %2170 = vmatmul.mubr.msk.f32.vlgmr.msra.gmra.mxu0 %vm86_vm0, %v26_v31  ;;  %2208 = vmatprep.subr.mxu1 %v2441_v0 }
  0x26   :  { %2194 = vmatpush3.xpose.msk.msra.mxu0 %vm86_vm0, %v58_v32  ;;  %2185 = vmatmul.mubr.msk.f32.vlgmr.msra.gmra.mxu1 %vm86_vm0, %v29_v33 }
  0x27   :  { %2172 = vmatprep.mubr.msk.f32.mxu0 %vm2442_vm1, %v2441_v0  ;;  %2209 = vmatpush3.xpose.msk.msra.mxu1 %vm86_vm0, %v61_v34 }
  0x28   :  { %2195 = vmatprep.subr.mxu0 %v2441_v0  ;;  %2187 = vmatprep.mubr.msk.f32.mxu1 %vm2442_vm1, %v2441_v0 }
  0x29   :  { %2173 = vmatmul.mubr.msk.f32.gmra.mxu0 %vm86_vm0, %v27_v35  ;;  %2210 = vmatprep.subr.mxu1 %v2441_v0 }
  0x2a   :  { %2196 = vmatpush3.xpose.msk.msra.mxu0 %vm86_vm0, %v57_v36  ;;  %2188 = vmatmul.mubr.msk.f32.gmra.mxu1 %vm86_vm0, %v30_v37 }
  0x2b   :  { %2175 = vmatprep.mubr.msk.f32.mxu0 %vm2442_vm1, %v2441_v0  ;;  %2211 = vmatpush3.xpose.msk.msra.mxu1 %vm86_vm0, %v60_v38 }
  0x2c   :  { %2197 = vmatprep.subr.mxu0 %v2441_v0  ;;  %2190 = vmatprep.mubr.msk.f32.mxu1 %vm2442_vm1, %v2441_v0 }
  0x2d   :  { %2176 = vmatmul.mubr.msk.f32.gmra.mxu0 %vm86_vm0, %v28_v39  ;;  %2212 = vmatprep.subr.mxu1 %v2441_v0 }
  0x2e   :  { %2198 = vmatpush3.xpose.msk.msra.mxu0 %vm86_vm0, %v56_v40  ;;  %2191 = vmatmul.mubr.msk.f32.gmra.mxu1 %vm86_vm0, %v31_v41 }
  0x2f   :  { %2199 = vmatprep.mubr.msk.f32.mxu0 %vm2442_vm1, %v2441_v0  ;;  %2213 = vmatpush3.xpose.msk.msra.mxu1 %vm86_vm0, %v59_v42 }
  0x30   :  { %2214 = vmatprep.mubr.msk.f32.mxu1 %vm2442_vm1, %v2441_v0  ;;  %2223 = vmatprep.subr.mxu0 %v2441_v0 }
  0x31   :  { %2200 = vmatmul.mubr.msk.f32.vlgmr.msra.gmra.mxu0 %vm86_vm0, %v32_v43  ;;  %2238 = vmatprep.subr.mxu1 %v2441_v0 }
  0x32   :  { %2215 = vmatmul.mubr.msk.f32.vlgmr.msra.gmra.mxu1 %vm86_vm0, %v35_v44  ;;  %2202 = vmatprep.mubr.msk.f32.mxu0 %vm2442_vm1, %v2441_v0 }
  0x33   :  { %2217 = vmatprep.mubr.msk.f32.mxu1 %vm2442_vm1, %v2441_v0 }
  0x35   :  { %2203 = vmatmul.mubr.msk.f32.gmra.mxu0 %vm86_vm0, %v33_v45 }
  0x36   :  { %2218 = vmatmul.mubr.msk.f32.gmra.mxu1 %vm86_vm0, %v36_v46  ;;  %2205 = vmatprep.mubr.msk.f32.mxu0 %vm2442_vm1, %v2441_v0 }
  0x37   :  { %2220 = vmatprep.mubr.msk.f32.mxu1 %vm2442_vm1, %v2441_v0 }
  0x39   :  { %2206 = vmatmul.mubr.msk.f32.gmra.mxu0 %vm86_vm0, %v34_v47 }
  0x3a   :  { %2221 = vmatmul.mubr.msk.f32.gmra.mxu1 %vm86_vm0, %v37_v48  ;;  %2229 = vmatprep.mubr.msk.f32.mxu0 %vm2442_vm1, %v2441_v0 }
  0x3b   :  { %2244 = vmatprep.mubr.msk.f32.mxu1 %vm2442_vm1, %v2441_v0 }
  0xcd   :  { %v171_v49 = vpop.f32.mrf.mxu0  ;;  %v269_v50 = vpop.f32.mrf.mxu1 }
  0xce   :  { %v2733_v51 = vmul.f32 0.17677669, %v171_v49  ;;  %v2735_v52 = vmul.f32 0.17677669, %v269_v50 }
  0xcf   :  { %v2111_v53 = vpop.f32.mrf.mxu0  ;;  %v2126_v54 = vpop.f32.mrf.mxu1 }
  0xd0   :  { %v896_v55 = vsel %vm895_vm2, %v2733_v51, -inf  ;;  %v906_v60 = vsel %vm895_vm2, %v2735_v52, -inf }
  0xd1   :  { %897 = vmax.xlane.f32.xlu0 %v896_v55  ;;  %v176_v56 = vpop.f32.mrf.mxu0  ;;  %v274_v57 = vpop.f32.mrf.mxu1 }
  0xd2   :  { %v2739_v58 = vmul.f32 0.17677669, %v176_v56  ;;  %v2741_v59 = vmul.f32 0.17677669, %v274_v57 }
  0xd3   :  { %v2114_v61 = vpop.f32.mrf.mxu0  ;;  %v2129_v62 = vpop.f32.mrf.mxu1 }
  0xd4   :  { %v899_v63 = vsel %vm895_vm2, %v2739_v58, -inf  ;;  %v909_v5 = vsel %vm895_vm2, %v2741_v59, -inf }
  0xd5   :  { %907 = vmax.xlane.f32.xlu0 %v906_v60  ;;  %900 = vmax.xlane.f32.xlu1 %v899_v63  ;;  %v181_v1 = vpop.f32.mrf.mxu0  ;;  %v279_v2 = vpop.f32.mrf.mxu1 }
  0xd6   :  { %v2747_v3 = vmul.f32 0.17677669, %v181_v1  ;;  %v2749_v4 = vmul.f32 0.17677669, %v279_v2 }
  0xd7   :  { %v2117_v6 = vpop.f32.mrf.mxu0  ;;  %v2132_v7 = vpop.f32.mrf.mxu1 }
  0xd8   :  { %v903_v8 = vsel %vm902_vm3, %v2747_v3, -inf  ;;  %v912_v12 = vsel %vm902_vm3, %v2749_v4, -inf }
  0xd9   :  { %910 = vmax.xlane.f32.xlu1 %v909_v5  ;;  %904 = vmax.xlane.f32.xlu0 %v903_v8  ;;  %v367_v9 = vpop.f32.mrf.mxu0 }
  0xda   :  { %v2755_v10 = vmul.f32 0.17677669, %v367_v9  ;;  %v465_v11 = vpop.f32.mrf.mxu1 }
  0xdb   :  { %v2141_v13 = vpop.f32.mrf.mxu0  ;;  %v2759_v14 = vmul.f32 0.17677669, %v465_v11 }
  0xdc   :  { %v2156_v15 = vpop.f32.mrf.mxu1  ;;  %v915_v16 = vsel %vm895_vm2, %v2755_v10, -inf }
  0xdd   :  { %913 = vmax.xlane.f32.xlu1 %v912_v12  ;;  %916 = vmax.xlane.f32.xlu0 %v915_v16  ;;  %v372_v17 = vpop.f32.mrf.mxu0  ;;  %v924_v20 = vsel %vm895_vm2, %v2759_v14, -inf }
  0xde   :  { %v2763_v18 = vmul.f32 0.17677669, %v372_v17  ;;  %v470_v19 = vpop.f32.mrf.mxu1 }
  0xdf   :  { %v2144_v21 = vpop.f32.mrf.mxu0  ;;  %v2767_v22 = vmul.f32 0.17677669, %v470_v19 }
  0xe0   :  { %v2159_v23 = vpop.f32.mrf.mxu1  ;;  %v918_v24 = vsel %vm895_vm2, %v2763_v18, -inf }
  0xe1   :  { %925 = vmax.xlane.f32.xlu1 %v924_v20  ;;  %919 = vmax.xlane.f32.xlu0 %v918_v24  ;;  %v377_v25 = vpop.f32.mrf.mxu0  ;;  %v927_v28 = vsel %vm895_vm2, %v2767_v22, -inf }
  0xe2   :  { %v2771_v26 = vmul.f32 0.17677669, %v377_v25  ;;  %v475_v27 = vpop.f32.mrf.mxu1 }
  0xe3   :  { %v2147_v29 = vpop.f32.mrf.mxu0  ;;  %v2775_v30 = vmul.f32 0.17677669, %v475_v27 }
  0xe4   :  { %v2162_v31 = vpop.f32.mrf.mxu1  ;;  %v921_v32 = vsel %vm902_vm3, %v2771_v26, -inf }
  0xe5   :  { %928 = vmax.xlane.f32.xlu1 %v927_v28  ;;  %922 = vmax.xlane.f32.xlu0 %v921_v32  ;;  %v563_v33 = vpop.f32.mrf.mxu0  ;;  %v930_v36 = vsel %vm902_vm3, %v2775_v30, -inf }
  0xe6   :  { %v2779_v34 = vmul.f32 0.17677669, %v563_v33  ;;  %v661_v35 = vpop.f32.mrf.mxu1 }
  0xe7   :  { %v2171_v37 = vpop.f32.mrf.mxu0  ;;  %v2783_v38 = vmul.f32 0.17677669, %v661_v35 }
  0xe8   :  { %v2186_v39 = vpop.f32.mrf.mxu1  ;;  %v933_v40 = vsel %vm895_vm2, %v2779_v34, -inf }
  0xe9   :  { %931 = vmax.xlane.f32.xlu1 %v930_v36  ;;  %934 = vmax.xlane.f32.xlu0 %v933_v40  ;;  %v568_v41 = vpop.f32.mrf.mxu0  ;;  %v942_v44 = vsel %vm895_vm2, %v2783_v38, -inf }
  0xea   :  { %v2787_v42 = vmul.f32 0.17677669, %v568_v41  ;;  %v666_v43 = vpop.f32.mrf.mxu1 }
  0xeb   :  { %v2174_v45 = vpop.f32.mrf.mxu0  ;;  %v2791_v46 = vmul.f32 0.17677669, %v666_v43 }
  0xec   :  { %v2189_v47 = vpop.f32.mrf.mxu1  ;;  %v936_v48 = vsel %vm895_vm2, %v2787_v42, -inf }
  0xed   :  { %943 = vmax.xlane.f32.xlu1 %v942_v44  ;;  %937 = vmax.xlane.f32.xlu0 %v936_v48  ;;  %v573_v49 = vpop.f32.mrf.mxu0  ;;  %v945_v54 = vsel %vm895_vm2, %v2791_v46, -inf }
  0xee   :  { %v2795_v50 = vmul.f32 0.17677669, %v573_v49  ;;  %v671_v53 = vpop.f32.mrf.mxu1 }
  0xef   :  { %v2177_v55 = vpop.f32.mrf.mxu0  ;;  %v2799_v56 = vmul.f32 0.17677669, %v671_v53 }
  0xf0   :  { %v2192_v57 = vpop.f32.mrf.mxu1  ;;  %v939_v60 = vsel %vm902_vm3, %v2795_v50, -inf }
  0xf1   :  { %946 = vmax.xlane.f32.xlu1 %v945_v54  ;;  %940 = vmax.xlane.f32.xlu0 %v939_v60  ;;  %v759_v61 = vpop.f32.mrf.mxu0  ;;  %v948_v1 = vsel %vm902_vm3, %v2799_v56, -inf }
  0xf2   :  { %v2803_v62 = vmul.f32 0.17677669, %v759_v61  ;;  %v857_v63 = vpop.f32.mrf.mxu1 }
  0xf3   :  { %v2201_v2 = vpop.f32.mrf.mxu0  ;;  %v2807_v5 = vmul.f32 0.17677669, %v857_v63 }
  0xf4   :  { %v2216_v6 = vpop.f32.mrf.mxu1  ;;  %v951_v7 = vsel %vm895_vm2, %v2803_v62, -inf }
  0xf5   :  { %949 = vmax.xlane.f32.xlu1 %v948_v1  ;;  %952 = vmax.xlane.f32.xlu0 %v951_v7  ;;  %v764_v8 = vpop.f32.mrf.mxu0  ;;  %v960_v12 = vsel %vm895_vm2, %v2807_v5, -inf }
  0xf6   :  { %v2811_v9 = vmul.f32 0.17677669, %v764_v8  ;;  %v862_v11 = vpop.f32.mrf.mxu1 }
  0xf7   :  { %v2204_v13 = vpop.f32.mrf.mxu0  ;;  %v2815_v15 = vmul.f32 0.17677669, %v862_v11 }
  0xf8   :  { %v2219_v16 = vpop.f32.mrf.mxu1  ;;  %v954_v17 = vsel %vm895_vm2, %v2811_v9, -inf }
  0xf9   :  { %961 = vmax.xlane.f32.xlu1 %v960_v12  ;;  %955 = vmax.xlane.f32.xlu0 %v954_v17  ;;  %v769_v19 = vpop.f32.mrf.mxu0  ;;  %v963_v23 = vsel %vm895_vm2, %v2815_v15, -inf }
  0xfa   :  { %v2819_v20 = vmul.f32 0.17677669, %v769_v19  ;;  %v867_v21 = vpop.f32.mrf.mxu1 }
  0xfb   :  { %v2823_v24 = vmul.f32 0.17677669, %v867_v21  ;;  %v2207_v25 = vpop.f32.mrf.mxu0 }
  0xfc   :  { %v2222_v27 = vpop.f32.mrf.mxu1  ;;  %v957_v28 = vsel %vm902_vm3, %v2819_v20, -inf }
  0xfd   :  { %964 = vmax.xlane.f32.xlu1 %v963_v23  ;;  %958 = vmax.xlane.f32.xlu0 %v957_v28  ;;  %v966_v29 = vsel %vm902_vm3, %v2823_v24, -inf }
 0x101   :  { %967 = vmax.xlane.f32.xlu1 %v966_v29 }
 0x15a   :  { %v898_v31 = vpop.xlane.xlu0 %897 }
 0x15b   :  { %v969_v32 = vsub.f32 %v2733_v51, %v898_v31 }
 0x15d   :  { %v993_v33 = vmul.f32 1.442695, %v969_v32 }
 0x15e   :  { %v908_v35 = vpop.xlane.xlu0 %907  ;;  %v901_v36 = vpop.xlane.xlu1 %900 }
 0x15f   :  { %2345 = vpow2.f32 %v993_v33  ;;  %v972_v37 = vsub.f32 %v2735_v52, %v908_v35  ;;  %v970_v39 = vsub.f32 %v2739_v58, %v901_v36 }
 0x161   :  { %v999_v40 = vmul.f32 1.442695, %v972_v37  ;;  %v995_v41 = vmul.f32 1.442695, %v970_v39 }
 0x162   :  { %v911_v43 = vpop.xlane.xlu1 %910  ;;  %v905_v44 = vpop.xlane.xlu0 %904 }
 0x163   :  { %2347 = vpow2.f32 %v999_v40  ;;  %v973_v45 = vsub.f32 %v2741_v59, %v911_v43  ;;  %v971_v47 = vsub.f32 %v2747_v3, %v905_v44 }
 0x164   :  { %2349 = vpow2.f32 %v995_v41 }
 0x165   :  { %v1001_v48 = vmul.f32 1.442695, %v973_v45  ;;  %v997_v51 = vmul.f32 1.442695, %v971_v47 }
 0x166   :  { %v914_v49 = vpop.xlane.xlu1 %913  ;;  %v917_v53 = vpop.xlane.xlu0 %916 }
 0x167   :  { %2351 = vpow2.f32 %v1001_v48  ;;  %v974_v54 = vsub.f32 %v2749_v4, %v914_v49  ;;  %v975_v52 = vsub.f32 %v2755_v10, %v917_v53 }
 0x168   :  { %2353 = vpow2.f32 %v997_v51 }
 0x169   :  { %v1003_v58 = vmul.f32 1.442695, %v974_v54  ;;  %v1005_v55 = vmul.f32 1.442695, %v975_v52 }
 0x16a   :  { %v926_v57 = vpop.xlane.xlu1 %925  ;;  %v920_v60 = vpop.xlane.xlu0 %919 }
 0x16b   :  { %2355 = vpow2.f32 %v1003_v58  ;;  %v978_v59 = vsub.f32 %v2759_v14, %v926_v57  ;;  %v976_v3 = vsub.f32 %v2763_v18, %v920_v60 }
 0x16c   :  { %v2838_v61 = vpop.eup %2345  ;;  %2357 = vpow2.f32 %v1005_v55 }
 0x16d   :  { %v1011_v63 = vmul.f32 1.442695, %v978_v59  ;;  %v1007_v1 = vmul.f32 1.442695, %v976_v3  ;;  %v1041_v4 = vsel %vm895_vm2, %v2838_v61, 0.0 }
 0x16e   :  { %v929_v2 = vpop.xlane.xlu1 %928  ;;  %v923_v10 = vpop.xlane.xlu0 %922  ;;  %1042 = vadd.xlane.f32.xlu0 %v1041_v4 }
 0x16f   :  { %2359 = vpow2.f32 %v1011_v63  ;;  %v979_v6 = vsub.f32 %v2767_v22, %v929_v2  ;;  %v977_v7 = vsub.f32 %v2771_v26, %v923_v10  ;;  %v64_v63 = vld [vmem:[%s3241_s2 + $0x10] sm:$0x1] }
 0x170   :  { %v2844_v8 = vpop.eup %2347  ;;  %2361 = vpow2.f32 %v1007_v1  ;;  %2224 = vmatpush3.msk.msra.mxu0 %vm1170_vm4, %v64_v63  ;;  %v70_v63 = vld [vmem:[%s3241_s2 + $0x40] sm:$0x1] }
 0x171   :  { %v2846_v14 = vpop.eup %2349  ;;  %v1013_v18 = vmul.f32 1.442695, %v979_v6  ;;  %v1009_v11 = vmul.f32 1.442695, %v977_v7  ;;  %v1050_v12 = vsel %vm895_vm2, %v2844_v8, 0.0  ;;  %2225 = vmatprep.subr.mxu0 %v2441_v0 }
 0x172   :  { %1051 = vadd.xlane.f32.xlu1 %v1050_v12  ;;  %v932_v13 = vpop.xlane.xlu1 %931  ;;  %v935_v16 = vpop.xlane.xlu0 %934  ;;  %v1044_v17 = vsel %vm895_vm2, %v2846_v14, 0.0 }
 0x173   :  { %2363 = vpow2.f32 %v1013_v18  ;;  %v980_v22 = vsub.f32 %v2775_v30, %v932_v13  ;;  %v981_v26 = vsub.f32 %v2779_v34, %v935_v16  ;;  %1045 = vadd.xlane.f32.xlu0 %v1044_v17  ;;  %v67_v13 = vld [vmem:[%s3241_s2 + $0x28] sm:$0x1]  ;;  %v62_v16 = vld [vmem:[%s3241_s2] sm:$0xff] }
 0x174   :  { %v2854_v19 = vpop.eup %2351  ;;  %2365 = vpow2.f32 %v1009_v11  ;;  %2239 = vmatpush3.msk.msra.mxu1 %vm1170_vm4, %v67_v13  ;;  %v72_v13 = vld [vmem:[%s3241_s2 + $0x50] sm:$0xff] }
 0x175   :  { %v2856_v21 = vpop.eup %2353  ;;  %v1015_v23 = vmul.f32 1.442695, %v980_v22  ;;  %v1017_v25 = vmul.f32 1.442695, %v981_v26  ;;  %v1053_v27 = vsel %vm895_vm2, %v2854_v19, 0.0  ;;  %2240 = vmatprep.subr.mxu1 %v2441_v0 }
 0x176   :  { %1054 = vadd.xlane.f32.xlu1 %v1053_v27  ;;  %v944_v28 = vpop.xlane.xlu1 %943  ;;  %v938_v29 = vpop.xlane.xlu0 %937  ;;  %v1047_v31 = vsel %vm902_vm3, %v2856_v21, 0.0 }
 0x177   :  { %2367 = vpow2.f32 %v1015_v23  ;;  %v984_v30 = vsub.f32 %v2783_v38, %v944_v28  ;;  %v982_v34 = vsub.f32 %v2787_v42, %v938_v29  ;;  %1048 = vadd.xlane.f32.xlu0 %v1047_v31  ;;  %v66_v23 = vld [vmem:[%s3241_s2 + $0x20] sm:$0xff]  ;;  %v65_v29 = vld [vmem:[%s3241_s2 + $0x18] sm:$0xff] }
 0x178   :  { %v2864_v32 = vpop.eup %2355  ;;  %2369 = vpow2.f32 %v1017_v25  ;;  %2241 = vmatpush3.msra.mxu1 %v66_v23 }
 0x179   :  { %v2866_v33 = vpop.eup %2357  ;;  %v1023_v35 = vmul.f32 1.442695, %v984_v30  ;;  %v1019_v36 = vmul.f32 1.442695, %v982_v34  ;;  %v1056_v37 = vsel %vm902_vm3, %v2864_v32, 0.0  ;;  %2242 = vmatprep.subr.mxu1 %v2441_v0 }
 0x17a   :  { %1057 = vadd.xlane.f32.xlu1 %v1056_v37  ;;  %v947_v39 = vpop.xlane.xlu1 %946  ;;  %v941_v40 = vpop.xlane.xlu0 %940  ;;  %v1059_v41 = vsel %vm895_vm2, %v2866_v33, 0.0  ;;  %2243 = vmatpush3.msra.mxu1 %v65_v29 }
 0x17b   :  { %2371 = vpow2.f32 %v1023_v35  ;;  %v985_v38 = vsub.f32 %v2791_v46, %v947_v39  ;;  %v983_v42 = vsub.f32 %v2795_v50, %v941_v40  ;;  %1060 = vadd.xlane.f32.xlu0 %v1059_v41  ;;  %2268 = vmatprep.subr.mxu1 %v2441_v0 }
 0x17c   :  { %v2874_v43 = vpop.eup %2359  ;;  %2373 = vpow2.f32 %v1019_v36 }
 0x17d   :  { %v2876_v44 = vpop.eup %2361  ;;  %v1025_v45 = vmul.f32 1.442695, %v985_v38  ;;  %v1021_v47 = vmul.f32 1.442695, %v983_v42  ;;  %v1068_v48 = vsel %vm895_vm2, %v2874_v43, 0.0 }
 0x17e   :  { %1069 = vadd.xlane.f32.xlu1 %v1068_v48  ;;  %v950_v51 = vpop.xlane.xlu1 %949  ;;  %v953_v49 = vpop.xlane.xlu0 %952  ;;  %v1062_v53 = vsel %vm895_vm2, %v2876_v44, 0.0 }
 0x17f   :  { %2375 = vpow2.f32 %v1025_v45  ;;  %v986_v46 = vsub.f32 %v2799_v56, %v950_v51  ;;  %v987_v50 = vsub.f32 %v2803_v62, %v953_v49  ;;  %1063 = vadd.xlane.f32.xlu0 %v1062_v53 }
 0x180   :  { %v2884_v54 = vpop.eup %2363  ;;  %2377 = vpow2.f32 %v1021_v47 }
 0x181   :  { %v2886_v52 = vpop.eup %2365  ;;  %v1027_v58 = vmul.f32 1.442695, %v986_v46  ;;  %v1029_v55 = vmul.f32 1.442695, %v987_v50  ;;  %v1071_v57 = vsel %vm895_vm2, %v2884_v54, 0.0 }
 0x182   :  { %1072 = vadd.xlane.f32.xlu1 %v1071_v57  ;;  %v962_v60 = vpop.xlane.xlu1 %961  ;;  %v956_v59 = vpop.xlane.xlu0 %955  ;;  %v1065_v3 = vsel %vm902_vm3, %v2886_v52, 0.0 }
 0x183   :  { %2379 = vpow2.f32 %v1027_v58  ;;  %v990_v56 = vsub.f32 %v2807_v5, %v962_v60  ;;  %v988_v62 = vsub.f32 %v2811_v9, %v956_v59  ;;  %1066 = vadd.xlane.f32.xlu0 %v1065_v3  ;;  %v63_v9 = vld [vmem:[%s3241_s2 + $0x8] sm:$0xff] }
 0x184   :  { %v2897_v1 = vpop.eup %2367  ;;  %2381 = vpow2.f32 %v1029_v55  ;;  %2226 = vmatpush3.msra.mxu0 %v63_v9 }
 0x185   :  { %v2900_v4 = vpop.eup %2369  ;;  %v1035_v2 = vmul.f32 1.442695, %v990_v56  ;;  %v1031_v10 = vmul.f32 1.442695, %v988_v62  ;;  %v1074_v5 = vsel %vm902_vm3, %v2897_v1, 0.0  ;;  %2227 = vmatprep.subr.mxu0 %v2441_v0 }
 0x186   :  { %1075 = vadd.xlane.f32.xlu1 %v1074_v5  ;;  %v965_v6 = vpop.xlane.xlu1 %964  ;;  %v1077_v7 = vsel %vm895_vm2, %v2900_v4, 0.0  ;;  %v959_v18 = vpop.xlane.xlu0 %958  ;;  %2228 = vmatpush3.msra.mxu0 %v62_v16  ;;  %v69_v5 = vld [vmem:[%s3241_s2 + $0x38] sm:$0xff] }
 0x187   :  { %2383 = vpow2.f32 %v1035_v2  ;;  %v991_v11 = vsub.f32 %v2815_v15, %v965_v6  ;;  %1078 = vadd.xlane.f32.xlu0 %v1077_v7  ;;  %v989_v12 = vsub.f32 %v2819_v20, %v959_v18  ;;  %2253 = vmatprep.subr.mxu0 %v2441_v0  ;;  %v73_v7 = vld [vmem:[%s3241_s2 + $0x58] sm:$0x1] }
 0x188   :  { %v2919_v17 = vpop.eup %2371  ;;  %2385 = vpow2.f32 %v1031_v10 }
 0x189   :  { %v2922_v15 = vpop.eup %2373  ;;  %v1037_v22 = vmul.f32 1.442695, %v991_v11  ;;  %v1033_v20 = vmul.f32 1.442695, %v989_v12  ;;  %v1086_v26 = vsel %vm895_vm2, %v2919_v17, 0.0 }
 0x18a   :  { %1087 = vadd.xlane.f32.xlu1 %v1086_v26  ;;  %v968_v25 = vpop.xlane.xlu1 %967  ;;  %v1080_v27 = vsel %vm895_vm2, %v2922_v15, 0.0  ;;  %v68_v26 = vld [vmem:[%s3241_s2 + $0x30] sm:$0xff] }
 0x18b   :  { %2387 = vpow2.f32 %v1037_v22  ;;  %v992_v28 = vsub.f32 %v2823_v24, %v968_v25  ;;  %1081 = vadd.xlane.f32.xlu0 %v1080_v27 }
 0x18c   :  { %v2938_v31 = vpop.eup %2375  ;;  %2389 = vpow2.f32 %v1033_v20 }
 0x18d   :  { %v2940_v30 = vpop.eup %2377  ;;  %v1039_v34 = vmul.f32 1.442695, %v992_v28  ;;  %v1089_v35 = vsel %vm895_vm2, %v2938_v31, 0.0 }
 0x18e   :  { %1090 = vadd.xlane.f32.xlu1 %v1089_v35  ;;  %v1083_v24 = vsel %vm902_vm3, %v2940_v30, 0.0 }
 0x18f   :  { %2391 = vpow2.f32 %v1039_v34  ;;  %1084 = vadd.xlane.f32.xlu0 %v1083_v24  ;;  %v76_v34 = vld [vmem:[%s3241_s2 + $0x70] sm:$0x1] }
 0x190   :  { %v2947_v36 = vpop.eup %2379 }
 0x191   :  { %v2949_v37 = vpop.eup %2381  ;;  %v1092_v39 = vsel %vm902_vm3, %v2947_v36, 0.0 }
 0x192   :  { %1093 = vadd.xlane.f32.xlu1 %v1092_v39  ;;  %v1095_v40 = vsel %vm895_vm2, %v2949_v37, 0.0 }
 0x193   :  { %1096 = vadd.xlane.f32.xlu0 %v1095_v40  ;;  %v79_v40 = vld [vmem:[%s3241_s2 + $0x88] sm:$0x1] }
 0x194   :  { %v2955_v41 = vpop.eup %2383 }
 0x195   :  { %v2957_v38 = vpop.eup %2385  ;;  %v1104_v42 = vsel %vm895_vm2, %v2955_v41, 0.0 }
 0x196   :  { %1105 = vadd.xlane.f32.xlu1 %v1104_v42  ;;  %v1098_v45 = vsel %vm895_vm2, %v2957_v38, 0.0 }
 0x197   :  { %1099 = vadd.xlane.f32.xlu0 %v1098_v45 }
 0x198   :  { %v2963_v47 = vpop.eup %2387 }
 0x199   :  { %v2965_v48 = vpop.eup %2389  ;;  %v1107_v51 = vsel %vm895_vm2, %v2963_v47, 0.0 }
 0x19a   :  { %1108 = vadd.xlane.f32.xlu1 %v1107_v51  ;;  %v1101_v49 = vsel %vm902_vm3, %v2965_v48, 0.0 }
 0x19b   :  { %1102 = vadd.xlane.f32.xlu0 %v1101_v49 }
 0x19c   :  { %v2971_v53 = vpop.eup %2391 }
 0x19d   :  { %v1110_v46 = vsel %vm902_vm3, %v2971_v53, 0.0 }
 0x19e   :  { %1111 = vadd.xlane.f32.xlu1 %v1110_v46 }
 0x1f7   :  { %v1043_v50 = vpop.xlane.xlu0 %1042 }
 0x1f8   :  { %2393 = vrcp.f32 %v1043_v50 }
 0x1fb   :  { %v1052_v58 = vpop.xlane.xlu1 %1051 }
 0x1fc   :  { %2395 = vrcp.f32 %v1052_v58  ;;  %v1046_v55 = vpop.xlane.xlu0 %1045 }
 0x1fd   :  { %2397 = vrcp.f32 %v1046_v55  ;;  %v74_v55 = vld [vmem:[%s3241_s2 + $0x60] sm:$0xff] }
 0x1ff   :  { %v1055_v57 = vpop.xlane.xlu1 %1054 }
 0x200   :  { %2399 = vrcp.f32 %v1055_v57  ;;  %v1049_v60 = vpop.xlane.xlu0 %1048 }
 0x201   :  { %2401 = vrcp.f32 %v1049_v60 }
 0x203   :  { %v1058_v59 = vpop.xlane.xlu1 %1057 }
 0x204   :  { %2403 = vrcp.f32 %v1058_v59  ;;  %v1061_v3 = vpop.xlane.xlu0 %1060 }
 0x205   :  { %v2394_v56 = vpop.eup %2393  ;;  %2405 = vrcp.f32 %v1061_v3 }
 0x206   :  { %v1114_v62 = vmul.f32 %v2394_v56, %v2838_v61 }
 0x207   :  { %v1070_v2 = vpop.xlane.xlu1 %1069 }
 0x208   :  { %2407 = vrcp.f32 %v1070_v2  ;;  %v1064_v10 = vpop.xlane.xlu0 %1063  ;;  %2230 = vmatmul.mubr.msk.f32.vlgmr.msra.gmra.mxu0 %vm895_vm2, %v1114_v62 }
 0x209   :  { %v2396_v9 = vpop.eup %2395  ;;  %2409 = vrcp.f32 %v1064_v10  ;;  %2232 = vmatprep.mubr.msk.f32.mxu0 %vm2442_vm1, %v2441_v0  ;;  %2254 = vmatpush3.msk.msra.mxu0 %vm1170_vm4, %v70_v63  ;;  %v82_v63 = vld [vmem:[%s3241_s2 + $0xa0] sm:$0x1]  ;;  %v85_v10 = vld [vmem:[%s3241_s2 + $0xb8] sm:$0x1] }
 0x20a   :  { %v2398_v61 = vpop.eup %2397  ;;  %v1120_v6 = vmul.f32 %v2396_v9, %v2844_v8  ;;  %2255 = vmatprep.subr.mxu0 %v2441_v0 }
 0x20b   :  { %v1073_v18 = vpop.xlane.xlu1 %1072  ;;  %v1116_v11 = vmul.f32 %v2398_v61, %v2846_v14  ;;  %2256 = vmatpush3.msra.mxu0 %v69_v5 }
 0x20c   :  { %2411 = vrcp.f32 %v1073_v18  ;;  %v1067_v12 = vpop.xlane.xlu0 %1066  ;;  %2245 = vmatmul.mubr.msk.f32.vlgmr.msra.gmra.mxu1 %vm895_vm2, %v1120_v6  ;;  %2257 = vmatprep.subr.mxu0 %v2441_v0  ;;  %v84_v18 = vld [vmem:[%s3241_s2 + $0xb0] sm:$0xff] }
 0x20d   :  { %v2400_v8 = vpop.eup %2399  ;;  %2413 = vrcp.f32 %v1067_v12  ;;  %2233 = vmatmul.mubr.msk.f32.gmra.mxu0 %vm895_vm2, %v1116_v11  ;;  %2269 = vmatpush3.msk.msra.mxu1 %vm1170_vm4, %v73_v7 }
 0x20e   :  { %v2402_v16 = vpop.eup %2401  ;;  %2247 = vmatprep.mubr.msk.f32.mxu1 %vm2442_vm1, %v2441_v0  ;;  %2270 = vmatprep.subr.mxu1 %v2441_v0  ;;  %v1122_v14 = vmul.f32 %v2400_v8, %v2854_v19  ;;  %v71_v19 = vld [vmem:[%s3241_s2 + $0x48] sm:$0xff] }
 0x20f   :  { %v1076_v22 = vpop.xlane.xlu1 %1075  ;;  %2235 = vmatprep.mubr.msk.f32.mxu0 %vm2442_vm1, %v2441_v0  ;;  %v1118_v20 = vmul.f32 %v2402_v16, %v2856_v21  ;;  %2271 = vmatpush3.msra.mxu1 %v72_v13  ;;  %v80_v13 = vld [vmem:[%s3241_s2 + $0x90] sm:$0xff]  ;;  %v83_v16 = vld [vmem:[%s3241_s2 + $0xa8] sm:$0xff] }
 0x210   :  { %2415 = vrcp.f32 %v1076_v22  ;;  %v1079_v23 = vpop.xlane.xlu0 %1078  ;;  %2248 = vmatmul.mubr.msk.f32.gmra.mxu1 %vm895_vm2, %v1122_v14  ;;  %2272 = vmatprep.subr.mxu1 %v2441_v0 }
 0x211   :  { %v2404_v25 = vpop.eup %2403  ;;  %2417 = vrcp.f32 %v1079_v23  ;;  %2236 = vmatmul.mubr.msk.f32.gmra.mxu0 %vm895_vm2, %v1118_v20  ;;  %2250 = vmatprep.mubr.msk.f32.mxu1 %vm2442_vm1, %v2441_v0 }
 0x212   :  { %v2406_v21 = vpop.eup %2405  ;;  %2258 = vmatpush3.msra.mxu0 %v68_v26  ;;  %2259 = vmatprep.mubr.msk.f32.mxu0 %vm2442_vm1, %v2441_v0  ;;  %v1124_v27 = vmul.f32 %v2404_v25, %v2864_v32  ;;  %v75_v32 = vld [vmem:[%s3241_s2 + $0x68] sm:$0xff] }
 0x213   :  { %v1126_v28 = vmul.f32 %v2406_v21, %v2866_v33  ;;  %v1088_v29 = vpop.xlane.xlu1 %1087  ;;  %2273 = vmatpush3.msra.mxu1 %v71_v19  ;;  %2283 = vmatprep.subr.mxu0 %v2441_v0 }
 0x214   :  { %2419 = vrcp.f32 %v1088_v29  ;;  %v1082_v35 = vpop.xlane.xlu0 %1081  ;;  %2251 = vmatmul.mubr.msk.f32.gmra.mxu1 %vm895_vm2, %v1124_v27  ;;  %2298 = vmatprep.subr.mxu1 %v2441_v0 }
 0x215   :  { %v2408_v24 = vpop.eup %2407  ;;  %2421 = vrcp.f32 %v1082_v35  ;;  %2260 = vmatmul.mubr.msk.f32.vlgmr.msra.gmra.mxu0 %vm895_vm2, %v1126_v28  ;;  %2274 = vmatprep.mubr.msk.f32.mxu1 %vm2442_vm1, %v2441_v0 }
 0x216   :  { %v2410_v33 = vpop.eup %2409  ;;  %v1132_v39 = vmul.f32 %v2408_v24, %v2874_v43  ;;  %2262 = vmatprep.mubr.msk.f32.mxu0 %vm2442_vm1, %v2441_v0  ;;  %2284 = vmatpush3.msk.msra.mxu0 %vm1170_vm4, %v76_v34  ;;  %v78_v43 = vld [vmem:[%s3241_s2 + $0x80] sm:$0xff] }
 0x217   :  { %v1091_v42 = vpop.xlane.xlu1 %1090  ;;  %v1128_v45 = vmul.f32 %v2410_v33, %v2876_v44  ;;  %2285 = vmatprep.subr.mxu0 %v2441_v0 }
 0x218   :  { %2423 = vrcp.f32 %v1091_v42  ;;  %v1085_v51 = vpop.xlane.xlu0 %1084  ;;  %2275 = vmatmul.mubr.msk.f32.vlgmr.msra.gmra.mxu1 %vm895_vm2, %v1132_v39  ;;  %2286 = vmatpush3.msra.mxu0 %v75_v32 }
 0x219   :  { %v2412_v49 = vpop.eup %2411  ;;  %2425 = vrcp.f32 %v1085_v51  ;;  %2263 = vmatmul.mubr.msk.f32.gmra.mxu0 %vm895_vm2, %v1128_v45  ;;  %2299 = vmatpush3.msk.msra.mxu1 %vm1170_vm4, %v79_v40 }
 0x21a   :  { %v2414_v46 = vpop.eup %2413  ;;  %2277 = vmatprep.mubr.msk.f32.mxu1 %vm2442_vm1, %v2441_v0  ;;  %2300 = vmatprep.subr.mxu1 %v2441_v0  ;;  %v1134_v44 = vmul.f32 %v2412_v49, %v2884_v54  ;;  %v77_v54 = vld [vmem:[%s3241_s2 + $0x78] sm:$0xff] }
 0x21b   :  { %v1094_v50 = vpop.xlane.xlu1 %1093  ;;  %2265 = vmatprep.mubr.msk.f32.mxu0 %vm2442_vm1, %v2441_v0  ;;  %v1130_v58 = vmul.f32 %v2414_v46, %v2886_v52  ;;  %2301 = vmatpush3.msra.mxu1 %v78_v43 }
 0x21c   :  { %2427 = vrcp.f32 %v1094_v50  ;;  %v1097_v57 = vpop.xlane.xlu0 %1096  ;;  %2278 = vmatmul.mubr.msk.f32.gmra.mxu1 %vm895_vm2, %v1134_v44  ;;  %2287 = vmatprep.subr.mxu0 %v2441_v0 }
 0x21d   :  { %v2416_v60 = vpop.eup %2415  ;;  %2429 = vrcp.f32 %v1097_v57  ;;  %2266 = vmatmul.mubr.msk.f32.gmra.mxu0 %vm895_vm2, %v1130_v58  ;;  %2280 = vmatprep.mubr.msk.f32.mxu1 %vm2442_vm1, %v2441_v0 }
 0x21e   :  { %v2418_v52 = vpop.eup %2417  ;;  %2302 = vmatprep.subr.mxu1 %v2441_v0  ;;  %2288 = vmatpush3.msra.mxu0 %v74_v55  ;;  %v1136_v59 = vmul.f32 %v2416_v60, %v2897_v1 }
 0x21f   :  { %v1138_v3 = vmul.f32 %v2418_v52, %v2900_v4  ;;  %v1106_v56 = vpop.xlane.xlu1 %1105  ;;  %2289 = vmatprep.mubr.msk.f32.mxu0 %vm2442_vm1, %v2441_v0  ;;  %2303 = vmatpush3.msra.mxu1 %v77_v54 }
 0x220   :  { %2431 = vrcp.f32 %v1106_v56  ;;  %v1100_v62 = vpop.xlane.xlu0 %1099  ;;  %2281 = vmatmul.mubr.msk.f32.gmra.mxu1 %vm895_vm2, %v1136_v59  ;;  %2328 = vmatprep.subr.mxu1 %v2441_v0 }
 0x221   :  { %v2420_v2 = vpop.eup %2419  ;;  %2433 = vrcp.f32 %v1100_v62  ;;  %2290 = vmatmul.mubr.msk.f32.vlgmr.msra.gmra.mxu0 %vm895_vm2, %v1138_v3  ;;  %2304 = vmatprep.mubr.msk.f32.mxu1 %vm2442_vm1, %v2441_v0 }
 0x222   :  { %v2422_v1 = vpop.eup %2421  ;;  %v1144_v4 = vmul.f32 %v2420_v2, %v2919_v17  ;;  %2292 = vmatprep.mubr.msk.f32.mxu0 %vm2442_vm1, %v2441_v0  ;;  %2313 = vmatprep.subr.mxu0 %v2441_v0  ;;  %v81_v17 = vld [vmem:[%s3241_s2 + $0x98] sm:$0xff] }
 0x223   :  { %v1109_v5 = vpop.xlane.xlu1 %1108  ;;  %v1140_v9 = vmul.f32 %v2422_v1, %v2922_v15  ;;  %2314 = vmatpush3.msk.msra.mxu0 %vm1170_vm4, %v82_v63 }
 0x224   :  { %2435 = vrcp.f32 %v1109_v5  ;;  %v1103_v61 = vpop.xlane.xlu0 %1102  ;;  %2305 = vmatmul.mubr.msk.f32.vlgmr.msra.gmra.mxu1 %vm895_vm2, %v1144_v4  ;;  %2315 = vmatprep.subr.mxu0 %v2441_v0 }
 0x225   :  { %v2424_v6 = vpop.eup %2423  ;;  %2437 = vrcp.f32 %v1103_v61  ;;  %2293 = vmatmul.mubr.msk.f32.gmra.mxu0 %vm895_vm2, %v1140_v9  ;;  %2329 = vmatpush3.msk.msra.mxu1 %vm1170_vm4, %v85_v10 }
 0x226   :  { %v2426_v7 = vpop.eup %2425  ;;  %2307 = vmatprep.mubr.msk.f32.mxu1 %vm2442_vm1, %v2441_v0  ;;  %2330 = vmatprep.subr.mxu1 %v2441_v0  ;;  %v1146_v15 = vmul.f32 %v2424_v6, %v2938_v31 }
 0x227   :  { %v1112_v11 = vpop.xlane.xlu1 %1111  ;;  %2295 = vmatprep.mubr.msk.f32.mxu0 %vm2442_vm1, %v2441_v0  ;;  %v1142_v12 = vmul.f32 %v2426_v7, %v2940_v30  ;;  %2316 = vmatpush3.msra.mxu0 %v81_v17 }
 0x228   :  { %2439 = vrcp.f32 %v1112_v11  ;;  %2308 = vmatmul.mubr.msk.f32.gmra.mxu1 %vm895_vm2, %v1146_v15  ;;  %2317 = vmatprep.subr.mxu0 %v2441_v0 }
 0x229   :  { %v2428_v31 = vpop.eup %2427  ;;  %2296 = vmatmul.mubr.msk.f32.gmra.mxu0 %vm895_vm2, %v1142_v12  ;;  %2331 = vmatpush3.msra.mxu1 %v84_v18 }
 0x22a   :  { %v2430_v8 = vpop.eup %2429  ;;  %2310 = vmatprep.mubr.msk.f32.mxu1 %vm2442_vm1, %v2441_v0  ;;  %2318 = vmatpush3.msra.mxu0 %v80_v13  ;;  %v1148_v30 = vmul.f32 %v2428_v31, %v2947_v36 }
 0x22b   :  { %v1150_v14 = vmul.f32 %v2430_v8, %v2949_v37  ;;  %2319 = vmatprep.mubr.msk.f32.mxu0 %vm2442_vm1, %v2441_v0  ;;  %2332 = vmatprep.subr.mxu1 %v2441_v0 }
 0x22c   :  { %2311 = vmatmul.mubr.msk.f32.gmra.mxu1 %vm895_vm2, %v1148_v30 }
 0x22d   :  { %v2432_v22 = vpop.eup %2431  ;;  %2320 = vmatmul.mubr.msk.f32.vlgmr.msra.gmra.mxu0 %vm895_vm2, %v1150_v14  ;;  %2333 = vmatpush3.msra.mxu1 %v83_v16 }
 0x22e   :  { %v2434_v20 = vpop.eup %2433  ;;  %v1156_v36 = vmul.f32 %v2432_v22, %v2955_v41  ;;  %2322 = vmatprep.mubr.msk.f32.mxu0 %vm2442_vm1, %v2441_v0  ;;  %2334 = vmatprep.mubr.msk.f32.mxu1 %vm2442_vm1, %v2441_v0 }
 0x22f   :  { %v1152_v37 = vmul.f32 %v2434_v20, %v2957_v38 }
 0x230   :  { %2335 = vmatmul.mubr.msk.f32.vlgmr.msra.gmra.mxu1 %vm895_vm2, %v1156_v36 }
 0x231   :  { %v2436_v26 = vpop.eup %2435  ;;  %2323 = vmatmul.mubr.msk.f32.gmra.mxu0 %vm895_vm2, %v1152_v37  ;;  %2337 = vmatprep.mubr.msk.f32.mxu1 %vm2442_vm1, %v2441_v0 }
 0x232   :  { %v2438_v23 = vpop.eup %2437  ;;  %2325 = vmatprep.mubr.msk.f32.mxu0 %vm2442_vm1, %v2441_v0  ;;  %v1158_v41 = vmul.f32 %v2436_v26, %v2963_v47 }
 0x233   :  { %v1154_v19 = vmul.f32 %v2438_v23, %v2965_v48 }
 0x234   :  { %2338 = vmatmul.mubr.msk.f32.gmra.mxu1 %vm895_vm2, %v1158_v41 }
 0x235   :  { %v2440_v25 = vpop.eup %2439  ;;  %2326 = vmatmul.mubr.msk.f32.gmra.mxu0 %vm895_vm2, %v1154_v19  ;;  %2340 = vmatprep.mubr.msk.f32.mxu1 %vm2442_vm1, %v2441_v0 }
 0x236   :  { %v1160_v38 = vmul.f32 %v2440_v25, %v2971_v53 }
 0x238   :  { %2341 = vmatmul.mubr.msk.f32.gmra.mxu1 %vm895_vm2, %v1160_v38 }
 0x2c8   :  { %v1240_v21 = vpop.f32.mrf.mxu0 }
 0x2c9   :  { %1898 = vst.msk [vmem:[%s3242_s3] sm:$0xff] %vm86_vm0, %v1240_v21 }
 0x2ca   :  { %v2231_v47 = vpop.f32.mrf.mxu0 }
 0x2cc   :  { %v1332_v48 = vpop.f32.mrf.mxu1 }
 0x2cd   :  { %v1245_v27 = vpop.f32.mrf.mxu0  ;;  %1902 = vst.msk [vmem:[%s3242_s3 + $0x18] sm:$0xff] %vm86_vm0, %v1332_v48 }
 0x2ce   :  { %1899 = vst.msk [vmem:[%s3242_s3 + $0x8] sm:$0xff] %vm86_vm0, %v1245_v27  ;;  %v2246_v0 = vpop.f32.mrf.mxu1 }
 0x2cf   :  { %v2234_v53 = vpop.f32.mrf.mxu0 }
 0x2d0   :  { %v1337_v28 = vpop.f32.mrf.mxu1 }
 0x2d1   :  { %v1250_v29 = vpop.f32.mrf.mxu0  ;;  %1903 = vst.msk [vmem:[%s3242_s3 + $0x20] sm:$0xff] %vm86_vm0, %v1337_v28 }
 0x2d2   :  { %1901 = vst.msk [vmem:[%s3242_s3 + $0x10] sm:$0x1] %vm1900_vm5, %v1250_v29  ;;  %v2249_v34 = vpop.f32.mrf.mxu1 }
 0x2d3   :  { %v2237_v35 = vpop.f32.mrf.mxu0 }
 0x2d4   :  { %v1342_v24 = vpop.f32.mrf.mxu1 }
 0x2d5   :  { %1904 = vst.msk [vmem:[%s3242_s3 + $0x28] sm:$0x1] %vm1900_vm5, %v1342_v24  ;;  %v1424_v32 = vpop.f32.mrf.mxu0 }
 0x2d6   :  { %1905 = vst.msk [vmem:[%s3242_s3 + $0x30] sm:$0xff] %vm86_vm0, %v1424_v32  ;;  %v2252_v33 = vpop.f32.mrf.mxu1 }
 0x2d7   :  { %v2261_v39 = vpop.f32.mrf.mxu0 }
 0x2d8   :  { %v1516_v40 = vpop.f32.mrf.mxu1 }
 0x2d9   :  { %v1429_v42 = vpop.f32.mrf.mxu0  ;;  %1908 = vst.msk [vmem:[%s3242_s3 + $0x48] sm:$0xff] %vm86_vm0, %v1516_v40 }
 0x2da   :  { %1906 = vst.msk [vmem:[%s3242_s3 + $0x38] sm:$0xff] %vm86_vm0, %v1429_v42  ;;  %v2276_v45 = vpop.f32.mrf.mxu1 }
 0x2db   :  { %v2264_v51 = vpop.f32.mrf.mxu0 }
 0x2dc   :  { %v1521_v43 = vpop.f32.mrf.mxu1 }
 0x2dd   :  { %v1434_v49 = vpop.f32.mrf.mxu0  ;;  %1909 = vst.msk [vmem:[%s3242_s3 + $0x50] sm:$0xff] %vm86_vm0, %v1521_v43 }
 0x2de   :  { %1907 = vst.msk [vmem:[%s3242_s3 + $0x40] sm:$0x1] %vm1900_vm5, %v1434_v49  ;;  %v2279_v46 = vpop.f32.mrf.mxu1 }
 0x2df   :  { %v2267_v44 = vpop.f32.mrf.mxu0 }
 0x2e0   :  { %v1526_v50 = vpop.f32.mrf.mxu1 }
 0x2e1   :  { %1910 = vst.msk [vmem:[%s3242_s3 + $0x58] sm:$0x1] %vm1900_vm5, %v1526_v50  ;;  %v1608_v58 = vpop.f32.mrf.mxu0 }
 0x2e2   :  { %1911 = vst.msk [vmem:[%s3242_s3 + $0x60] sm:$0xff] %vm86_vm0, %v1608_v58  ;;  %v2282_v55 = vpop.f32.mrf.mxu1 }
 0x2e3   :  { %v2291_v57 = vpop.f32.mrf.mxu0 }
 0x2e4   :  { %v1700_v54 = vpop.f32.mrf.mxu1 }
 0x2e5   :  { %v1613_v60 = vpop.f32.mrf.mxu0  ;;  %1914 = vst.msk [vmem:[%s3242_s3 + $0x78] sm:$0xff] %vm86_vm0, %v1700_v54 }
 0x2e6   :  { %1912 = vst.msk [vmem:[%s3242_s3 + $0x68] sm:$0xff] %vm86_vm0, %v1613_v60  ;;  %v2306_v52 = vpop.f32.mrf.mxu1 }
 0x2e7   :  { %v2294_v59 = vpop.f32.mrf.mxu0 }
 0x2e8   :  { %v1705_v3 = vpop.f32.mrf.mxu1 }
 0x2e9   :  { %v1618_v56 = vpop.f32.mrf.mxu0  ;;  %1915 = vst.msk [vmem:[%s3242_s3 + $0x80] sm:$0xff] %vm86_vm0, %v1705_v3 }
 0x2ea   :  { %1913 = vst.msk [vmem:[%s3242_s3 + $0x70] sm:$0x1] %vm1900_vm5, %v1618_v56  ;;  %v2309_v62 = vpop.f32.mrf.mxu1 }
 0x2eb   :  { %v2297_v63 = vpop.f32.mrf.mxu0 }
 0x2ec   :  { %v1710_v2 = vpop.f32.mrf.mxu1 }
 0x2ed   :  { %1916 = vst.msk [vmem:[%s3242_s3 + $0x88] sm:$0x1] %vm1900_vm5, %v1710_v2  ;;  %v1792_v1 = vpop.f32.mrf.mxu0 }
 0x2ee   :  { %1917 = vst.msk [vmem:[%s3242_s3 + $0x90] sm:$0xff] %vm86_vm0, %v1792_v1  ;;  %v2312_v4 = vpop.f32.mrf.mxu1 }
 0x2ef   :  { %v2321_v10 = vpop.f32.mrf.mxu0 }
 0x2f0   :  { %v1884_v5 = vpop.f32.mrf.mxu1 }
 0x2f1   :  { %v1797_v9 = vpop.f32.mrf.mxu0  ;;  %1920 = vst.msk [vmem:[%s3242_s3 + $0xa8] sm:$0xff] %vm86_vm0, %v1884_v5 }
 0x2f2   :  { %1918 = vst.msk [vmem:[%s3242_s3 + $0x98] sm:$0xff] %vm86_vm0, %v1797_v9  ;;  %v2336_v61 = vpop.f32.mrf.mxu1 }
 0x2f3   :  { %v2324_v17 = vpop.f32.mrf.mxu0 }
 0x2f4   :  { %v1889_v6 = vpop.f32.mrf.mxu1 }
 0x2f5   :  { %v1802_v7 = vpop.f32.mrf.mxu0  ;;  %1921 = vst.msk [vmem:[%s3242_s3 + $0xb0] sm:$0xff] %vm86_vm0, %v1889_v6 }
 0x2f6   :  { %1919 = vst.msk [vmem:[%s3242_s3 + $0xa0] sm:$0x1] %vm1900_vm5, %v1802_v7  ;;  %v2339_v15 = vpop.f32.mrf.mxu1 }
 0x2f7   :  { %v2327_v18 = vpop.f32.mrf.mxu0 }
 0x2f8   :  { %v1894_v11 = vpop.f32.mrf.mxu1 }
 0x2f9   :  { %1922 = vst.msk [vmem:[%s3242_s3 + $0xb8] sm:$0x1] %vm1900_vm5, %v1894_v11 }
 0x2fa   :  { %v2342_v12 = vpop.f32.mrf.mxu1 }

// kernel: ummt_forward.40
= control target key start
LH: loop header
LB: loop body
LE: loop exit
PB: predicated region body
PF: predicated region fallthrough
CT: control target
= control target key end

     0   :  { %v398_v3 = vmov 0.0   ;;  %s662_s1 = inlined_call_operand.vmem [shape: f32[128,256], index: 1, kind: input, shape index: {}]   ;;  %s663_s3 = inlined_call_operand.vmem [shape: f32[256,128], index: 3, kind: input, shape index: {}]   ;;  %s664_s0 = inlined_call_operand.vmem [shape: f32[40,128], index: 0, kind: input, shape index: {}]   ;;  %s665_s2 = inlined_call_operand.vmem [shape: f32[1,256], index: 2, kind: input, shape index: {}]   ;;  %s666_s4 = inlined_call_operand.vmem [shape: f32[1,128], index: 4, kind: input, shape index: {}]   ;;  %s667_s5 = inlined_call_operand.vmem [shape: f32[40,128], index: 5, kind: output, shape index: {}]  }
   0x1   :  { %v65_v0 = vld [vmem:[%s662_s1 + $0xf8] sm:$0xff]  ;;  %v64_v1 = vld [vmem:[%s662_s1 + $0xf0] sm:$0xff]  ;;  %v63_v2 = vld [vmem:[%s662_s1 + $0xe8] sm:$0xff]  ;;  %142 = vmatprep.mubr.f32.mxu0 %v398_v3 }
   0x2   :  { %78 = vmatprep.subr.mxu0 %v65_v0  ;;  %v62_v4 = vld [vmem:[%s662_s1 + $0xe0] sm:$0xff]  ;;  %v61_v5 = vld [vmem:[%s662_s1 + $0xd8] sm:$0xff]  ;;  %v60_v6 = vld [vmem:[%s662_s1 + $0xd0] sm:$0xff] }
   0x3   :  { %79 = vmatpush1.msra.mxu0 %v64_v1  ;;  %v59_v7 = vld [vmem:[%s662_s1 + $0xc8] sm:$0xff]  ;;  %v58_v8 = vld [vmem:[%s662_s1 + $0xc0] sm:$0xff]  ;;  %v57_v9 = vld [vmem:[%s662_s1 + $0xb8] sm:$0xff] }
   0x4   :  { %80 = vmatprep.subr.mxu0 %v63_v2  ;;  %v56_v10 = vld [vmem:[%s662_s1 + $0xb0] sm:$0xff]  ;;  %v55_v11 = vld [vmem:[%s662_s1 + $0xa8] sm:$0xff]  ;;  %v54_v12 = vld [vmem:[%s662_s1 + $0xa0] sm:$0xff] }
   0x5   :  { %81 = vmatpush1.msra.mxu0 %v62_v4  ;;  %v53_v13 = vld [vmem:[%s662_s1 + $0x98] sm:$0xff]  ;;  %v52_v14 = vld [vmem:[%s662_s1 + $0x90] sm:$0xff]  ;;  %v51_v15 = vld [vmem:[%s662_s1 + $0x88] sm:$0xff] }
   0x6   :  { %82 = vmatprep.subr.mxu0 %v61_v5  ;;  %v219_v16 = vld [vmem:[%s663_s3 + $0xf8] sm:$0xff]  ;;  %v50_v18 = vld [vmem:[%s662_s1 + $0x80] sm:$0xff]  ;;  %v218_v19 = vld [vmem:[%s663_s3 + $0xf0] sm:$0xff] }
   0x7   :  { %83 = vmatpush1.msra.mxu0 %v60_v6  ;;  %v203_v17 = vld [vmem:[%s663_s3 + $0x78] sm:$0xff]  ;;  %350 = vmatprep.subr.mxu1 %v219_v16  ;;  %v202_v20 = vld [vmem:[%s663_s3 + $0x70] sm:$0xff]  ;;  %v217_v22 = vld [vmem:[%s663_s3 + $0xe8] sm:$0xff]  ;;  %v68_v6 = vlaneseq }
   0x8   :  { %84 = vmatprep.subr.mxu0 %v59_v7  ;;  %v49_v21 = vld [vmem:[%s662_s1 + $0x78] sm:$0xff]  ;;  %351 = vmatpush3.msra.mxu1 %v203_v17  ;;  %v48_v23 = vld [vmem:[%s662_s1 + $0x70] sm:$0xff]  ;;  %v201_v24 = vld [vmem:[%s663_s3 + $0x68] sm:$0xff] }
   0x9   :  { %85 = vmatpush1.msra.mxu0 %v58_v8  ;;  %352 = vmatprep.subr.mxu1 %v218_v19  ;;  %v47_v25 = vld [vmem:[%s662_s1 + $0x68] sm:$0xff]  ;;  %v216_v26 = vld [vmem:[%s663_s3 + $0xe0] sm:$0xff]  ;;  %v45_v29 = vld [vmem:[%s662_s1 + $0x58] sm:$0xff]  ;;  %v69_v7 = vshrl.u32 %v68_v6, 7 }
   0xa   :  { %86 = vmatprep.subr.mxu0 %v57_v9  ;;  %353 = vmatpush3.msra.mxu1 %v202_v20  ;;  %v46_v27 = vld [vmem:[%s662_s1 + $0x60] sm:$0xff]  ;;  %v215_v30 = vld [vmem:[%s663_s3 + $0xd8] sm:$0xff]  ;;  %v44_v31 = vld [vmem:[%s662_s1 + $0x50] sm:$0xff] }
   0xb   :  { %87 = vmatpush1.msra.mxu0 %v56_v10  ;;  %354 = vmatprep.subr.mxu1 %v217_v22  ;;  %v200_v28 = vld [vmem:[%s663_s3 + $0x60] sm:$0xff]  ;;  %v199_v32 = vld [vmem:[%s663_s3 + $0x58] sm:$0xff]  ;;  %v43_v33 = vld [vmem:[%s662_s1 + $0x48] sm:$0xff]  ;;  %v70_v8 = vsub.s32 0, %v69_v7  ;;  %v74_v10 = vsub.s32 1, %v69_v7 }
   0xc   :  { %88 = vmatprep.subr.mxu0 %v55_v11  ;;  %355 = vmatpush3.msra.mxu1 %v201_v24  ;;  %v214_v34 = vld [vmem:[%s663_s3 + $0xd0] sm:$0xff]  ;;  %v42_v35 = vld [vmem:[%s662_s1 + $0x40] sm:$0xff]  ;;  %v41_v37 = vld [vmem:[%s662_s1 + $0x38] sm:$0xff] }
   0xd   :  { %89 = vmatpush1.msra.mxu0 %v54_v12  ;;  %356 = vmatprep.subr.mxu1 %v216_v26  ;;  %v198_v36 = vld [vmem:[%s663_s3 + $0x50] sm:$0xff]  ;;  %v213_v38 = vld [vmem:[%s663_s3 + $0xc8] sm:$0xff]  ;;  %v212_v42 = vld [vmem:[%s663_s3 + $0xc0] sm:$0xff] }
   0xe   :  { %90 = vmatprep.subr.mxu0 %v53_v13  ;;  %357 = vmatpush3.msra.mxu1 %v200_v28  ;;  %v40_v39 = vld [vmem:[%s662_s1 + $0x30] sm:$0xff]  ;;  %v197_v40 = vld [vmem:[%s663_s3 + $0x48] sm:$0xff]  ;;  %v38_v43 = vld [vmem:[%s662_s1 + $0x20] sm:$0xff] }
   0xf   :  { %91 = vmatpush1.msra.mxu0 %v52_v14  ;;  %358 = vmatprep.subr.mxu1 %v215_v30  ;;  %v39_v41 = vld [vmem:[%s662_s1 + $0x28] sm:$0xff]  ;;  %v196_v44 = vld [vmem:[%s663_s3 + $0x40] sm:$0xff]  ;;  %v37_v45 = vld [vmem:[%s662_s1 + $0x18] sm:$0xff] }
  0x10   :  { %92 = vmatprep.subr.mxu0 %v51_v15  ;;  %359 = vmatpush3.msra.mxu1 %v199_v32  ;;  %v211_v46 = vld [vmem:[%s663_s3 + $0xb8] sm:$0xff]  ;;  %v36_v47 = vld [vmem:[%s662_s1 + $0x10] sm:$0xff]  ;;  %v35_v49 = vld [vmem:[%s662_s1 + $0x8] sm:$0xff] }
  0x11   :  { %93 = vmatpush1.msra.mxu0 %v50_v18  ;;  %360 = vmatprep.subr.mxu1 %v214_v34  ;;  %v195_v48 = vld [vmem:[%s663_s3 + $0x38] sm:$0xff]  ;;  %v210_v50 = vld [vmem:[%s663_s3 + $0xb0] sm:$0xff]  ;;  %v34_v51 = vld [vmem:[%s662_s1] sm:$0xff] }
  0x12   :  { %94 = vmatprep.subr.mxu0 %v49_v21  ;;  %361 = vmatpush3.msra.mxu1 %v198_v36  ;;  %v194_v52 = vld [vmem:[%s663_s3 + $0x30] sm:$0xff]  ;;  %v29_v53 = vld [vmem:[%s664_s0] sm:$0xff]  ;;  %v209_v54 = vld [vmem:[%s663_s3 + $0xa8] sm:$0xff] }
  0x13   :  { %95 = vmatpush1.msra.mxu0 %v48_v23  ;;  %362 = vmatprep.subr.mxu1 %v213_v38  ;;  %v193_v55 = vld [vmem:[%s663_s3 + $0x28] sm:$0xff]  ;;  %v208_v56 = vld [vmem:[%s663_s3 + $0xa0] sm:$0xff]  ;;  %v31_v59 = vld [vmem:[%s664_s0 + $0x10] sm:$0xff] }
  0x14   :  { %96 = vmatprep.subr.mxu0 %v47_v25  ;;  %363 = vmatpush3.msra.mxu1 %v197_v40  ;;  %v192_v57 = vld [vmem:[%s663_s3 + $0x20] sm:$0xff]  ;;  %v30_v58 = vld [vmem:[%s664_s0 + $0x8] sm:$0xff]  ;;  %v32_v60 = vld [vmem:[%s664_s0 + $0x18] sm:$0xff] }
  0x15   :  { %97 = vmatpush1.msra.mxu0 %v46_v27  ;;  %364 = vmatprep.subr.mxu1 %v212_v42  ;;  %v33_v61 = vld [vmem:[%s664_s0 + $0x20] sm:$0xff]  ;;  %v207_v62 = vld [vmem:[%s663_s3 + $0x98] sm:$0xff]  ;;  %v206_v0 = vld [vmem:[%s663_s3 + $0x90] sm:$0xff] }
  0x16   :  { %98 = vmatprep.subr.mxu0 %v45_v29  ;;  %365 = vmatpush3.msra.mxu1 %v196_v44  ;;  %v191_v63 = vld [vmem:[%s663_s3 + $0x18] sm:$0xff]  ;;  %v190_v1 = vld [vmem:[%s663_s3 + $0x10] sm:$0xff]  ;;  %v205_v2 = vld [vmem:[%s663_s3 + $0x88] sm:$0xff] }
  0x17   :  { %99 = vmatpush1.msra.mxu0 %v44_v31  ;;  %366 = vmatprep.subr.mxu1 %v211_v46  ;;  %v204_v4 = vld [vmem:[%s663_s3 + $0x80] sm:$0xff] }
  0x18   :  { %100 = vmatprep.subr.mxu0 %v43_v33  ;;  %367 = vmatpush3.msra.mxu1 %v195_v48  ;;  %v188_v5 = vld [vmem:[%s663_s3] sm:$0xff] }
  0x19   :  { %101 = vmatpush1.msra.mxu0 %v42_v35  ;;  %368 = vmatprep.subr.mxu1 %v210_v50  ;;  %v66_v9 = vld [vmem:[%s665_s2] sm:$0x3] }
  0x1a   :  { %102 = vmatprep.subr.mxu0 %v41_v37  ;;  %369 = vmatpush3.msra.mxu1 %v194_v52  ;;  %v71_v11 = vrot.slane %v66_v9, %v70_v8  ;;  %v75_v12 = vrot.slane %v66_v9, %v74_v10 }
  0x1b   :  { %103 = vmatpush1.msra.mxu0 %v40_v39  ;;  %370 = vmatprep.subr.mxu1 %v209_v54 }
  0x1c   :  { %104 = vmatprep.subr.mxu0 %v39_v41  ;;  %371 = vmatpush3.msra.mxu1 %v193_v55 }
  0x1d   :  { %105 = vmatpush1.msra.mxu0 %v38_v43  ;;  %372 = vmatprep.subr.mxu1 %v208_v56 }
  0x1e   :  { %106 = vmatprep.subr.mxu0 %v37_v45  ;;  %373 = vmatpush3.msra.mxu1 %v192_v57  ;;  %v349_v45 = vld [vmem:[%s666_s4] ss:$0 sm:$0xff] }
  0x1f   :  { %107 = vmatpush1.msra.mxu0 %v36_v47  ;;  %374 = vmatprep.subr.mxu1 %v207_v62 }
  0x20   :  { %108 = vmatprep.subr.mxu0 %v35_v49  ;;  %375 = vmatpush3.msra.mxu1 %v191_v63 }
  0x21   :  { %109 = vmatpush1.msra.mxu0 %v34_v51  ;;  %376 = vmatprep.subr.mxu1 %v206_v0 }
  0x22   :  { %143 = vmatmul.mubr.f32.vlgmr.msra.gmra.mxu0 %v29_v53  ;;  %377 = vmatpush3.msra.mxu1 %v190_v1 }
  0x23   :  { %148 = vmatprep.mubr.f32.mxu0 %v398_v3  ;;  %378 = vmatprep.subr.mxu1 %v205_v2 }
  0x26   :  { %149 = vmatmul.mubr.f32.gmra.mxu0 %v30_v58 }
  0x27   :  { %154 = vmatprep.mubr.f32.mxu0 %v398_v3 }
  0x2a   :  { %155 = vmatmul.mubr.f32.gmra.mxu0 %v31_v59 }
  0x2b   :  { %160 = vmatprep.mubr.f32.mxu0 %v398_v3 }
  0x2e   :  { %161 = vmatmul.mubr.f32.gmra.mxu0 %v32_v60 }
  0x2f   :  { %166 = vmatprep.mubr.f32.mxu0 %v398_v3  ;;  %v189_v3 = vld [vmem:[%s663_s3 + $0x8] sm:$0xff] }
  0x30   :  { %379 = vmatpush3.msra.mxu1 %v189_v3 }
  0x31   :  { %380 = vmatprep.subr.mxu1 %v204_v4 }
  0x32   :  { %167 = vmatmul.mubr.f32.gmra.mxu0 %v33_v61  ;;  %381 = vmatpush3.msra.mxu1 %v188_v5 }
  0xe2   :  { %v144_v13 = vpop.f32.mrf.mxu0 }
  0xe3   :  { %v145_v14 = vadd.f32 %v144_v13, %v71_v11 }
  0xe4   :  { %v146_v15 = vpop.f32.mrf.mxu0 }
  0xe5   :  { %v147_v16 = vadd.f32 %v146_v15, %v75_v12  ;;  %v173_v19 = vmax.f32 %v145_v14, 0.0 }
  0xe6   :  { %v150_v17 = vpop.f32.mrf.mxu0 }
  0xe7   :  { %v174_v18 = vmax.f32 %v147_v16, 0.0  ;;  %v151_v20 = vadd.f32 %v150_v17, %v71_v11 }
  0xe8   :  { %v152_v21 = vpop.f32.mrf.mxu0 }
  0xe9   :  { %v153_v22 = vadd.f32 %v152_v21, %v75_v12  ;;  %284 = vmatprep.mubr.f32.mxu1 %v174_v18  ;;  %v175_v25 = vmax.f32 %v151_v20, 0.0 }
  0xea   :  { %v156_v23 = vpop.f32.mrf.mxu0  ;;  %285 = vmatmul.mubr.f32.vlgmr.msra.gmra.mxu1 %v173_v19 }
  0xeb   :  { %v176_v24 = vmax.f32 %v153_v22, 0.0  ;;  %v157_v26 = vadd.f32 %v156_v23, %v71_v11 }
  0xec   :  { %v158_v27 = vpop.f32.mrf.mxu0 }
  0xed   :  { %v159_v28 = vadd.f32 %v158_v27, %v75_v12  ;;  %289 = vmatprep.mubr.f32.mxu1 %v176_v24  ;;  %v177_v31 = vmax.f32 %v157_v26, 0.0 }
  0xee   :  { %v162_v29 = vpop.f32.mrf.mxu0  ;;  %290 = vmatmul.mubr.f32.gmra.mxu1 %v175_v25 }
  0xef   :  { %v178_v30 = vmax.f32 %v159_v28, 0.0  ;;  %v163_v32 = vadd.f32 %v162_v29, %v71_v11 }
  0xf0   :  { %v164_v33 = vpop.f32.mrf.mxu0 }
  0xf1   :  { %v165_v34 = vadd.f32 %v164_v33, %v75_v12  ;;  %294 = vmatprep.mubr.f32.mxu1 %v178_v30  ;;  %v179_v37 = vmax.f32 %v163_v32, 0.0 }
  0xf2   :  { %v168_v35 = vpop.f32.mrf.mxu0  ;;  %295 = vmatmul.mubr.f32.gmra.mxu1 %v177_v31 }
  0xf3   :  { %v180_v36 = vmax.f32 %v165_v34, 0.0  ;;  %v169_v38 = vadd.f32 %v168_v35, %v71_v11 }
  0xf4   :  { %v170_v39 = vpop.f32.mrf.mxu0 }
  0xf5   :  { %v171_v40 = vadd.f32 %v170_v39, %v75_v12  ;;  %299 = vmatprep.mubr.f32.mxu1 %v180_v36  ;;  %v181_v42 = vmax.f32 %v169_v38, 0.0 }
  0xf6   :  { %300 = vmatmul.mubr.f32.gmra.mxu1 %v179_v37 }
  0xf7   :  { %v182_v41 = vmax.f32 %v171_v40, 0.0 }
  0xf9   :  { %304 = vmatprep.mubr.f32.mxu1 %v182_v41 }
  0xfa   :  { %305 = vmatmul.mubr.f32.gmra.mxu1 %v181_v42 }
 0x1aa   :  { %v382_v43 = vpop.f32.mrf.mxu1 }
 0x1ac   :  { %v383_v44 = vpop.f32.mrf.mxu1 }
 0x1ad   :  { %v384_v46 = vadd.f32 %v383_v44, %v382_v43 }
 0x1ae   :  { %v385_v47 = vpop.f32.mrf.mxu1 }
 0x1af   :  { %v335_v48 = vadd.f32 %v384_v46, %v349_v45 }
 0x1b0   :  { %v386_v49 = vpop.f32.mrf.mxu1 }
 0x1b1   :  { %340 = vst [vmem:[%s667_s5] sm:$0xff] %v335_v48  ;;  %v387_v50 = vadd.f32 %v386_v49, %v385_v47 }
 0x1b2   :  { %v388_v51 = vpop.f32.mrf.mxu1 }
 0x1b3   :  { %v336_v52 = vadd.f32 %v387_v50, %v349_v45 }
 0x1b4   :  { %v389_v53 = vpop.f32.mrf.mxu1 }
 0x1b5   :  { %341 = vst [vmem:[%s667_s5 + $0x8] sm:$0xff] %v336_v52  ;;  %v390_v54 = vadd.f32 %v389_v53, %v388_v51 }
 0x1b6   :  { %v391_v55 = vpop.f32.mrf.mxu1 }
 0x1b7   :  { %v337_v56 = vadd.f32 %v390_v54, %v349_v45 }
 0x1b8   :  { %v392_v57 = vpop.f32.mrf.mxu1 }
 0x1b9   :  { %342 = vst [vmem:[%s667_s5 + $0x10] sm:$0xff] %v337_v56  ;;  %v393_v58 = vadd.f32 %v392_v57, %v391_v55 }
 0x1ba   :  { %v394_v59 = vpop.f32.mrf.mxu1 }
 0x1bb   :  { %v338_v60 = vadd.f32 %v393_v58, %v349_v45 }
 0x1bc   :  { %v395_v61 = vpop.f32.mrf.mxu1 }
 0x1bd   :  { %343 = vst [vmem:[%s667_s5 + $0x18] sm:$0xff] %v338_v60  ;;  %v396_v62 = vadd.f32 %v395_v61, %v394_v59 }
 0x1bf   :  { %v339_v63 = vadd.f32 %v396_v62, %v349_v45 }
 0x1c1   :  { %344 = vst [vmem:[%s667_s5 + $0x20] sm:$0xff] %v339_v63 }

// kernel: ummt_forward.53
= control target key start
LH: loop header
LB: loop body
LE: loop exit
PB: predicated region body
PF: predicated region fallthrough
CT: control target
= control target key end

     0   :  { %v187_v3 = vmov 0.0   ;;  %v51_v36 = vlaneseq  ;;  %s337_s1 = inlined_call_operand.vmem [shape: f32[128,256], index: 1, kind: input, shape index: {}]   ;;  %s338_s0 = inlined_call_operand.vmem [shape: f32[24,128], index: 0, kind: input, shape index: {}]   ;;  %s339_s2 = inlined_call_operand.vmem [shape: f32[1,256], index: 2, kind: input, shape index: {}]   ;;  %s340_s3 = inlined_call_operand.vmem [shape: f32[24,256], index: 3, kind: output, shape index: {}]  }
   0x1   :  { %v48_v0 = vld [vmem:[%s337_s1 + $0xf8] sm:$0xff]  ;;  %v47_v1 = vld [vmem:[%s337_s1 + $0xf0] sm:$0xff]  ;;  %v46_v2 = vld [vmem:[%s337_s1 + $0xe8] sm:$0xff]  ;;  %131 = vmatprep.mubr.f32.mxu1 %v187_v3  ;;  %125 = vmatprep.mubr.f32.mxu0 %v187_v3 }
   0x2   :  { %154 = vmatprep.subr.mxu1 %v48_v0  ;;  %61 = vmatprep.subr.mxu0 %v48_v0  ;;  %v45_v4 = vld [vmem:[%s337_s1 + $0xe0] sm:$0xff]  ;;  %v44_v5 = vld [vmem:[%s337_s1 + $0xd8] sm:$0xff]  ;;  %v43_v6 = vld [vmem:[%s337_s1 + $0xd0] sm:$0xff]  ;;  %v52_v37 = vshrl.u32 %v51_v36, 7 }
   0x3   :  { %170 = vmatpush1.msra.mxu1 %v47_v1  ;;  %62 = vmatpush1.msra.mxu0 %v47_v1  ;;  %v42_v7 = vld [vmem:[%s337_s1 + $0xc8] sm:$0xff]  ;;  %v41_v8 = vld [vmem:[%s337_s1 + $0xc0] sm:$0xff]  ;;  %v40_v9 = vld [vmem:[%s337_s1 + $0xb8] sm:$0xff] }
   0x4   :  { %155 = vmatprep.subr.mxu1 %v46_v2  ;;  %63 = vmatprep.subr.mxu0 %v46_v2  ;;  %v39_v10 = vld [vmem:[%s337_s1 + $0xb0] sm:$0xff]  ;;  %v38_v11 = vld [vmem:[%s337_s1 + $0xa8] sm:$0xff]  ;;  %v37_v12 = vld [vmem:[%s337_s1 + $0xa0] sm:$0xff]  ;;  %v53_v38 = vsub.s32 0, %v52_v37  ;;  %v57_v40 = vsub.s32 1, %v52_v37 }
   0x5   :  { %171 = vmatpush1.msra.mxu1 %v45_v4  ;;  %64 = vmatpush1.msra.mxu0 %v45_v4  ;;  %v36_v13 = vld [vmem:[%s337_s1 + $0x98] sm:$0xff]  ;;  %v35_v14 = vld [vmem:[%s337_s1 + $0x90] sm:$0xff]  ;;  %v34_v15 = vld [vmem:[%s337_s1 + $0x88] sm:$0xff] }
   0x6   :  { %156 = vmatprep.subr.mxu1 %v44_v5  ;;  %65 = vmatprep.subr.mxu0 %v44_v5  ;;  %v33_v16 = vld [vmem:[%s337_s1 + $0x80] sm:$0xff]  ;;  %v32_v17 = vld [vmem:[%s337_s1 + $0x78] sm:$0xff]  ;;  %v31_v18 = vld [vmem:[%s337_s1 + $0x70] sm:$0xff] }
   0x7   :  { %172 = vmatpush1.msra.mxu1 %v43_v6  ;;  %66 = vmatpush1.msra.mxu0 %v43_v6  ;;  %v30_v19 = vld [vmem:[%s337_s1 + $0x68] sm:$0xff]  ;;  %v29_v20 = vld [vmem:[%s337_s1 + $0x60] sm:$0xff]  ;;  %v28_v21 = vld [vmem:[%s337_s1 + $0x58] sm:$0xff] }
   0x8   :  { %157 = vmatprep.subr.mxu1 %v42_v7  ;;  %67 = vmatprep.subr.mxu0 %v42_v7  ;;  %v27_v22 = vld [vmem:[%s337_s1 + $0x50] sm:$0xff]  ;;  %v26_v23 = vld [vmem:[%s337_s1 + $0x48] sm:$0xff]  ;;  %v25_v24 = vld [vmem:[%s337_s1 + $0x40] sm:$0xff] }
   0x9   :  { %173 = vmatpush1.msra.mxu1 %v41_v8  ;;  %68 = vmatpush1.msra.mxu0 %v41_v8  ;;  %v24_v25 = vld [vmem:[%s337_s1 + $0x38] sm:$0xff]  ;;  %v23_v26 = vld [vmem:[%s337_s1 + $0x30] sm:$0xff]  ;;  %v22_v27 = vld [vmem:[%s337_s1 + $0x28] sm:$0xff] }
   0xa   :  { %158 = vmatprep.subr.mxu1 %v40_v9  ;;  %69 = vmatprep.subr.mxu0 %v40_v9  ;;  %v21_v28 = vld [vmem:[%s337_s1 + $0x20] sm:$0xff]  ;;  %v20_v29 = vld [vmem:[%s337_s1 + $0x18] sm:$0xff]  ;;  %v19_v30 = vld [vmem:[%s337_s1 + $0x10] sm:$0xff] }
   0xb   :  { %174 = vmatpush1.msra.mxu1 %v39_v10  ;;  %70 = vmatpush1.msra.mxu0 %v39_v10  ;;  %v18_v31 = vld [vmem:[%s337_s1 + $0x8] sm:$0xff]  ;;  %v17_v32 = vld [vmem:[%s337_s1] sm:$0xff]  ;;  %v16_v35 = vld [vmem:[%s338_s0 + $0x10] sm:$0xff] }
   0xc   :  { %159 = vmatprep.subr.mxu1 %v38_v11  ;;  %71 = vmatprep.subr.mxu0 %v38_v11  ;;  %v15_v33 = vld [vmem:[%s338_s0 + $0x8] sm:$0xff]  ;;  %v14_v34 = vld [vmem:[%s338_s0] sm:$0xff] }
   0xd   :  { %175 = vmatpush1.msra.mxu1 %v37_v12  ;;  %72 = vmatpush1.msra.mxu0 %v37_v12  ;;  %v49_v39 = vld [vmem:[%s339_s2] sm:$0x3] }
   0xe   :  { %160 = vmatprep.subr.mxu1 %v36_v13  ;;  %73 = vmatprep.subr.mxu0 %v36_v13  ;;  %v54_v41 = vrot.slane %v49_v39, %v53_v38  ;;  %v58_v42 = vrot.slane %v49_v39, %v57_v40 }
   0xf   :  { %176 = vmatpush1.msra.mxu1 %v35_v14  ;;  %74 = vmatpush1.msra.mxu0 %v35_v14 }
  0x10   :  { %161 = vmatprep.subr.mxu1 %v34_v15  ;;  %75 = vmatprep.subr.mxu0 %v34_v15 }
  0x11   :  { %177 = vmatpush1.msra.mxu1 %v33_v16  ;;  %76 = vmatpush1.msra.mxu0 %v33_v16 }
  0x12   :  { %162 = vmatprep.subr.mxu1 %v32_v17  ;;  %77 = vmatprep.subr.mxu0 %v32_v17 }
  0x13   :  { %178 = vmatpush1.msra.mxu1 %v31_v18  ;;  %78 = vmatpush1.msra.mxu0 %v31_v18 }
  0x14   :  { %163 = vmatprep.subr.mxu1 %v30_v19  ;;  %79 = vmatprep.subr.mxu0 %v30_v19 }
  0x15   :  { %179 = vmatpush1.msra.mxu1 %v29_v20  ;;  %80 = vmatpush1.msra.mxu0 %v29_v20 }
  0x16   :  { %164 = vmatprep.subr.mxu1 %v28_v21  ;;  %81 = vmatprep.subr.mxu0 %v28_v21 }
  0x17   :  { %180 = vmatpush1.msra.mxu1 %v27_v22  ;;  %82 = vmatpush1.msra.mxu0 %v27_v22 }
  0x18   :  { %165 = vmatprep.subr.mxu1 %v26_v23  ;;  %83 = vmatprep.subr.mxu0 %v26_v23 }
  0x19   :  { %181 = vmatpush1.msra.mxu1 %v25_v24  ;;  %84 = vmatpush1.msra.mxu0 %v25_v24 }
  0x1a   :  { %166 = vmatprep.subr.mxu1 %v24_v25  ;;  %85 = vmatprep.subr.mxu0 %v24_v25 }
  0x1b   :  { %182 = vmatpush1.msra.mxu1 %v23_v26  ;;  %86 = vmatpush1.msra.mxu0 %v23_v26 }
  0x1c   :  { %167 = vmatprep.subr.mxu1 %v22_v27  ;;  %87 = vmatprep.subr.mxu0 %v22_v27 }
  0x1d   :  { %183 = vmatpush1.msra.mxu1 %v21_v28  ;;  %88 = vmatpush1.msra.mxu0 %v21_v28 }
  0x1e   :  { %168 = vmatprep.subr.mxu1 %v20_v29  ;;  %89 = vmatprep.subr.mxu0 %v20_v29 }
  0x1f   :  { %184 = vmatpush1.msra.mxu1 %v19_v30  ;;  %90 = vmatpush1.msra.mxu0 %v19_v30 }
  0x20   :  { %169 = vmatprep.subr.mxu1 %v18_v31  ;;  %91 = vmatprep.subr.mxu0 %v18_v31 }
  0x21   :  { %185 = vmatpush1.msra.mxu1 %v17_v32  ;;  %92 = vmatpush1.msra.mxu0 %v17_v32 }
  0x22   :  { %132 = vmatmul.mubr.f32.vlgmr.msra.gmra.mxu1 %v15_v33  ;;  %126 = vmatmul.mubr.f32.vlgmr.msra.gmra.mxu0 %v14_v34 }
  0x23   :  { %137 = vmatprep.mubr.f32.mxu1 %v187_v3 }
  0x26   :  { %138 = vmatmul.mubr.f32.gmra.mxu1 %v16_v35 }
  0xe2   :  { %v133_v43 = vpop.f32.mrf.mxu1  ;;  %v127_v44 = vpop.f32.mrf.mxu0 }
  0xe3   :  { %v134_v45 = vadd.f32 %v133_v43, %v54_v41  ;;  %v128_v46 = vadd.f32 %v127_v44, %v54_v41 }
  0xe4   :  { %v135_v47 = vpop.f32.mrf.mxu1  ;;  %v129_v48 = vpop.f32.mrf.mxu0 }
  0xe5   :  { %146 = vst [vmem:[%s340_s3 + $0x10] sm:$0xff] %v134_v45  ;;  %144 = vst [vmem:[%s340_s3] sm:$0xff] %v128_v46  ;;  %v136_v49 = vadd.f32 %v135_v47, %v58_v42  ;;  %v130_v50 = vadd.f32 %v129_v48, %v58_v42 }
  0xe6   :  { %v139_v51 = vpop.f32.mrf.mxu1 }
  0xe7   :  { %147 = vst [vmem:[%s340_s3 + $0x18] sm:$0xff] %v136_v49  ;;  %145 = vst [vmem:[%s340_s3 + $0x8] sm:$0xff] %v130_v50  ;;  %v140_v52 = vadd.f32 %v139_v51, %v54_v41 }
  0xe8   :  { %v141_v53 = vpop.f32.mrf.mxu1 }
  0xe9   :  { %148 = vst [vmem:[%s340_s3 + $0x20] sm:$0xff] %v140_v52  ;;  %v142_v54 = vadd.f32 %v141_v53, %v58_v42 }
  0xeb   :  { %149 = vst [vmem:[%s340_s3 + $0x28] sm:$0xff] %v142_v54 }

// kernel: ummt_forward.49
= control target key start
LH: loop header
LB: loop body
LE: loop exit
PB: predicated region body
PF: predicated region fallthrough
CT: control target
= control target key end

     0   :  { %s1118_s12 = smov 0   ;;  %s1195_s0 = inlined_call_operand.vmem [shape: f32[68,2,32], index: 0, kind: input, shape index: {}]   ;;  %s1196_s1 = inlined_call_operand.vmem [shape: f32[68,2,32], index: 1, kind: input, shape index: {}]   ;;  %s1197_s2 = inlined_call_operand.vmem [shape: f32[68,2,32], index: 2, kind: input, shape index: {}]   ;;  %s1198_s3 = inlined_call_operand.vmem [shape: f32[68,2,32], index: 3, kind: output, shape index: {}]  }
   0x1 LB: > { %s975_s13 = sadd.s32 4294967295, %s1094_s12   ;;  %p979_p0 = scmp.ge.s32.totalorder %s1094_s12, 1  ;;  %s1094_s12 = sphi %s1118_s12, %s13_s12  }
   0x2   : > { %p160_p1 = scmp.lt.s32.totalorder %s1094_s12, 18 }
   0x4   : > { %p161_p2 = pnand %p979_p0, %p160_p1 }
   0x5   : > { %s980_s14 = sshll.u32 (!%p161_p2), %s975_s13, 2 }
   0x6   : > { %164 = sbr.rel (%p161_p2) target bundleno = 728 (0x2d8), region = 32  ;;  %p195_p3 = scmp.lt.s32.totalorder (!%p161_p2), %s980_s14, 67 }
   0xb   : > { %v1096_v0 = vmov 0.0   ;;  %vm1097_vm0 = vmmov 0   ;;  %s1200_s14 = smov (!%p195_p3, %s980_s14), 67  ;;  %vm230_vm1 = vcmask 261120   ;;  %vm539_vm2 = vcmask 9216  }
   0xc   : > { %1022 = vmatprep.subr.mxu0 %v1096_v0  ;;  %1024 = vmatprep.mubr.msk.f32.mxu0 %vm1097_vm0, %v1096_v0  ;;  %s1132_s15 = sshll.u32 %s1200_s14, 1  ;;  %vm588_vm3 = vcmask 1041408   ;;  %vm584_vm4 = vcmask 15360   ;;  %vm890_vm5 = vcmask 254976  }
   0xd   : > { %1027 = vmatprep.subr.mxu1 %v1096_v0  ;;  %1029 = vmatprep.mubr.msk.f32.mxu1 %vm1097_vm0, %v1096_v0  ;;  %s204_s18 = scalar_lea.vmem %s1196_s1, %s1132_s15  ;;  %s198_s21 = scalar_lea.vmem %s1195_s0, %s1132_s15 }
   0xe   : > { %v222_v1 = vld [vmem:[%s204_s18] sm:$0x3]  ;;  %v223_v2 = vld [vmem:[%s204_s18 + $0x2] sm:$0x3]  ;;  %v224_v5 = vld [vmem:[%s204_s18 + $0x4] sm:$0x3]  ;;  %s210_s24 = scalar_lea.vmem %s1197_s2, %s1132_s15  ;;  %s216_s27 = scalar_lea.vmem %s1198_s3, %s1132_s15 }
   0xf   : > { %1023 = vmatpush3.xpose.msk.msra.mxu0 %vm230_vm1, %v222_v1  ;;  %v218_v3 = vld [vmem:[%s198_s21] sm:$0x3]  ;;  %1028 = vmatpush3.xpose.msk.msra.mxu1 %vm230_vm1, %v223_v2  ;;  %v219_v4 = vld [vmem:[%s198_s21 + $0x2] sm:$0x3]  ;;  %v225_v6 = vld [vmem:[%s204_s18 + $0x6] sm:$0x3] }
  0x10   : > { %1032 = vmatprep.subr.mxu0 %v1096_v0  ;;  %1037 = vmatprep.subr.mxu1 %v1096_v0  ;;  %v220_v7 = vld [vmem:[%s198_s21 + $0x4] sm:$0x3]  ;;  %v221_v8 = vld [vmem:[%s198_s21 + $0x6] sm:$0x3]  ;;  %v226_v45 = vld [vmem:[%s210_s24] sm:$0x3] }
  0x11   : > { %v227_v46 = vld [vmem:[%s210_s24 + $0x2] sm:$0x3]  ;;  %v228_v53 = vld [vmem:[%s210_s24 + $0x4] sm:$0x3]  ;;  %v229_v57 = vld [vmem:[%s210_s24 + $0x6] sm:$0x3] }
  0x12   : > { %1025 = vmatmul.mubr.msk.f32.vlgmr.msra.gmra.mxu0 %vm230_vm1, %v218_v3  ;;  %1030 = vmatmul.mubr.msk.f32.vlgmr.msra.gmra.mxu1 %vm230_vm1, %v219_v4 }
  0x13   : > { %1033 = vmatpush3.xpose.msk.msra.mxu0 %vm230_vm1, %v224_v5  ;;  %1034 = vmatprep.mubr.msk.f32.mxu0 %vm1097_vm0, %v1096_v0 }
  0x14   : > { %1038 = vmatpush3.xpose.msk.msra.mxu1 %vm230_vm1, %v225_v6  ;;  %1039 = vmatprep.mubr.msk.f32.mxu1 %vm1097_vm0, %v1096_v0 }
  0x15   : > { %1042 = vmatprep.subr.mxu0 %v1096_v0  ;;  %1047 = vmatprep.subr.mxu1 %v1096_v0 }
  0x16   : > { %1035 = vmatmul.mubr.msk.f32.vlgmr.msra.gmra.mxu0 %vm230_vm1, %v220_v7 }
  0x17   : > { %1040 = vmatmul.mubr.msk.f32.vlgmr.msra.gmra.mxu1 %vm230_vm1, %v221_v8  ;;  %1044 = vmatprep.mubr.msk.f32.mxu0 %vm1097_vm0, %v1096_v0 }
  0x18   : > { %1049 = vmatprep.mubr.msk.f32.mxu1 %vm1097_vm0, %v1096_v0  ;;  %1043 = vmatpush3.msk.msra.mxu0 %vm588_vm3, %v226_v45 }
  0x19   : > { %1052 = vmatprep.subr.mxu0 %v1096_v0  ;;  %1048 = vmatpush3.msk.msra.mxu1 %vm588_vm3, %v227_v46 }
  0x1a   : > { %1057 = vmatprep.subr.mxu1 %v1096_v0 }
  0xd2   : > { %v303_v9 = vpop.f32.mrf.mxu0  ;;  %v379_v10 = vpop.f32.mrf.mxu1 }
  0xd3   : > { %v535_v11 = vmul.f32 0.17677669, %v303_v9  ;;  %v536_v12 = vmul.f32 0.17677669, %v379_v10 }
  0xd4   : > { %v1026_v13 = vpop.f32.mrf.mxu0  ;;  %v1031_v14 = vpop.f32.mrf.mxu1 }
  0xd5   : > { %v540_v15 = vsel %vm539_vm2, %v535_v11, -inf  ;;  %v543_v19 = vsel %vm539_vm2, %v536_v12, -inf }
  0xd6   : > { %541 = vmax.xlane.f32.xlu0 %v540_v15  ;;  %v455_v16 = vpop.f32.mrf.mxu0 }
  0xd7   : > { %v537_v17 = vmul.f32 0.17677669, %v455_v16  ;;  %v531_v18 = vpop.f32.mrf.mxu1 }
  0xd8   : > { %v1036_v20 = vpop.f32.mrf.mxu0  ;;  %v538_v21 = vmul.f32 0.17677669, %v531_v18 }
  0xd9   : > { %v546_v22 = vsel %vm539_vm2, %v537_v17, -inf  ;;  %v1041_v23 = vpop.f32.mrf.mxu1 }
  0xda   : > { %544 = vmax.xlane.f32.xlu0 %v543_v19  ;;  %547 = vmax.xlane.f32.xlu1 %v546_v22  ;;  %v549_v24 = vsel %vm539_vm2, %v538_v21, -inf }
  0xde   : > { %550 = vmax.xlane.f32.xlu1 %v549_v24 }
 0x15f   : > { %v542_v25 = vpop.xlane.xlu0 %541 }
 0x160   : > { %v552_v26 = vsub.f32 %v535_v11, %v542_v25 }
 0x162   : > { %v556_v27 = vmul.f32 1.442695, %v552_v26 }
 0x163   : > { %v545_v28 = vpop.xlane.xlu0 %544  ;;  %v548_v29 = vpop.xlane.xlu1 %547 }
 0x164   : > { %1072 = vpow2.f32 %v556_v27  ;;  %v553_v30 = vsub.f32 %v536_v12, %v545_v28  ;;  %v554_v31 = vsub.f32 %v537_v17, %v548_v29 }
 0x166   : > { %v558_v32 = vmul.f32 1.442695, %v553_v30  ;;  %v560_v33 = vmul.f32 1.442695, %v554_v31 }
 0x167   : > { %v551_v34 = vpop.xlane.xlu1 %550 }
 0x168   : > { %1074 = vpow2.f32 %v558_v32  ;;  %v555_v35 = vsub.f32 %v538_v21, %v551_v34 }
 0x169   : > { %1076 = vpow2.f32 %v560_v33 }
 0x16a   : > { %v562_v36 = vmul.f32 1.442695, %v555_v35 }
 0x16c   : > { %1078 = vpow2.f32 %v562_v36 }
 0x171   : > { %v1073_v37 = vpop.eup %1072 }
 0x172   : > { %v564_v38 = vsel %vm539_vm2, %v1073_v37, 0.0 }
 0x173   : > { %565 = vadd.xlane.f32.xlu0 %v564_v38 }
 0x175   : > { %v1075_v39 = vpop.eup %1074 }
 0x176   : > { %v1077_v40 = vpop.eup %1076  ;;  %v567_v41 = vsel %vm539_vm2, %v1075_v39, 0.0 }
 0x177   : > { %568 = vadd.xlane.f32.xlu1 %v567_v41  ;;  %v570_v42 = vsel %vm539_vm2, %v1077_v40, 0.0 }
 0x178   : > { %571 = vadd.xlane.f32.xlu0 %v570_v42 }
 0x179   : > { %v1079_v43 = vpop.eup %1078 }
 0x17a   : > { %v573_v44 = vsel %vm539_vm2, %v1079_v43, 0.0 }
 0x17b   : > { %574 = vadd.xlane.f32.xlu1 %v573_v44 }
 0x1fc   : > { %v566_v47 = vpop.xlane.xlu0 %565 }
 0x1fd   : > { %1080 = vrcp.f32 %v566_v47 }
 0x200   : > { %v569_v48 = vpop.xlane.xlu1 %568 }
 0x201   : > { %v572_v49 = vpop.xlane.xlu0 %571  ;;  %1082 = vrcp.f32 %v569_v48 }
 0x202   : > { %1084 = vrcp.f32 %v572_v49 }
 0x204   : > { %v575_v50 = vpop.xlane.xlu1 %574 }
 0x205   : > { %1086 = vrcp.f32 %v575_v50 }
 0x20a   : > { %v1081_v51 = vpop.eup %1080 }
 0x20b   : > { %v577_v52 = vmul.f32 %v1081_v51, %v1073_v37 }
 0x20d   : > { %1045 = vmatmul.mubr.msk.f32.vlgmr.msra.gmra.mxu0 %vm584_vm4, %v577_v52 }
 0x20e   : > { %v1083_v54 = vpop.eup %1082  ;;  %1053 = vmatpush3.msk.msra.mxu0 %vm588_vm3, %v228_v53  ;;  %1054 = vmatprep.mubr.msk.f32.mxu0 %vm1097_vm0, %v1096_v0 }
 0x20f   : > { %v1085_v55 = vpop.eup %1084  ;;  %v579_v56 = vmul.f32 %v1083_v54, %v1075_v39 }
 0x210   : > { %v581_v58 = vmul.f32 %v1085_v55, %v1077_v40 }
 0x211   : > { %1050 = vmatmul.mubr.msk.f32.vlgmr.msra.gmra.mxu1 %vm584_vm4, %v579_v56 }
 0x212   : > { %v1087_v59 = vpop.eup %1086  ;;  %1055 = vmatmul.mubr.msk.f32.vlgmr.msra.gmra.mxu0 %vm584_vm4, %v581_v58  ;;  %1058 = vmatpush3.msk.msra.mxu1 %vm588_vm3, %v229_v57 }
 0x213   : > { %1059 = vmatprep.mubr.msk.f32.mxu1 %vm1097_vm0, %v1096_v0  ;;  %v583_v60 = vmul.f32 %v1087_v59, %v1079_v43 }
 0x215   : > { %1060 = vmatmul.mubr.msk.f32.vlgmr.msra.gmra.mxu1 %vm584_vm4, %v583_v60 }
 0x2cd   : > { %v658_v61 = vpop.f32.mrf.mxu0 }
 0x2ce   : > { %891 = vst.msk [vmem:[%s216_s27] sm:$0x3] %vm890_vm5, %v658_v61 }
 0x2cf   : > { %v1046_v62 = vpop.f32.mrf.mxu0 }
 0x2d1   : > { %v734_v63 = vpop.f32.mrf.mxu1 }
 0x2d2   : > { %892 = vst.msk [vmem:[%s216_s27 + $0x2] sm:$0x3] %vm890_vm5, %v734_v63  ;;  %v810_v1 = vpop.f32.mrf.mxu0 }
 0x2d3   : > { %893 = vst.msk [vmem:[%s216_s27 + $0x4] sm:$0x3] %vm890_vm5, %v810_v1  ;;  %v1051_v2 = vpop.f32.mrf.mxu1 }
 0x2d4   : > { %v1056_v3 = vpop.f32.mrf.mxu0 }
 0x2d5   : > { %v886_v4 = vpop.f32.mrf.mxu1 }
 0x2d6   : > { %894 = vst.msk [vmem:[%s216_s27 + $0x6] sm:$0x3] %vm890_vm5, %v886_v4 }
 0x2d7   : > { %v1061_v0 = vpop.f32.mrf.mxu1 }
 0x2d8 PF: > { %s13_s12 = sadd.s32 1, %s1094_s12  }
 0x2d9   : > { %p10_p4 = scmp.ge.s32.totalorder %s13_s12, 19  }
 0x2db   :  { %12 = sbr.rel (!%p10_p4) target bundleno = 1 (0x1), region = 68 }

// kernel: ummt_forward.54
= control target key start
LH: loop header
LB: loop body
LE: loop exit
PB: predicated region body
PF: predicated region fallthrough
CT: control target
= control target key end

     0   :  { %s786_s12 = smov 0   ;;  %s844_s0 = inlined_call_operand.vmem [shape: f32[68,2,32], index: 0, kind: input, shape index: {}]   ;;  %s845_s1 = inlined_call_operand.vmem [shape: f32[68,1,32], index: 1, kind: input, shape index: {}]   ;;  %s846_s2 = inlined_call_operand.vmem [shape: f32[68,1,32], index: 2, kind: input, shape index: {}]   ;;  %s847_s3 = inlined_call_operand.vmem [shape: f32[68,2,32], index: 3, kind: output, shape index: {}]  }
   0x1 LB: > { %s677_s13 = sadd.s32 4294967295, %s762_s12   ;;  %p681_p0 = scmp.ge.s32.totalorder %s762_s12, 1  ;;  %s762_s12 = sphi %s786_s12, %s13_s12  }
   0x2   : > { %p158_p1 = scmp.lt.s32.totalorder %s762_s12, 18 }
   0x4   : > { %p159_p2 = pnand %p681_p0, %p158_p1 }
   0x5   : > { %s682_s14 = sshll.u32 (!%p159_p2), %s677_s13, 2 }
   0x6   : > { %162 = sbr.rel (%p159_p2) target bundleno = 396 (0x18c), region = 32  ;;  %p191_p3 = scmp.lt.s32.totalorder (!%p159_p2), %s682_s14, 67 }
   0xb   : > { %s849_s14 = smov (!%p191_p3, %s682_s14), 67  ;;  %vm231_vm0 = vcmask 254976   ;;  %vm297_vm1 = vcmask 1040384   ;;  %v764_v16 = vmov 0.0   ;;  %vm765_vm2 = vmmov 0  }
   0xc   : > { %s683_s15 = sshll.u32 %s849_s14, 1  ;;  %s199_s18 = scalar_lea.vmem %s845_s1, %s849_s14  ;;  %710 = vmatprep.subr.mxu0 %v764_v16  ;;  %712 = vmatprep.mubr.msk.f32.mxu0 %vm765_vm2, %v764_v16  ;;  %vm293_vm3 = vcmask 7168  }
   0xd   : > { %s194_s21 = scalar_lea.vmem %s844_s0, %s683_s15  ;;  %v690_v0 = vld [vmem:[%s199_s18 + $0x2] ss:$0 sm:$0xff]  ;;  %v688_v1 = vld [vmem:[%s199_s18] ss:$0 sm:$0xff]  ;;  %v691_v2 = vld [vmem:[%s199_s18 + $0x3] ss:$0 sm:$0xff]  ;;  %s814_s24 = scalar_lea.vmem %s846_s2, %s849_s14  ;;  %715 = vmatprep.subr.mxu1 %v764_v16  ;;  %717 = vmatprep.mubr.msk.f32.mxu1 %vm765_vm2, %v764_v16 }
   0xe   : > { %v214_v3 = vld [vmem:[%s194_s21 + $0x4] sm:$0x3]  ;;  %v212_v4 = vld [vmem:[%s194_s21] sm:$0x3]  ;;  %v215_v5 = vld [vmem:[%s194_s21 + $0x6] sm:$0x3]  ;;  %s210_s27 = scalar_lea.vmem %s847_s3, %s683_s15 }
   0xf   : > { %v251_v6 = vmul.f32 %v690_v0, %v214_v3  ;;  %v230_v7 = vmul.f32 %v688_v1, %v212_v4  ;;  %v261_v8 = vmul.f32 %v691_v2, %v215_v5  ;;  %v213_v9 = vld [vmem:[%s194_s21 + $0x2] sm:$0x3]  ;;  %v689_v10 = vld [vmem:[%s199_s18 + $0x1] ss:$0 sm:$0xff]  ;;  %v220_v17 = vld [vmem:[%s814_s24] sm:$0x1] }
  0x10   : > { %v241_v11 = vmul.f32 %v689_v10, %v213_v9  ;;  %711 = vmatpush3.msk.msra.mxu0 %vm297_vm1, %v220_v17  ;;  %v221_v18 = vld [vmem:[%s814_s24 + $0x1] sm:$0x1]  ;;  %v222_v41 = vld [vmem:[%s814_s24 + $0x2] sm:$0x1]  ;;  %v223_v46 = vld [vmem:[%s814_s24 + $0x3] sm:$0x1] }
  0x11   : > { %v252_v12 = vsel %vm231_vm0, %v251_v6, 0.0  ;;  %v232_v13 = vsel %vm231_vm0, %v230_v7, 0.0  ;;  %v262_v14 = vsel %vm231_vm0, %v261_v8, 0.0  ;;  %720 = vmatprep.subr.mxu0 %v764_v16  ;;  %716 = vmatpush3.msk.msra.mxu1 %vm297_vm1, %v221_v18 }
  0x12   : > { %253 = vadd.xlane.f32.xlu1 %v252_v12  ;;  %233 = vadd.xlane.f32.xlu0 %v232_v13  ;;  %v242_v15 = vsel %vm231_vm0, %v241_v11, 0.0 }
  0x13   : > { %725 = vmatprep.subr.mxu1 %v764_v16 }
  0x16   : > { %263 = vadd.xlane.f32.xlu1 %v262_v14  ;;  %243 = vadd.xlane.f32.xlu0 %v242_v15 }
  0x9b   : > { %v254_v19 = vpop.xlane.xlu1 %253  ;;  %v234_v20 = vpop.xlane.xlu0 %233 }
  0x9c   : > { %v267_v21 = vmul.f32 0.17677669, %v254_v19  ;;  %v265_v22 = vmul.f32 0.17677669, %v234_v20 }
  0x9e   : > { %v271_v23 = vsub.f32 %v267_v21, %v267_v21  ;;  %v269_v24 = vsub.f32 %v265_v22, %v265_v22 }
  0x9f   : > { %v264_v25 = vpop.xlane.xlu1 %263  ;;  %v244_v26 = vpop.xlane.xlu0 %243 }
  0xa0   : > { %v277_v27 = vmul.f32 1.442695, %v271_v23  ;;  %v273_v28 = vmul.f32 1.442695, %v269_v24  ;;  %v268_v29 = vmul.f32 0.17677669, %v264_v25 }
  0xa1   : > { %v266_v30 = vmul.f32 0.17677669, %v244_v26 }
  0xa2   : > { %740 = vpow2.f32 %v277_v27  ;;  %v272_v31 = vsub.f32 %v268_v29, %v268_v29 }
  0xa3   : > { %742 = vpow2.f32 %v273_v28  ;;  %v270_v32 = vsub.f32 %v266_v30, %v266_v30 }
  0xa4   : > { %v279_v33 = vmul.f32 1.442695, %v272_v31 }
  0xa5   : > { %v275_v34 = vmul.f32 1.442695, %v270_v32 }
  0xa6   : > { %744 = vpow2.f32 %v279_v33 }
  0xa7   : > { %746 = vpow2.f32 %v275_v34 }
  0xaf   : > { %v741_v35 = vpop.eup %740 }
  0xb0   : > { %v743_v36 = vpop.eup %742 }
  0xb1   : > { %748 = vrcp.f32 %v743_v36 }
  0xb2   : > { %750 = vrcp.f32 %v741_v35 }
  0xb3   : > { %v745_v37 = vpop.eup %744 }
  0xb4   : > { %v747_v38 = vpop.eup %746 }
  0xb5   : > { %752 = vrcp.f32 %v747_v38 }
  0xb6   : > { %754 = vrcp.f32 %v745_v37 }
  0xbe   : > { %v749_v39 = vpop.eup %748 }
  0xbf   : > { %v286_v40 = vmul.f32 %v749_v39, %v743_v36  ;;  %v751_v42 = vpop.eup %750 }
  0xc0   : > { %v290_v45 = vmul.f32 %v751_v42, %v741_v35 }
  0xc1   : > { %713 = vmatmul.mubr.msk.f32.vlgmr.msra.gmra.mxu0 %vm293_vm3, %v286_v40 }
  0xc2   : > { %v753_v43 = vpop.eup %752  ;;  %721 = vmatpush3.msk.msra.mxu0 %vm297_vm1, %v222_v41  ;;  %722 = vmatprep.mubr.msk.f32.mxu0 %vm765_vm2, %v764_v16 }
  0xc3   : > { %v288_v44 = vmul.f32 %v753_v43, %v747_v38  ;;  %v755_v47 = vpop.eup %754 }
  0xc4   : > { %v292_v48 = vmul.f32 %v755_v47, %v745_v37 }
  0xc5   : > { %718 = vmatmul.mubr.msk.f32.vlgmr.msra.gmra.mxu1 %vm293_vm3, %v288_v44  ;;  %723 = vmatmul.mubr.msk.f32.vlgmr.msra.gmra.mxu0 %vm293_vm3, %v290_v45 }
  0xc6   : > { %726 = vmatpush3.msk.msra.mxu1 %vm297_vm1, %v223_v46  ;;  %727 = vmatprep.mubr.msk.f32.mxu1 %vm765_vm2, %v764_v16 }
  0xc9   : > { %728 = vmatmul.mubr.msk.f32.vlgmr.msra.gmra.mxu1 %vm293_vm3, %v292_v48 }
 0x181   : > { %v367_v49 = vpop.f32.mrf.mxu0 }
 0x182   : > { %599 = vst.msk [vmem:[%s210_s27] sm:$0x3] %vm231_vm0, %v367_v49 }
 0x183   : > { %v714_v50 = vpop.f32.mrf.mxu0 }
 0x185   : > { %v443_v51 = vpop.f32.mrf.mxu1  ;;  %v519_v52 = vpop.f32.mrf.mxu0 }
 0x186   : > { %600 = vst.msk [vmem:[%s210_s27 + $0x2] sm:$0x3] %vm231_vm0, %v443_v51  ;;  %601 = vst.msk [vmem:[%s210_s27 + $0x4] sm:$0x3] %vm231_vm0, %v519_v52 }
 0x187   : > { %v719_v53 = vpop.f32.mrf.mxu1  ;;  %v724_v54 = vpop.f32.mrf.mxu0 }
 0x189   : > { %v595_v55 = vpop.f32.mrf.mxu1 }
 0x18a   : > { %602 = vst.msk [vmem:[%s210_s27 + $0x6] sm:$0x3] %vm231_vm0, %v595_v55 }
 0x18b   : > { %v729_v56 = vpop.f32.mrf.mxu1 }
 0x18c PF: > { %s13_s12 = sadd.s32 1, %s762_s12  }
 0x18d   : > { %p10_p4 = scmp.ge.s32.totalorder %s13_s12, 19  }
 0x18f   :  { %12 = sbr.rel (!%p10_p4) target bundleno = 1 (0x1), region = 68 }

</bundles_post_ra>
